<compile_context>
chip_gen: v7x
topology: tpu7x:2x2x1
jax: 0.10.0
libtpu: 0.0.40
codegen_flags: <defaults>
</compile_context>

<pallas_src>
import functools

import jax
import jax.numpy as jnp
from jax import lax
from jax.experimental import pallas as pl
from jax.experimental.pallas import tpu as pltpu


# ---------------------------------------------------------------------------
# Generation-dependent scoped-VMEM budget
# ---------------------------------------------------------------------------
def _vmem_limit_bytes():
    """~3/4 of physical VMEM, capped at 100 MiB.
    -> ~48 MiB on v7x (64 MiB physical), ~96-100 MiB on v5e/v6e (128 MiB)."""
    cap = 128 * 1024 * 1024
    try:
        info = pltpu.get_tpu_info()
        cap = int(getattr(info, "vmem_capacity_bytes", cap) or cap)
    except Exception:
        pass
    return int(min(100 * 1024 * 1024, (cap * 3) // 4))


_VMEM_LIMIT = _vmem_limit_bytes()


def _cparams(*sem):
    return pltpu.CompilerParams(dimension_semantics=tuple(sem),
                                vmem_limit_bytes=_VMEM_LIMIT)


# ---------------------------------------------------------------------------
# Pallas kernels
# ---------------------------------------------------------------------------
def _apply_act(y, act):
    if act == "relu":
        return jnp.maximum(y, 0.0)
    if act == "tanh":
        return jnp.tanh(y)
    return y


def _accum_rows_s1(x, w_ref, *, KH, KW, Ho, Wo, Cin):
    """Stride-1 conv as KH matmuls: for each kernel row ki, concatenate the KW
    shifted (Ho,Wo,Cin) windows along channels -> one (Ho*Wo, KW*Cin) @
    (KW*Cin, Cout) MXU matmul (weights are (ki,kj,Cin)-major, so the weight
    block is a contiguous, sublane-aligned row slice). f32 accumulation."""
    Cout = w_ref.shape[1]
    acc = jnp.zeros((Ho * Wo, Cout), jnp.float32)
    for ki in range(KH):
        if KW == 1:
            xs = x[ki:ki + Ho, 0:Wo, :]
        else:
            xs = jnp.concatenate(
                [x[ki:ki + Ho, kj:kj + Wo, :] for kj in range(KW)], axis=-1)
        xs = xs.reshape(Ho * Wo, KW * Cin)
        wt = w_ref[pl.ds(ki * KW * Cin, KW * Cin), :]
        acc = acc + jnp.dot(xs, wt, preferred_element_type=jnp.float32)
    return acc


def _accum_rows_s2(x, w_ref, *, KH, KW, Ho, Wo, Cin):
    """Stride-2 conv over the 4-way even/odd phase-split padded input
    x: (4, Hp/2, Wp/2, Cin). Same per-ki kj-concat grouping as stride 1."""
    Cout = w_ref.shape[1]
    acc = jnp.zeros((Ho * Wo, Cout), jnp.float32)
    for ki in range(KH):
        slabs = []
        for kj in range(KW):
            p = (ki % 2) * 2 + (kj % 2)
            slabs.append(x[p, ki // 2:ki // 2 + Ho, kj // 2:kj // 2 + Wo, :])
        xs = jnp.concatenate(slabs, axis=-1).reshape(Ho * Wo, KW * Cin)
        wt = w_ref[pl.ds(ki * KW * Cin, KW * Cin), :]
        acc = acc + jnp.dot(xs, wt, preferred_element_type=jnp.float32)
    return acc


def _conv_kernel(x_ref, w_ref, s_ref, b_ref, o_ref, *, KH, KW, Ho, Wo, Cin, act):
    """Single stride-1 conv (+ folded BN + activation). Used for the 7x7 stem,
    the 1x1 ConvTranspose matmuls and the 3x3 head."""
    acc = _accum_rows_s1(x_ref[...], w_ref, KH=KH, KW=KW, Ho=Ho, Wo=Wo, Cin=Cin)
    y = _apply_act(acc * s_ref[...] + b_ref[...], act)
    o_ref[...] = y.reshape(Ho, Wo, -1).astype(o_ref.dtype)


def _fused_s1_kernel(x_ref, w1_ref, s1_ref, b1_ref, w2_ref, s2_ref, b2_ref,
                     o_ref, mid_ref, *, Ho, Wo, Cin, Cmid, residual):
    """Fused [conv3x3+BN+ReLU] -> [conv3x3+BN (+identity residual)] -> ReLU.
    Intermediate activation stays in a padded VMEM scratch (no HBM round trip).
    Covers stride-1 BasicBlocks (residual=True, Cin==Cmid) and DoubleConv
    (residual=False)."""
    Cout = w2_ref.shape[1]
    x = x_ref[...]                                        # (Ho+2, Wo+2, Cin) bf16
    acc1 = _accum_rows_s1(x, w1_ref, KH=3, KW=3, Ho=Ho, Wo=Wo, Cin=Cin)
    y1 = jnp.maximum(acc1 * s1_ref[...] + b1_ref[...], 0.0)

    mid_ref[...] = jnp.zeros_like(mid_ref)                # zero halo + body
    mid_ref[1:Ho + 1, 1:Wo + 1, :] = y1.reshape(Ho, Wo, Cmid).astype(mid_ref.dtype)

    acc2 = _accum_rows_s1(mid_ref[...], w2_ref, KH=3, KW=3, Ho=Ho, Wo=Wo, Cin=Cmid)
    y2 = acc2 * s2_ref[...] + b2_ref[...]
    if residual:                                          # identity skip (Cin == Cout)
        y2 = y2 + x[1:Ho + 1, 1:Wo + 1, :].reshape(Ho * Wo, Cin).astype(jnp.float32)
    y2 = jnp.maximum(y2, 0.0)
    o_ref[...] = y2.reshape(Ho, Wo, Cout).astype(o_ref.dtype)


def _fused_s2_kernel(x_ref, w1_ref, s1_ref, b1_ref, w2_ref, s2_ref, b2_ref,
                     wd_ref, sd_ref, bd_ref, o_ref, mid_ref, *, Ho, Wo, Cin, Cout):
    """Fused stride-2 BasicBlock: conv3x3/s2+BN+ReLU -> conv3x3+BN, plus the
    1x1 stride-2 downsample residual computed from phase (1,1) of the already
    phase-split input (== x[::2, ::2] of the unpadded activation)."""
    x = x_ref[...]                                        # (4, Hp/2, Wp/2, Cin)
    acc1 = _accum_rows_s2(x, w1_ref, KH=3, KW=3, Ho=Ho, Wo=Wo, Cin=Cin)
    y1 = jnp.maximum(acc1 * s1_ref[...] + b1_ref[...], 0.0)

    mid_ref[...] = jnp.zeros_like(mid_ref)
    mid_ref[1:Ho + 1, 1:Wo + 1, :] = y1.reshape(Ho, Wo, Cout).astype(mid_ref.dtype)

    acc2 = _accum_rows_s1(mid_ref[...], w2_ref, KH=3, KW=3, Ho=Ho, Wo=Wo, Cin=Cout)

    xi = x[3, 0:Ho, 0:Wo, :].reshape(Ho * Wo, Cin)        # phase (1,1) == x[::2, ::2]
    ident = jnp.dot(xi, wd_ref[...], preferred_element_type=jnp.float32)
    ident = ident * sd_ref[...] + bd_ref[...]

    y2 = jnp.maximum(acc2 * s2_ref[...] + b2_ref[...] + ident, 0.0)
    o_ref[...] = y2.reshape(Ho, Wo, Cout).astype(o_ref.dtype)


def _grid_sample_kernel(vec_ref, lab_ref, out_ref, *, H, W, TH):
    """Nearest grid_sample (align_corners=False, zeros padding) as a blocked
    one-hot gather matmul.  vec_ref: (TH, W, 2) displacement row tile,
    lab_ref: (H*W, 128) bf16 lane-dense label, out_ref: (TH*W, 128) f32."""
    r = pl.program_id(1)
    v = vec_ref[...]
    jj = lax.broadcasted_iota(jnp.float32, (TH, W), 1)
    ii = lax.broadcasted_iota(jnp.float32, (TH, W), 0) + (r * TH).astype(jnp.float32)

    # affine_grid with identity theta (align_corners=False) + predicted offset
    gx = v[:, :, 0] + (2.0 * jj + 1.0) / W - 1.0
    gy = v[:, :, 1] + (2.0 * ii + 1.0) / H - 1.0

    # grid_sample unnormalize (align_corners=False), nearest, padding_mode=zeros
    fx = ((gx + 1.0) * W - 1.0) * 0.5
    fy = ((gy + 1.0) * H - 1.0) * 0.5
    ix = jnp.floor(fx + 0.5)
    iy = jnp.floor(fy + 0.5)
    valid = (ix >= 0.0) & (ix <= W - 1.0) & (iy >= 0.0) & (iy <= H - 1.0)
    ixc = jnp.clip(ix, 0.0, W - 1.0).astype(jnp.int32)
    iyc = jnp.clip(iy, 0.0, H - 1.0).astype(jnp.int32)

    TQ = TH * W
    HW = H * W
    flat = (iyc * W + ixc).reshape(TQ, 1)
    cols = lax.broadcasted_iota(jnp.int32, (TQ, HW), 1)
    # bf16 one-hot / bf16 label: MXU-native, f32 accumulation (0/1 exact in bf16).
    onehot = ((cols == flat) & valid.reshape(TQ, 1)).astype(jnp.bfloat16)
    out_ref[...] = jnp.dot(onehot, lab_ref[...], preferred_element_type=jnp.float32)


# ---------------------------------------------------------------------------
# Wrappers around the Pallas kernels
# ---------------------------------------------------------------------------
def _mat_specs(layer):
    K, N = layer["w"].shape
    return [pl.BlockSpec((K, N), lambda b: (0, 0)),
            pl.BlockSpec((1, N), lambda b: (0, 0)),
            pl.BlockSpec((1, N), lambda b: (0, 0))]


def _mat_args(layer):
    return [layer["w"], layer["scale"], layer["bias"]]


def conv2d(x, layer, *, act="none", out_dtype=jnp.bfloat16):
    """Single stride-1 conv (stem / 1x1 up-projection / head). x: (B,H,W,Cin)."""
    B, H, W, Cin = x.shape
    KH, KW, pad = layer["kh"], layer["kw"], layer["pad"]
    N = layer["w"].shape[1]
    Ho = H + 2 * pad - KH + 1
    Wo = W + 2 * pad - KW + 1

    xp = x.astype(jnp.bfloat16)
    if pad:
        xp = jnp.pad(xp, ((0, 0), (pad, pad), (pad, pad), (0, 0)))
    Hp, Wp = xp.shape[1], xp.shape[2]

    return pl.pallas_call(
        functools.partial(_conv_kernel, KH=KH, KW=KW, Ho=Ho, Wo=Wo, Cin=Cin, act=act),
        out_shape=jax.ShapeDtypeStruct((B, Ho, Wo, N), out_dtype),
        grid=(B,),
        in_specs=[pl.BlockSpec((None, Hp, Wp, Cin), lambda b: (b, 0, 0, 0))]
                 + _mat_specs(layer),
        out_specs=pl.BlockSpec((None, Ho, Wo, N), lambda b: (b, 0, 0, 0)),
        compiler_params=_cparams("parallel"),
    )(xp, *_mat_args(layer))


def basic_block(x, blk):
    """One fused pallas_call per ResNet BasicBlock."""
    B, H, W, Cin = x.shape
    stride = blk["conv1"]["stride"]
    Cout = blk["conv1"]["w"].shape[1]

    xp = jnp.pad(x.astype(jnp.bfloat16), ((0, 0), (1, 1), (1, 1), (0, 0)))
    w_specs = _mat_specs(blk["conv1"]) + _mat_specs(blk["conv2"])
    w_args = _mat_args(blk["conv1"]) + _mat_args(blk["conv2"])

    if stride == 1:
        Ho, Wo = H, W
        kernel = functools.partial(_fused_s1_kernel, Ho=Ho, Wo=Wo, Cin=Cin,
                                   Cmid=Cout, residual=True)
        in_specs = [pl.BlockSpec((None, H + 2, W + 2, Cin),
                                 lambda b: (b, 0, 0, 0))] + w_specs
        call_args = [xp] + w_args
    else:
        Ho = (H - 1) // 2 + 1
        Wo = (W - 1) // 2 + 1
        # even/odd phase split of the padded input (same bytes, no im2col); the
        # kernel then only takes unit-stride static slices, and phase (1,1)
        # doubles as the 1x1 stride-2 residual input.
        Hp, Wp = xp.shape[1], xp.shape[2]
        if Hp % 2:
            xp = jnp.pad(xp, ((0, 0), (0, 1), (0, 0), (0, 0))); Hp += 1
        if Wp % 2:
            xp = jnp.pad(xp, ((0, 0), (0, 0), (0, 1), (0, 0))); Wp += 1
        xin = xp.reshape(B, Hp // 2, 2, Wp // 2, 2, Cin)
        xin = jnp.transpose(xin, (0, 2, 4, 1, 3, 5)).reshape(B, 4, Hp // 2, Wp // 2, Cin)
        kernel = functools.partial(_fused_s2_kernel, Ho=Ho, Wo=Wo, Cin=Cin, Cout=Cout)
        w_specs = w_specs + _mat_specs(blk["down"])
        w_args = w_args + _mat_args(blk["down"])
        in_specs = [pl.BlockSpec((None, 4, Hp // 2, Wp // 2, Cin),
                                 lambda b: (b, 0, 0, 0, 0))] + w_specs
        call_args = [xin] + w_args

    return pl.pallas_call(
        kernel,
        out_shape=jax.ShapeDtypeStruct((B, Ho, Wo, Cout), jnp.bfloat16),
        grid=(B,),
        in_specs=in_specs,
        out_specs=pl.BlockSpec((None, Ho, Wo, Cout), lambda b: (b, 0, 0, 0)),
        scratch_shapes=[pltpu.VMEM((Ho + 2, Wo + 2, Cout), jnp.bfloat16)],
        compiler_params=_cparams("parallel"),
    )(*call_args)


def double_conv(x, p):
    """Fused DoubleConv: [conv3x3+BN+ReLU] x2 in one pallas_call."""
    B, H, W, Cin = x.shape
    Cout = p["conv1"]["w"].shape[1]
    xp = jnp.pad(x.astype(jnp.bfloat16), ((0, 0), (1, 1), (1, 1), (0, 0)))
    return pl.pallas_call(
        functools.partial(_fused_s1_kernel, Ho=H, Wo=W, Cin=Cin, Cmid=Cout,
                          residual=False),
        out_shape=jax.ShapeDtypeStruct((B, H, W, Cout), jnp.bfloat16),
        grid=(B,),
        in_specs=[pl.BlockSpec((None, H + 2, W + 2, Cin), lambda b: (b, 0, 0, 0))]
                 + _mat_specs(p["conv1"]) + _mat_specs(p["conv2"]),
        out_specs=pl.BlockSpec((None, H, W, Cout), lambda b: (b, 0, 0, 0)),
        scratch_shapes=[pltpu.VMEM((H + 2, W + 2, Cout), jnp.bfloat16)],
        compiler_params=_cparams("parallel"),
    )(xp, *_mat_args(p["conv1"]), *_mat_args(p["conv2"]))


def up_conv(x, skip, p):
    """ConvTranspose2d(k=2,s=2) as a 1x1 matmul + pixel shuffle, then fused DoubleConv."""
    B, H, W, _ = x.shape
    Cout = p["up"]["w"].shape[1] // 4
    y = conv2d(x, p["up"], act="none")                     # (B,H,W,4*Cout)
    y = y.reshape(B, H, W, 2, 2, Cout)
    y = jnp.transpose(y, (0, 1, 3, 2, 4, 5)).reshape(B, 2 * H, 2 * W, Cout)
    x = jnp.concatenate([y, skip], axis=-1)   # TODO(synk): concat order assumed (up, skip)
    return double_conv(x, p["double"])


def grid_sample_nearest(vector, label_nhwc):
    """vector: (B,H,W,2) f32 displacement; label_nhwc: (B,H,W,C) f32."""
    B, H, W, C = label_nhwc.shape
    HW = H * W
    CP = 128                                               # lane-dense channel pad
    # TODO(synk): at production HW, do the 128-lane pad inside the kernel (VMEM
    # scratch) instead of HBM; label values round through bf16 (exact for masks).
    lab = label_nhwc.reshape(B, HW, C).astype(jnp.bfloat16)
    lab = jnp.pad(lab, ((0, 0), (0, 0), (0, CP - C)))

    # row tile: bounded (TH*W, HW) one-hot per grid step
    TH = H
    cap = max(1, 2048 // max(W, 1))
    for cand in range(min(H, cap), 0, -1):
        if H % cand == 0 and (cand * W) % 8 == 0:
            TH = cand
            break
    TQ = TH * W

    out = pl.pallas_call(
        functools.partial(_grid_sample_kernel, H=H, W=W, TH=TH),
        out_shape=jax.ShapeDtypeStruct((B, HW, CP), jnp.float32),
        grid=(B, H // TH),
        in_specs=[pl.BlockSpec((None, TH, W, 2), lambda b, r: (b, r, 0, 0)),
                  pl.BlockSpec((None, HW, CP), lambda b, r: (b, 0, 0))],
        out_specs=pl.BlockSpec((None, TQ, CP), lambda b, r: (b, r, 0)),
        compiler_params=_cparams("parallel", "parallel"),
    )(vector.astype(jnp.float32), lab)
    return out[:, :, :C].reshape(B, H, W, C)


# ---------------------------------------------------------------------------
# Network definition (ResNet18 BasicBlocks + U-Net decoder)
# ---------------------------------------------------------------------------
def tracknet_forward(PP, last_image, new_image, last_label):
    """Inputs NCHW f32 (PyTorch convention). Returns (new_label NCHW, vector NHWC2)."""
    x = jnp.concatenate([last_image, new_image, last_label], axis=1)   # (B,8,H,W)
    x = jnp.transpose(x, (0, 2, 3, 1)).astype(jnp.bfloat16)            # NHWC bf16

    f0 = conv2d(x, PP["first"], act="none")       # plain conv stem (no bias / BN)

    f1 = f0
    for blk in PP["enc1"]:
        f1 = basic_block(f1, blk)
    f2 = f1
    for blk in PP["enc2"]:
        f2 = basic_block(f2, blk)
    f3 = f2
    for blk in PP["enc3"]:
        f3 = basic_block(f3, blk)
    f4 = f3
    for blk in PP["enc4"]:
        f4 = basic_block(f4, blk)

    d = up_conv(f4, f3, PP["dec4"])
    d = up_conv(d, f2, PP["dec3"])
    d = up_conv(d, f1, PP["dec2"])
    d = double_conv(jnp.concatenate([f0, d], axis=-1), PP["dec1"])

    # head (+Tanh): weights zero-padded to 128 output lanes for lane-dense stores
    vec128 = conv2d(d, PP["last"], act="tanh", out_dtype=jnp.float32)  # (B,H,W,128)
    vector = vec128[..., :2]                                           # (B,H,W,2)

    label_nhwc = jnp.transpose(last_label, (0, 2, 3, 1)).astype(jnp.float32)
    new_label_nhwc = grid_sample_nearest(vector, label_nhwc)
    new_label = jnp.transpose(new_label_nhwc, (0, 3, 1, 2))            # back to NCHW
    return new_label, vector


# ---------------------------------------------------------------------------
# Parameters: synthetic init (PyTorch layout) + one-time prep (Pallas layout)
# ---------------------------------------------------------------------------
def init_params(key):
    keys = iter(jax.random.split(key, 256))

    def conv_w(cout, cin, kh, kw):
        fan_in = cin * kh * kw
        return jax.random.normal(next(keys), (cout, cin, kh, kw), jnp.float32) \
            * (0.3 / jnp.sqrt(fan_in))

    def bn(c):
        k1, k2, k3 = jax.random.split(next(keys), 3)
        gamma = 1.0 + 0.1 * jax.random.normal(k1, (c,), jnp.float32)
        beta = 0.1 * jax.random.normal(k2, (c,), jnp.float32)
        mean = 0.1 * jax.random.normal(k3, (c,), jnp.float32)
        var = jnp.ones((c,), jnp.float32)
        scale = gamma / jnp.sqrt(var + 1e-5)
        bias = beta - mean * scale
        return scale, bias

    def make_block(cin, cout, stride):
        blk = {
            "conv1_w": conv_w(cout, cin, 3, 3), "bn1": bn(cout),
            "conv2_w": conv_w(cout, cout, 3, 3), "bn2": bn(cout),
            "stride": stride,
        }
        if stride != 1 or cin != cout:
            blk["down_w"] = conv_w(cout, cin, 1, 1)
            blk["down_bn"] = bn(cout)
        return blk

    def make_double(cin, cout):
        return {"conv1_w": conv_w(cout, cin, 3, 3), "bn1": bn(cout),
                "conv2_w": conv_w(cout, cout, 3, 3), "bn2": bn(cout)}

    def make_up(cin, cout):
        return {
            "up_w": jax.random.normal(next(keys), (cin, cout, 2, 2), jnp.float32)
                    * (0.3 / jnp.sqrt(cin)),
            "up_b": 0.1 * jax.random.normal(next(keys), (cout,), jnp.float32),
            "double": make_double(2 * cout, cout),
        }

    P = {"first_w": conv_w(64, 8, 7, 7)}
    P["enc1"] = [make_block(64, 64, 1), make_block(64, 64, 1)]
    P["enc2"] = [make_block(64, 128, 2), make_block(128, 128, 1)]
    P["enc3"] = [make_block(128, 256, 2), make_block(256, 256, 1)]
    P["enc4"] = [make_block(256, 512, 2), make_block(512, 512, 1)]
    P["dec4"] = make_up(512, 256)
    P["dec3"] = make_up(256, 128)
    P["dec2"] = make_up(128, 64)
    P["dec1"] = make_double(128, 64)
    P["last_w"] = conv_w(2, 64, 3, 3)
    P["last_b"] = 0.05 * jax.random.normal(next(keys), (2,), jnp.float32)
    return P


def prepare_params(P):
    """One-time weight relayout: (Cout,Cin,KH,KW) -> tap-major (KH*KW*Cin, Cout) bf16,
    folded-BN scale/bias as (1, Cout) f32, 2-channel head padded to 128 lanes."""

    def prep_conv(w_oihw, scale, bias, stride, pad, pad_cout_to=None):
        Cout, Cin, KH, KW = w_oihw.shape
        w2 = jnp.transpose(w_oihw, (2, 3, 1, 0)).reshape(KH * KW * Cin, Cout)
        if pad_cout_to is not None and pad_cout_to > Cout:
            extra = pad_cout_to - Cout
            w2 = jnp.pad(w2, ((0, 0), (0, extra)))
            scale = jnp.pad(scale, (0, extra))
            bias = jnp.pad(bias, (0, extra))
        return {"w": w2.astype(jnp.bfloat16),
                "scale": scale.reshape(1, -1).astype(jnp.float32),
                "bias": bias.reshape(1, -1).astype(jnp.float32),
                "kh": KH, "kw": KW, "stride": stride, "pad": pad}

    def prep_block(blk):
        d = {"conv1": prep_conv(blk["conv1_w"], *blk["bn1"], blk["stride"], 1),
             "conv2": prep_conv(blk["conv2_w"], *blk["bn2"], 1, 1)}
        if "down_w" in blk:
            # 1x1 stride-2 downsample: spatial subsample is phase (1,1) of the
            # phase-split input inside the fused kernel; the conv itself is a
            # plain (Cin, Cout) matmul.
            d["down"] = prep_conv(blk["down_w"], *blk["down_bn"], 1, 0)
        return d

    def prep_double(p):
        return {"conv1": prep_conv(p["conv1_w"], *p["bn1"], 1, 1),
                "conv2": prep_conv(p["conv2_w"], *p["bn2"], 1, 1)}

    def prep_up(p):
        Cin, Cout = p["up_w"].shape[0], p["up_w"].shape[1]
        w_r = jnp.transpose(p["up_w"], (0, 2, 3, 1)).reshape(Cin, 4 * Cout)
        up = {"w": w_r.astype(jnp.bfloat16),
              "scale": jnp.ones((1, 4 * Cout), jnp.float32),
              "bias": jnp.tile(p["up_b"], 4).reshape(1, 4 * Cout).astype(jnp.float32),
              "kh": 1, "kw": 1, "stride": 1, "pad": 0}
        return {"up": up, "double": prep_double(p["double"])}

    ones64 = jnp.ones((64,), jnp.float32)
    zeros64 = jnp.zeros((64,), jnp.float32)
    PP = {
        "first": prep_conv(P["first_w"], ones64, zeros64, 1, 3),
        "enc1": [prep_block(b) for b in P["enc1"]],
        "enc2": [prep_block(b) for b in P["enc2"]],
        "enc3": [prep_block(b) for b in P["enc3"]],
        "enc4": [prep_block(b) for b in P["enc4"]],
        "dec4": prep_up(P["dec4"]),
        "dec3": prep_up(P["dec3"]),
        "dec2": prep_up(P["dec2"]),
        "dec1": prep_double(P["dec1"]),
        "last": prep_conv(P["last_w"], jnp.ones((2,), jnp.float32), P["last_b"],
                          1, 1, pad_cout_to=128),
    }
    return PP


# ---------------------------------------------------------------------------
if __name__ == "__main__":
    key = jax.random.PRNGKey(0)
    kp, k1, k2, k3 = jax.random.split(key, 4)
    PP = prepare_params(init_params(kp))

    B, H, W = 2, 16, 16
    last_image = jax.random.normal(k1, (B, 3, H, W), jnp.float32)
    new_image = jax.random.normal(k2, (B, 3, H, W), jnp.float32)
    last_label = jax.random.normal(k3, (B, 2, H, W), jnp.float32)

    new_label, vector = tracknet_forward(PP, last_image, new_image, last_label)
    jax.block_until_ready((new_label, vector))

    assert new_label.shape == (B, 2, H, W)
    assert vector.shape == (B, H, W, 2)
    assert new_label.dtype == jnp.float32 and vector.dtype == jnp.float32
    assert bool(jnp.all(jnp.isfinite(new_label))) and bool(jnp.all(jnp.isfinite(vector)))
    print("KERNEL_OK")
</pallas_src>

<mosaic_0001>
module attributes {stable_mosaic.version = 11 : i64} {
  func.func @_conv_kernel(%arg0: i32, %arg1: memref<1x22x22x8xbf16, #tpu.memory_space<vmem>>, %arg2: memref<392x64xbf16, #tpu.memory_space<vmem>>, %arg3: memref<1x64xf32, #tpu.memory_space<vmem>>, %arg4: memref<1x64xf32, #tpu.memory_space<vmem>>, %arg5: memref<1x16x16x64xbf16, #tpu.memory_space<vmem>>) attributes {dimension_semantics = [#tpu.dimension_semantics<parallel>], iteration_bounds = array<i64: 2>, scalar_prefetch = 0 : i64, scratch_operands = 0 : i64, tpu.core_type = #tpu.core_type<tc>, window_params = [{transform_indices = @transform_0, window_bounds = array<i64: 1, 22, 22, 8>}, {pipeline_mode = #tpu.pipeline_mode<synchronous>, transform_indices = @transform_1, window_bounds = array<i64: 392, 64>}, {pipeline_mode = #tpu.pipeline_mode<synchronous>, transform_indices = @transform_2, window_bounds = array<i64: 1, 64>}, {pipeline_mode = #tpu.pipeline_mode<synchronous>, transform_indices = @transform_3, window_bounds = array<i64: 1, 64>}, {transform_indices = @transform_4, window_bounds = array<i64: 1, 16, 16, 64>}]} {
    %c0 = arith.constant 0 : index
    %c0_0 = arith.constant 0 : index
    %c0_1 = arith.constant 0 : index
    %c0_2 = arith.constant 0 : index
    %0 = vector.load %arg1[%c0, %c0_0, %c0_1, %c0_2] : memref<1x22x22x8xbf16, #tpu.memory_space<vmem>>, vector<1x22x22x8xbf16>
    %1 = vector.shape_cast %0 : vector<1x22x22x8xbf16> to vector<22x22x8xbf16>
    %cst = arith.constant 0.000000e+00 : f32
    %2 = vector.broadcast %cst : f32 to vector<256x64xf32>
    %3 = vector.extract_strided_slice %1 {offsets = [0, 0, 0], sizes = [16, 16, 8], strides = [1, 1, 1]} : vector<22x22x8xbf16> to vector<16x16x8xbf16>
    %4 = vector.extract_strided_slice %1 {offsets = [0, 1, 0], sizes = [16, 16, 8], strides = [1, 1, 1]} : vector<22x22x8xbf16> to vector<16x16x8xbf16>
    %5 = vector.extract_strided_slice %1 {offsets = [0, 2, 0], sizes = [16, 16, 8], strides = [1, 1, 1]} : vector<22x22x8xbf16> to vector<16x16x8xbf16>
    %6 = vector.extract_strided_slice %1 {offsets = [0, 3, 0], sizes = [16, 16, 8], strides = [1, 1, 1]} : vector<22x22x8xbf16> to vector<16x16x8xbf16>
    %7 = vector.extract_strided_slice %1 {offsets = [0, 4, 0], sizes = [16, 16, 8], strides = [1, 1, 1]} : vector<22x22x8xbf16> to vector<16x16x8xbf16>
    %8 = vector.extract_strided_slice %1 {offsets = [0, 5, 0], sizes = [16, 16, 8], strides = [1, 1, 1]} : vector<22x22x8xbf16> to vector<16x16x8xbf16>
    %9 = vector.extract_strided_slice %1 {offsets = [0, 6, 0], sizes = [16, 16, 8], strides = [1, 1, 1]} : vector<22x22x8xbf16> to vector<16x16x8xbf16>
    %10 = tpu.concatenate %3, %4, %5, %6, %7, %8, %9 in 2 : vector<16x16x8xbf16>, vector<16x16x8xbf16>, vector<16x16x8xbf16>, vector<16x16x8xbf16>, vector<16x16x8xbf16>, vector<16x16x8xbf16>, vector<16x16x8xbf16> -> vector<16x16x56xbf16>
    %11 = vector.shape_cast %10 : vector<16x16x56xbf16> to vector<256x56xbf16>
    %c0_3 = arith.constant 0 : index
    %c0_4 = arith.constant 0 : index
    %12 = vector.load %arg2[%c0_3, %c0_4] : memref<392x64xbf16, #tpu.memory_space<vmem>>, vector<56x64xbf16>
    %cst_5 = arith.constant dense<0.000000e+00> : vector<256x64xf32>
    %13 = tpu.matmul %11, %12, %cst_5 {dimension_numbers = #tpu.dot_dimension_numbers<[1], [0], [0], [1], [0, 0, 1, 1], [], []>} : vector<256x56xbf16>, vector<56x64xbf16>, vector<256x64xf32> -> vector<256x64xf32>
    %14 = arith.addf %2, %13 : vector<256x64xf32>
    %15 = vector.extract_strided_slice %1 {offsets = [1, 0, 0], sizes = [16, 16, 8], strides = [1, 1, 1]} : vector<22x22x8xbf16> to vector<16x16x8xbf16>
    %16 = vector.extract_strided_slice %1 {offsets = [1, 1, 0], sizes = [16, 16, 8], strides = [1, 1, 1]} : vector<22x22x8xbf16> to vector<16x16x8xbf16>
    %17 = vector.extract_strided_slice %1 {offsets = [1, 2, 0], sizes = [16, 16, 8], strides = [1, 1, 1]} : vector<22x22x8xbf16> to vector<16x16x8xbf16>
    %18 = vector.extract_strided_slice %1 {offsets = [1, 3, 0], sizes = [16, 16, 8], strides = [1, 1, 1]} : vector<22x22x8xbf16> to vector<16x16x8xbf16>
    %19 = vector.extract_strided_slice %1 {offsets = [1, 4, 0], sizes = [16, 16, 8], strides = [1, 1, 1]} : vector<22x22x8xbf16> to vector<16x16x8xbf16>
    %20 = vector.extract_strided_slice %1 {offsets = [1, 5, 0], sizes = [16, 16, 8], strides = [1, 1, 1]} : vector<22x22x8xbf16> to vector<16x16x8xbf16>
    %21 = vector.extract_strided_slice %1 {offsets = [1, 6, 0], sizes = [16, 16, 8], strides = [1, 1, 1]} : vector<22x22x8xbf16> to vector<16x16x8xbf16>
    %22 = tpu.concatenate %15, %16, %17, %18, %19, %20, %21 in 2 : vector<16x16x8xbf16>, vector<16x16x8xbf16>, vector<16x16x8xbf16>, vector<16x16x8xbf16>, vector<16x16x8xbf16>, vector<16x16x8xbf16>, vector<16x16x8xbf16> -> vector<16x16x56xbf16>
    %23 = vector.shape_cast %22 : vector<16x16x56xbf16> to vector<256x56xbf16>
    %c56 = arith.constant 56 : index
    %c0_6 = arith.constant 0 : index
    %24 = vector.load %arg2[%c56, %c0_6] : memref<392x64xbf16, #tpu.memory_space<vmem>>, vector<56x64xbf16>
    %cst_7 = arith.constant dense<0.000000e+00> : vector<256x64xf32>
    %25 = tpu.matmul %23, %24, %cst_7 {dimension_numbers = #tpu.dot_dimension_numbers<[1], [0], [0], [1], [0, 0, 1, 1], [], []>} : vector<256x56xbf16>, vector<56x64xbf16>, vector<256x64xf32> -> vector<256x64xf32>
    %26 = arith.addf %14, %25 : vector<256x64xf32>
    %27 = vector.extract_strided_slice %1 {offsets = [2, 0, 0], sizes = [16, 16, 8], strides = [1, 1, 1]} : vector<22x22x8xbf16> to vector<16x16x8xbf16>
    %28 = vector.extract_strided_slice %1 {offsets = [2, 1, 0], sizes = [16, 16, 8], strides = [1, 1, 1]} : vector<22x22x8xbf16> to vector<16x16x8xbf16>
    %29 = vector.extract_strided_slice %1 {offsets = [2, 2, 0], sizes = [16, 16, 8], strides = [1, 1, 1]} : vector<22x22x8xbf16> to vector<16x16x8xbf16>
    %30 = vector.extract_strided_slice %1 {offsets = [2, 3, 0], sizes = [16, 16, 8], strides = [1, 1, 1]} : vector<22x22x8xbf16> to vector<16x16x8xbf16>
    %31 = vector.extract_strided_slice %1 {offsets = [2, 4, 0], sizes = [16, 16, 8], strides = [1, 1, 1]} : vector<22x22x8xbf16> to vector<16x16x8xbf16>
    %32 = vector.extract_strided_slice %1 {offsets = [2, 5, 0], sizes = [16, 16, 8], strides = [1, 1, 1]} : vector<22x22x8xbf16> to vector<16x16x8xbf16>
    %33 = vector.extract_strided_slice %1 {offsets = [2, 6, 0], sizes = [16, 16, 8], strides = [1, 1, 1]} : vector<22x22x8xbf16> to vector<16x16x8xbf16>
    %34 = tpu.concatenate %27, %28, %29, %30, %31, %32, %33 in 2 : vector<16x16x8xbf16>, vector<16x16x8xbf16>, vector<16x16x8xbf16>, vector<16x16x8xbf16>, vector<16x16x8xbf16>, vector<16x16x8xbf16>, vector<16x16x8xbf16> -> vector<16x16x56xbf16>
    %35 = vector.shape_cast %34 : vector<16x16x56xbf16> to vector<256x56xbf16>
    %c112 = arith.constant 112 : index
    %c0_8 = arith.constant 0 : index
    %36 = vector.load %arg2[%c112, %c0_8] : memref<392x64xbf16, #tpu.memory_space<vmem>>, vector<56x64xbf16>
    %cst_9 = arith.constant dense<0.000000e+00> : vector<256x64xf32>
    %37 = tpu.matmul %35, %36, %cst_9 {dimension_numbers = #tpu.dot_dimension_numbers<[1], [0], [0], [1], [0, 0, 1, 1], [], []>} : vector<256x56xbf16>, vector<56x64xbf16>, vector<256x64xf32> -> vector<256x64xf32>
    %38 = arith.addf %26, %37 : vector<256x64xf32>
    %39 = vector.extract_strided_slice %1 {offsets = [3, 0, 0], sizes = [16, 16, 8], strides = [1, 1, 1]} : vector<22x22x8xbf16> to vector<16x16x8xbf16>
    %40 = vector.extract_strided_slice %1 {offsets = [3, 1, 0], sizes = [16, 16, 8], strides = [1, 1, 1]} : vector<22x22x8xbf16> to vector<16x16x8xbf16>
    %41 = vector.extract_strided_slice %1 {offsets = [3, 2, 0], sizes = [16, 16, 8], strides = [1, 1, 1]} : vector<22x22x8xbf16> to vector<16x16x8xbf16>
    %42 = vector.extract_strided_slice %1 {offsets = [3, 3, 0], sizes = [16, 16, 8], strides = [1, 1, 1]} : vector<22x22x8xbf16> to vector<16x16x8xbf16>
    %43 = vector.extract_strided_slice %1 {offsets = [3, 4, 0], sizes = [16, 16, 8], strides = [1, 1, 1]} : vector<22x22x8xbf16> to vector<16x16x8xbf16>
    %44 = vector.extract_strided_slice %1 {offsets = [3, 5, 0], sizes = [16, 16, 8], strides = [1, 1, 1]} : vector<22x22x8xbf16> to vector<16x16x8xbf16>
    %45 = vector.extract_strided_slice %1 {offsets = [3, 6, 0], sizes = [16, 16, 8], strides = [1, 1, 1]} : vector<22x22x8xbf16> to vector<16x16x8xbf16>
    %46 = tpu.concatenate %39, %40, %41, %42, %43, %44, %45 in 2 : vector<16x16x8xbf16>, vector<16x16x8xbf16>, vector<16x16x8xbf16>, vector<16x16x8xbf16>, vector<16x16x8xbf16>, vector<16x16x8xbf16>, vector<16x16x8xbf16> -> vector<16x16x56xbf16>
    %47 = vector.shape_cast %46 : vector<16x16x56xbf16> to vector<256x56xbf16>
    %c168 = arith.constant 168 : index
    %c0_10 = arith.constant 0 : index
    %48 = vector.load %arg2[%c168, %c0_10] : memref<392x64xbf16, #tpu.memory_space<vmem>>, vector<56x64xbf16>
    %cst_11 = arith.constant dense<0.000000e+00> : vector<256x64xf32>
    %49 = tpu.matmul %47, %48, %cst_11 {dimension_numbers = #tpu.dot_dimension_numbers<[1], [0], [0], [1], [0, 0, 1, 1], [], []>} : vector<256x56xbf16>, vector<56x64xbf16>, vector<256x64xf32> -> vector<256x64xf32>
    %50 = arith.addf %38, %49 : vector<256x64xf32>
    %51 = vector.extract_strided_slice %1 {offsets = [4, 0, 0], sizes = [16, 16, 8], strides = [1, 1, 1]} : vector<22x22x8xbf16> to vector<16x16x8xbf16>
    %52 = vector.extract_strided_slice %1 {offsets = [4, 1, 0], sizes = [16, 16, 8], strides = [1, 1, 1]} : vector<22x22x8xbf16> to vector<16x16x8xbf16>
    %53 = vector.extract_strided_slice %1 {offsets = [4, 2, 0], sizes = [16, 16, 8], strides = [1, 1, 1]} : vector<22x22x8xbf16> to vector<16x16x8xbf16>
    %54 = vector.extract_strided_slice %1 {offsets = [4, 3, 0], sizes = [16, 16, 8], strides = [1, 1, 1]} : vector<22x22x8xbf16> to vector<16x16x8xbf16>
    %55 = vector.extract_strided_slice %1 {offsets = [4, 4, 0], sizes = [16, 16, 8], strides = [1, 1, 1]} : vector<22x22x8xbf16> to vector<16x16x8xbf16>
    %56 = vector.extract_strided_slice %1 {offsets = [4, 5, 0], sizes = [16, 16, 8], strides = [1, 1, 1]} : vector<22x22x8xbf16> to vector<16x16x8xbf16>
    %57 = vector.extract_strided_slice %1 {offsets = [4, 6, 0], sizes = [16, 16, 8], strides = [1, 1, 1]} : vector<22x22x8xbf16> to vector<16x16x8xbf16>
    %58 = tpu.concatenate %51, %52, %53, %54, %55, %56, %57 in 2 : vector<16x16x8xbf16>, vector<16x16x8xbf16>, vector<16x16x8xbf16>, vector<16x16x8xbf16>, vector<16x16x8xbf16>, vector<16x16x8xbf16>, vector<16x16x8xbf16> -> vector<16x16x56xbf16>
    %59 = vector.shape_cast %58 : vector<16x16x56xbf16> to vector<256x56xbf16>
    %c224 = arith.constant 224 : index
    %c0_12 = arith.constant 0 : index
    %60 = vector.load %arg2[%c224, %c0_12] : memref<392x64xbf16, #tpu.memory_space<vmem>>, vector<56x64xbf16>
    %cst_13 = arith.constant dense<0.000000e+00> : vector<256x64xf32>
    %61 = tpu.matmul %59, %60, %cst_13 {dimension_numbers = #tpu.dot_dimension_numbers<[1], [0], [0], [1], [0, 0, 1, 1], [], []>} : vector<256x56xbf16>, vector<56x64xbf16>, vector<256x64xf32> -> vector<256x64xf32>
    %62 = arith.addf %50, %61 : vector<256x64xf32>
    %63 = vector.extract_strided_slice %1 {offsets = [5, 0, 0], sizes = [16, 16, 8], strides = [1, 1, 1]} : vector<22x22x8xbf16> to vector<16x16x8xbf16>
    %64 = vector.extract_strided_slice %1 {offsets = [5, 1, 0], sizes = [16, 16, 8], strides = [1, 1, 1]} : vector<22x22x8xbf16> to vector<16x16x8xbf16>
    %65 = vector.extract_strided_slice %1 {offsets = [5, 2, 0], sizes = [16, 16, 8], strides = [1, 1, 1]} : vector<22x22x8xbf16> to vector<16x16x8xbf16>
    %66 = vector.extract_strided_slice %1 {offsets = [5, 3, 0], sizes = [16, 16, 8], strides = [1, 1, 1]} : vector<22x22x8xbf16> to vector<16x16x8xbf16>
    %67 = vector.extract_strided_slice %1 {offsets = [5, 4, 0], sizes = [16, 16, 8], strides = [1, 1, 1]} : vector<22x22x8xbf16> to vector<16x16x8xbf16>
    %68 = vector.extract_strided_slice %1 {offsets = [5, 5, 0], sizes = [16, 16, 8], strides = [1, 1, 1]} : vector<22x22x8xbf16> to vector<16x16x8xbf16>
    %69 = vector.extract_strided_slice %1 {offsets = [5, 6, 0], sizes = [16, 16, 8], strides = [1, 1, 1]} : vector<22x22x8xbf16> to vector<16x16x8xbf16>
    %70 = tpu.concatenate %63, %64, %65, %66, %67, %68, %69 in 2 : vector<16x16x8xbf16>, vector<16x16x8xbf16>, vector<16x16x8xbf16>, vector<16x16x8xbf16>, vector<16x16x8xbf16>, vector<16x16x8xbf16>, vector<16x16x8xbf16> -> vector<16x16x56xbf16>
    %71 = vector.shape_cast %70 : vector<16x16x56xbf16> to vector<256x56xbf16>
    %c280 = arith.constant 280 : index
    %c0_14 = arith.constant 0 : index
    %72 = vector.load %arg2[%c280, %c0_14] : memref<392x64xbf16, #tpu.memory_space<vmem>>, vector<56x64xbf16>
    %cst_15 = arith.constant dense<0.000000e+00> : vector<256x64xf32>
    %73 = tpu.matmul %71, %72, %cst_15 {dimension_numbers = #tpu.dot_dimension_numbers<[1], [0], [0], [1], [0, 0, 1, 1], [], []>} : vector<256x56xbf16>, vector<56x64xbf16>, vector<256x64xf32> -> vector<256x64xf32>
    %74 = arith.addf %62, %73 : vector<256x64xf32>
    %75 = vector.extract_strided_slice %1 {offsets = [6, 0, 0], sizes = [16, 16, 8], strides = [1, 1, 1]} : vector<22x22x8xbf16> to vector<16x16x8xbf16>
    %76 = vector.extract_strided_slice %1 {offsets = [6, 1, 0], sizes = [16, 16, 8], strides = [1, 1, 1]} : vector<22x22x8xbf16> to vector<16x16x8xbf16>
    %77 = vector.extract_strided_slice %1 {offsets = [6, 2, 0], sizes = [16, 16, 8], strides = [1, 1, 1]} : vector<22x22x8xbf16> to vector<16x16x8xbf16>
    %78 = vector.extract_strided_slice %1 {offsets = [6, 3, 0], sizes = [16, 16, 8], strides = [1, 1, 1]} : vector<22x22x8xbf16> to vector<16x16x8xbf16>
    %79 = vector.extract_strided_slice %1 {offsets = [6, 4, 0], sizes = [16, 16, 8], strides = [1, 1, 1]} : vector<22x22x8xbf16> to vector<16x16x8xbf16>
    %80 = vector.extract_strided_slice %1 {offsets = [6, 5, 0], sizes = [16, 16, 8], strides = [1, 1, 1]} : vector<22x22x8xbf16> to vector<16x16x8xbf16>
    %81 = vector.extract_strided_slice %1 {offsets = [6, 6, 0], sizes = [16, 16, 8], strides = [1, 1, 1]} : vector<22x22x8xbf16> to vector<16x16x8xbf16>
    %82 = tpu.concatenate %75, %76, %77, %78, %79, %80, %81 in 2 : vector<16x16x8xbf16>, vector<16x16x8xbf16>, vector<16x16x8xbf16>, vector<16x16x8xbf16>, vector<16x16x8xbf16>, vector<16x16x8xbf16>, vector<16x16x8xbf16> -> vector<16x16x56xbf16>
    %83 = vector.shape_cast %82 : vector<16x16x56xbf16> to vector<256x56xbf16>
    %c336 = arith.constant 336 : index
    %c0_16 = arith.constant 0 : index
    %84 = vector.load %arg2[%c336, %c0_16] : memref<392x64xbf16, #tpu.memory_space<vmem>>, vector<56x64xbf16>
    %cst_17 = arith.constant dense<0.000000e+00> : vector<256x64xf32>
    %85 = tpu.matmul %83, %84, %cst_17 {dimension_numbers = #tpu.dot_dimension_numbers<[1], [0], [0], [1], [0, 0, 1, 1], [], []>} : vector<256x56xbf16>, vector<56x64xbf16>, vector<256x64xf32> -> vector<256x64xf32>
    %86 = arith.addf %74, %85 : vector<256x64xf32>
    %c0_18 = arith.constant 0 : index
    %c0_19 = arith.constant 0 : index
    %87 = vector.load %arg3[%c0_18, %c0_19] : memref<1x64xf32, #tpu.memory_space<vmem>>, vector<1x64xf32>
    %88 = vector.broadcast %87 : vector<1x64xf32> to vector<256x64xf32>
    %89 = arith.mulf %86, %88 : vector<256x64xf32>
    %c0_20 = arith.constant 0 : index
    %c0_21 = arith.constant 0 : index
    %90 = vector.load %arg4[%c0_20, %c0_21] : memref<1x64xf32, #tpu.memory_space<vmem>>, vector<1x64xf32>
    %91 = vector.broadcast %90 : vector<1x64xf32> to vector<256x64xf32>
    %92 = arith.addf %89, %91 : vector<256x64xf32>
    %93 = vector.shape_cast %92 : vector<256x64xf32> to vector<16x16x64xf32>
    %94 = arith.truncf %93 : vector<16x16x64xf32> to vector<16x16x64xbf16>
    %c0_22 = arith.constant 0 : index
    %c0_23 = arith.constant 0 : index
    %c0_24 = arith.constant 0 : index
    %c0_25 = arith.constant 0 : index
    %95 = vector.load %arg5[%c0_22, %c0_23, %c0_24, %c0_25] : memref<1x16x16x64xbf16, #tpu.memory_space<vmem>>, vector<1x16x16x64xbf16>
    %96 = vector.shape_cast %95 : vector<1x16x16x64xbf16> to vector<16x16x64xbf16>
    %97 = vector.shape_cast %94 : vector<16x16x64xbf16> to vector<1x16x16x64xbf16>
    tpu.vector_store %arg5[%c0_22, %c0_23, %c0_24, %c0_25], %97 {strides = array<i32>} : memref<1x16x16x64xbf16, #tpu.memory_space<vmem>>, vector<1x16x16x64xbf16>,
    return
  }
  func.func @transform_0(%arg0: i32) -> (i32, i32, i32, i32) {
    %c0_i32 = arith.constant 0 : i32
    %c0_i32_0 = arith.constant 0 : i32
    %c0_i32_1 = arith.constant 0 : i32
    %c0_i32_2 = arith.constant 0 : i32
    return %arg0, %c0_i32, %c0_i32_0, %c0_i32_1 : i32, i32, i32, i32
  }
  func.func @transform_1(%arg0: i32) -> (i32, i32) {
    %c0_i32 = arith.constant 0 : i32
    %c0_i32_0 = arith.constant 0 : i32
    %c0_i32_1 = arith.constant 0 : i32
    return %c0_i32, %c0_i32_0 : i32, i32
  }
  func.func @transform_2(%arg0: i32) -> (i32, i32) {
    %c0_i32 = arith.constant 0 : i32
    %c0_i32_0 = arith.constant 0 : i32
    %c0_i32_1 = arith.constant 0 : i32
    return %c0_i32, %c0_i32_0 : i32, i32
  }
  func.func @transform_3(%arg0: i32) -> (i32, i32) {
    %c0_i32 = arith.constant 0 : i32
    %c0_i32_0 = arith.constant 0 : i32
    %c0_i32_1 = arith.constant 0 : i32
    return %c0_i32, %c0_i32_0 : i32, i32
  }
  func.func @transform_4(%arg0: i32) -> (i32, i32, i32, i32) {
    %c0_i32 = arith.constant 0 : i32
    %c0_i32_0 = arith.constant 0 : i32
    %c0_i32_1 = arith.constant 0 : i32
    %c0_i32_2 = arith.constant 0 : i32
    return %arg0, %c0_i32, %c0_i32_0, %c0_i32_1 : i32, i32, i32, i32
  }
}

</mosaic_0001>

<bundles_post_ra>
// kernel: tpu_custom_call.1
= control target key start
LH: loop header
LB: loop body
LE: loop exit
PB: predicated region body
PF: predicated region fallthrough
CT: control target
= control target key end

     0   :  { %9 = vsyncpa [#allocation3], 0  ;;  %s6925_s0 = inlined_call_operand.hbm [shape: bf16[2,22,22,8], index: 0, kind: input, shape index: {}]   ;;  %s6926_s1 = inlined_call_operand.hbm [shape: bf16[392,64], index: 1, kind: input, shape index: {}]   ;;  %s6927_s2 = inlined_call_operand.hbm [shape: f32[1,64], index: 2, kind: input, shape index: {}]   ;;  %s6928_s3 = inlined_call_operand.hbm [shape: f32[1,64], index: 3, kind: input, shape index: {}]   ;;  %s6929_s4 = inlined_call_operand.hbm [shape: bf16[2,16,16,64], index: 4, kind: output, shape index: {}]  }
   0x1   :  { %11 = vsyncpa [#allocation3 + $0x1], 0 }
   0x2   :  { %12 = vsyncpa [#allocation6], 0 }
   0x3   :  { %13 = vsyncpa [#allocation9], 0 }
   0x4   :  { %14 = vsyncpa [#allocation4], 0 }
   0x5   :  { %16 = vsyncpa [#allocation4 + $0x1], 0  ;;  %s5066_s15 = smov 0   ;;  %s5068_s16 = smov 0  }
   0x6   :  { %s5070_s17 = smov 0   ;;  %s5072_s18 = smov 0  }
   0x7 LB: > { %s5087_s19 = sadd.s32 4294967295, %s5024_s18   ;;  %s3758_s20 = sadd.s32 4294967294, %s5024_s18   ;;  %s5024_s18 = sphi %s5072_s18, %s6952_s18   ;;  %s5020_s17 = sphi %s5070_s17, %s6951_s17   ;;  %s5016_s16 = sphi %s5068_s16, %s6950_s16   ;;  %s5012_s15 = sphi %s5066_s15, %s6949_s15  }
   0x8   : > { %p42_p0 = scmp.ne.s32.totalorder %s5016_s16, %s5012_s15  ;;  %p6930_p1 = scmp.eq.s32.totalorder %s5087_s19, 0 }
   0x9   : > { %p135_p3 = scmp.eq.s32.totalorder %s3758_s20, 1  ;;  %p3759_p5 = scmp.ge.s32.totalorder %s5024_s18, 1 }
   0xa   : > { %p5096_p4 = por %p6930_p1, %p42_p0  ;;  %p142_p7 = scmp.lt.s32.totalorder %s5024_s18, 3 }
   0xb   : > { %p5101_p6 = por %p135_p3, %p42_p0  ;;  %s5026_s24 = smov [#allocation5]  }
   0xc   : > { %s6933_s21 = scalar_select %p5096_p4, 1, 0 }
   0xd   : > { %s6934_s22 = scalar_select %p5101_p6, 1, 0 }
   0xe   : > { %p5106_p8 = pnand %p3759_p5, %p142_p7  ;;  %s154_s25 = sshll.u32 %s5026_s24, 4  ;;  %s5110_s25 = int_to_ptr.vmem [resolvable:$true] %s154_s25 }
   0xf   : > { %s5027_s27 = smov [#allocation7]   ;;  %s5028_s29 = smov [#allocation8]  }
  0x10   : > { %s6935_s23 = scalar_select %p5106_p8, 1, 0 }
  0x11   : > { %p4673_p9 = pneg %p5106_p8  ;;  %s168_s28 = sshll.u32 %s5027_s27, 4  ;;  %s5121_s28 = int_to_ptr.vmem [resolvable:$true] %s168_s28 }
  0x12   : > { %s5123_s30 = sshll.u32 %s5028_s29, 4  ;;  %s4836_s7 = scalar_lea.hbm %s6926_s1, 3136  ;;  %s180_s30 = int_to_ptr.vmem [resolvable:$true] %s5123_s30 }
  0x13   : > { %p5117_p11 = pnand %p4673_p9, %p6930_p1  ;;  %p4837_p12 = scmp.ne.s32.totalorder %s6926_s1, %s4836_s7 }
  0x14   : > { %p4843_p5 = scmp.lt.u32.totalorder %s4836_s7, %s6926_s1 }
  0x15   : > { %p5133_p13 = pneg %p5117_p11 }
  0x17   : > { %p4839_p0 = pnand %p5133_p13, %p4837_p12 }
  0x19   : > { %p4840_p3 = pneg %p4839_p0 }
  0x1b   : > { %p4845_p7 = pnand %p4843_p5, %p4840_p3 }
  0x1d   : > { %4848 = shalt.err (!%p4845_p7)
}
  0x1e   : > { %s4849_s13 = scalar_lea.vmem %s5110_s25, 3136  ;;  %p4857_p2 = scmp.lt.s32.totalorder %s5110_s25, %s5110_s25 }
  0x1f   : > { %p4850_p9 = scmp.ne.s32.totalorder %s5110_s25, %s4849_s13  ;;  %p4858_p6 = scmp.lt.s32.totalorder %s4849_s13, %s4849_s13 }
  0x21   : > { %p4852_p10 = pnand %p4850_p9, %p5133_p13  ;;  %p4859_p12 = por %p4858_p6, %p4857_p2 }
  0x23   : > { %p4853_p1 = pneg %p4852_p10 }
  0x25   : > { %p4860_p0 = pnand %p4859_p12, %p4853_p1 }
  0x27   : > { %4863 = shalt.err (!%p4860_p0)
}
  0x28   : > { %s5029_s14 = smov 64   ;;  %s5030_s20 = smov 4  }
  0x29   : > { %4676 = dma.hbm_to_vmem [thread:$0]  (!%p5117_p11), %s6926_s1, 3136, %s5110_s25, [#allocation6], %s5029_s14, %s5029_s14, %s5030_s20  }
  0x2a   : > { %s4864_s6 = scalar_lea.hbm %s6927_s2, 16 }
  0x2b   : > { %p4865_p1 = scmp.ne.s32.totalorder %s6927_s2, %s4864_s6  ;;  %p4871_p10 = scmp.lt.u32.totalorder %s4864_s6, %s6927_s2 }
  0x2d   : > { %p4867_p2 = pnand %p4865_p1, %p5133_p13 }
  0x2f   : > { %p4868_p6 = pneg %p4867_p2 }
  0x31   : > { %p4873_p3 = pnand %p4871_p10, %p4868_p6 }
  0x33   : > { %4876 = shalt.err (!%p4873_p3)
}
  0x34   : > { %s4877_s25 = scalar_lea.vmem %s5121_s28, 16  ;;  %s4884_s12 = scalar_lea.vmem %s5121_s28, 32 }
  0x35   : > { %p4878_p5 = scmp.ne.s32.totalorder %s5121_s28, %s4877_s25  ;;  %p4885_p12 = scmp.lt.s32.totalorder %s5121_s28, %s5121_s28 }
  0x36   : > { %p4886_p0 = scmp.lt.s32.totalorder %s4884_s12, %s4877_s25 }
  0x37   : > { %p4880_p7 = pnand %p4878_p5, %p5133_p13 }
  0x38   : > { %p4887_p1 = por %p4886_p0, %p4885_p12 }
  0x39   : > { %p4881_p9 = pneg %p4880_p7 }
  0x3b   : > { %p4888_p2 = pnand %p4887_p1, %p4881_p9 }
  0x3d   : > { %4891 = shalt.err (!%p4888_p2)
}
  0x3e   : > { %4679 = dma.hbm_to_vmem [thread:$0]  (!%p5117_p11), %s6927_s2, 16, %s5121_s28, [#allocation6]  }
  0x3f   : > { %s4892_s5 = scalar_lea.hbm %s6928_s3, 16 }
  0x40   : > { %p4893_p6 = scmp.ne.s32.totalorder %s6928_s3, %s4892_s5  ;;  %p4899_p5 = scmp.lt.u32.totalorder %s4892_s5, %s6928_s3 }
  0x42   : > { %p4895_p10 = pnand %p4893_p6, %p5133_p13 }
  0x44   : > { %p4896_p3 = pneg %p4895_p10 }
  0x46   : > { %p4901_p7 = pnand %p4899_p5, %p4896_p3 }
  0x48   : > { %4904 = shalt.err (!%p4901_p7)
}
  0x49   : > { %s4905_s11 = scalar_lea.vmem %s180_s30, 16  ;;  %s4912_s28 = scalar_lea.vmem %s180_s30, 32 }
  0x4a   : > { %p4906_p9 = scmp.ne.s32.totalorder %s180_s30, %s4905_s11  ;;  %p4913_p1 = scmp.lt.s32.totalorder %s180_s30, %s180_s30 }
  0x4b   : > { %p4914_p2 = scmp.lt.s32.totalorder %s4912_s28, %s4905_s11 }
  0x4c   : > { %p4908_p12 = pnand %p4906_p9, %p5133_p13 }
  0x4d   : > { %p4915_p4 = por %p4914_p2, %p4913_p1 }
  0x4e   : > { %p4909_p0 = pneg %p4908_p12 }
  0x50   : > { %p4916_p8 = pnand %p4915_p4, %p4909_p0 }
  0x52   : > { %4919 = shalt.err (!%p4916_p8)
}
  0x53   : > { %4682 = dma.hbm_to_vmem [thread:$0]  (!%p5117_p11), %s6928_s3, 16, %s180_s30, [#allocation9]  }
  0x54   : > { %s5201_s10 = sadd.s32 1, %s5024_s18   ;;  %s29_s26 = sadd.s32 1, %s5020_s17 }
  0x55   : > { %s26_s13 = ssub.s32 %s5024_s18, %s5201_s10  ;;  %p36_p8 = scmp.ne.s32.totalorder %s5020_s17, %s5016_s16 }
  0x56   : > { %p27_p4 = scmp.eq.s32.totalorder %s26_s13, 0  ;;  %p37_p13 = scmp.eq.s32.totalorder %s5024_s18, 0 }
  0x57   : > { %p4694_p6 = scmp.lt.s32.totalorder %s5024_s18, 2  ;;  %p6938_p3 = scmp.eq.s32.totalorder %s5087_s19, 1 }
  0x58   : > { %s5211_s24 = scalar_select %p27_p4, %s5020_s17, %s29_s26  }
  0x59   : > { %p38_p10 = por %p37_p13, %p36_p8  ;;  %p5215_p5 = por %p6938_p3, %p36_p8 }
  0x5a   : > { %s190_s29 = sand.u32 1, %s5020_s17   ;;  %s4655_s5 = smul.u32 4224, %s5024_s18 }
  0x5b   : > { %s4654_s30 = smul.u32 264, %s190_s29  ;;  %p5221_p11 = pnand %p4694_p6, %p38_p10 }
  0x5c   : > { %s5228_s9 = scalar_lea.hbm %s6925_s0, %s4655_s5  ;;  %s5232_s25 = scalar_lea.sflag [#allocation3], %s190_s29 }
  0x5d   : > { %s194_s11 = scalar_lea.vmem [#allocation2], %s4654_s30  ;;  %s4920_s12 = scalar_lea.hbm %s5228_s9, 4224 }
  0x5e   : > { %s201_s28 = sshll.u32 %s194_s11, 4  ;;  %p4921_p7 = scmp.ne.s32.totalorder %s5228_s9, %s4920_s12  ;;  %s5230_s28 = int_to_ptr.vmem [resolvable:$true] %s201_s28 }
  0x5f   : > { %p4922_p9 = pneg %p5221_p11  ;;  %s4925_s5 = scalar_lea.hbm %s6925_s0, 8448 }
  0x60   : > { %p4926_p1 = scmp.lt.u32.totalorder %s5228_s9, %s6925_s0  ;;  %p4927_p2 = scmp.lt.u32.totalorder %s4925_s5, %s4920_s12 }
  0x61   : > { %p4923_p12 = pnand %p4922_p9, %p4921_p7  ;;  %p4929_p8 = scmp.lt.u32.totalorder %s4920_s12, %s5228_s9 }
  0x62   : > { %p4928_p4 = por %p4927_p2, %p4926_p1 }
  0x63   : > { %p4924_p0 = pneg %p4923_p12 }
  0x64   : > { %p4930_p13 = por %p4929_p8, %p4928_p4 }
  0x66   : > { %p4931_p6 = pnand %p4930_p13, %p4924_p0 }
  0x68   : > { %4934 = shalt.err (!%p4931_p6)
}
  0x69   : > { %s4935_s29 = scalar_lea.vmem %s5230_s28, 4224  ;;  %s5031_s30 = smov [#allocation2]  }
  0x6a   : > { %p4936_p10 = scmp.ne.s32.totalorder %s5230_s28, %s4935_s29  ;;  %s4940_s11 = sshll.u32 %s5031_s30, 4  ;;  %s4941_s11 = int_to_ptr.vmem [resolvable:$false] %s4940_s11 }
  0x6b   : > { %s4942_s13 = scalar_lea.vmem %s4941_s11, 8448  ;;  %p4943_p12 = scmp.lt.s32.totalorder %s5230_s28, %s4941_s11 }
  0x6c   : > { %p4938_p3 = pnand %p4936_p10, %p4922_p9  ;;  %p4944_p1 = scmp.lt.s32.totalorder %s4942_s13, %s4935_s29 }
  0x6e   : > { %p4939_p7 = pneg %p4938_p3  ;;  %p4945_p2 = por %p4944_p1, %p4943_p12 }
  0x70   : > { %p4946_p4 = pnand %p4945_p2, %p4939_p7 }
  0x72   : > { %4949 = shalt.err (!%p4946_p4)
}
  0x73   : > { %4686 = dma.hbm_to_vmem [thread:$0]  (!%p5221_p11), %s5228_s9, 4224, %s5230_s28, %s5232_s25, %s5029_s14, %s5029_s14, %s5030_s20  }
  0x74   : > { %p6941_p9 = scmp.ne.s32.totalorder %s6935_s23, 0 }
  0x75   : > { %s5266_s12 = sand.u32 (!%p6941_p9), 1, %s5016_s16   ;;  %p6942_p0 = scmp.ne.s32.totalorder (!%p6941_p9), %s6933_s21, 0 }
  0x76   : > { %213 = sbr.rel (%p6941_p9) target bundleno = 859 (0x35b), region = 36  ;;  %s216_s5 = scalar_lea.sflag (!%p6941_p9), [#allocation3], %s5266_s12 }
  0x77   : > { %s4656_s26 = smul.u32 (!%p6941_p9), 264, %s5266_s12 }
  0x79   : > { %s5270_s7 = scalar_lea.vmem (!%p6941_p9), [#allocation2], %s4656_s26 }
  0x7d   : > { %4995 = dma.done.wait (%p6942_p0), %s216_s5, 4224  }
  0x7e   : > { %4997 = vsyncadd (%p6942_p0), %s216_s5, 4294963072  ;;  %p6943_p11 = scmp.eq.s32.totalorder %s5087_s19, 0 }
  0x80   : > { %4999 = dma.done.wait (%p6943_p11), [#allocation6], 3152   ;;  %p6944_p8 = pmov %p6943_p11 }
  0x82   : > { %5001 = vsyncadd (%p6944_p8), [#allocation6], 4294964144  ;;  %p6945_p13 = pmov %p6944_p8 }
  0x83   : > { %p6946_p6 = pmov %p6944_p8 }
  0x84   : > { %5003 = dma.done.wait (%p6945_p13), [#allocation9], 16  }
  0x85   : > { %5005 = vsyncadd (%p6946_p6), [#allocation9], 4294967280  ;;  %vm676_vm0 = vcmask 1046528   ;;  %v5285_v0 = vld [vmem:[%s5270_s7 + $0x24] sm:$0xff]   ;;  %v5291_v2 = vld [vmem:[%s5270_s7 + $0xc] sm:$0xff]   ;;  %s5032_s21 = smov 16  }
  0x86   : > { %v5288_v1 = vld [vmem:[%s5270_s7 + $0x2c] ss:$0 sps:$4 sm:$0x77]   ;;  %v686_v3 = vrot.slane %v5285_v0, 1  ;;  %v5299_v6 = vld [vmem:[%s5270_s7 + $0x30] sm:$0xff]   ;;  %v680_v7 = vrot.slane %v5291_v2, 1 }
  0x87   : > { %v687_v4 = vrot.slane %v5288_v1, 1  ;;  %v5296_v5 = vld [vmem:[%s5270_s7 + $0x14] ss:$0 sps:$4 sm:$0x77]   ;;  %vm451_vm1 = vsmask.f32 7424 }
  0x88   : > { %v5303_v8 = vld [vmem:[%s5270_s7 + $0x18] sm:$0xff]   ;;  %v681_v10 = vrot.slane %v5296_v5, 1  ;;  %v689_v12 = vrot.slane %v5299_v6, 1  ;;  %v5316_v16 = vld [vmem:[%s5270_s7 + $0x20] ss:$0 sps:$4 sm:$0x77]  }
  0x89   : > { %v688_v9 = vsel %vm676_vm0, %v686_v3, %v687_v4  ;;  %v5308_v11 = vld [vmem:[%s5270_s7 + $0x38] ss:$0 sps:$4 sm:$0x77]   ;;  %v683_v13 = vrot.slane %v5303_v8, 1  ;;  %v5320_v17 = vshrl.u32 %v5303_v8, 16  ;;  %v5323_v18 = vshll.u32 %v5303_v8, 16 }
  0x8a   : > { %731 = vrot.lane.b32.xlu1 %v688_v9, %s5032_s21  ;;  %v682_v14 = vsel %vm676_vm0, %v680_v7, %v681_v10  ;;  %v690_v15 = vrot.slane %v5308_v11, 1  ;;  %v5326_v19 = vshrl.u32 %v5291_v2, 16  ;;  %v5329_v20 = vshll.u32 %v5291_v2, 16  ;;  %s5033_s23 = smov 8   ;;  %s5034_s14 = smov 24  }
  0x8b   : > { %727 = vrot.lane.b32.xlu0 %v682_v14, %s5032_s21  ;;  %v684_v22 = vrot.slane %v5316_v16, 1  ;;  %v5334_v23 = vshll.u32 %v5316_v16, 16  ;;  %v5337_v24 = vshll.u32 %v5296_v5, 16  ;;  %vm757_vm2 = vsmask.f32 6400  ;;  %s5035_s20 = smov 32  }
  0x8c   : > { %v691_v21 = vsel %vm676_vm0, %v689_v12, %v690_v15  ;;  %v481_v25 = vrot.slane %v5323_v18, 1  ;;  %v469_v26 = vrot.slane %v5329_v20, 1  ;;  %v5343_v27 = vshrl.u32 %v5299_v6, 16  ;;  %s5036_s6 = smov 40   ;;  %s5037_s9 = smov 48  }
  0x8d   : > { %v5346_v28 = vshll.u32 %v5299_v6, 16  ;;  %v685_v29 = vsel %vm676_vm0, %v683_v13, %v684_v22  ;;  %v486_v30 = vrot.slane %v5334_v23, 1  ;;  %v474_v31 = vrot.slane %v5337_v24, 1  ;;  %s3769_s28 = sshll.u32 %s5266_s12, 7  ;;  %s4025_s8 = sshll.u32 %s5087_s19, 11 }
  0x8e   : > { %733 = vrot.lane.b32.xlu1 %v691_v21, %s5032_s21  ;;  %v5352_v32 = vshll.u32 %v5308_v11, 16  ;;  %v482_v33 = vor.u32 %v481_v25, %v5320_v17  ;;  %v470_v34 = vor.u32 %v469_v26, %v5326_v19  ;;  %v5359_v36 = vshrl.u32 %v5285_v0, 16  ;;  %s6746_s25 = scalar_lea.vmem [#allocation10], %s3769_s28  ;;  %s6873_s13 = scalar_lea.hbm %s6929_s4, %s4025_s8 }
  0x8f   : > { %729 = vrot.lane.b32.xlu0 %v685_v29, %s5032_s21  ;;  %v505_v35 = vrot.slane %v5346_v28, 1  ;;  %v5363_v38 = vshll.u32 %v5285_v0, 16  ;;  %v5366_v39 = vshll.u32 %v5288_v1, 16  ;;  %v788_v40 = vshrl.u32 %v5288_v1, 16  ;;  %s3656_s29 = sshll.u32 %s6746_s25, 4  ;;  %s3643_s19 = scalar_lea.sflag [#allocation4], %s5266_s12  ;;  %s6875_s29 = int_to_ptr.vmem [resolvable:$true] %s3656_s29 }
  0x90   : > { %v510_v37 = vrot.slane %v5352_v32, 1  ;;  %v487_v41 = vsel %vm451_vm1, %v482_v33, %v486_v30  ;;  %v475_v42 = vsel %vm451_vm1, %v470_v34, %v474_v31  ;;  %v785_v44 = vrot.slane %v5359_v36, 1  ;;  %s4950_s26 = scalar_lea.vmem %s6875_s29, 2048  ;;  %s5038_s5 = smov [#allocation10]  }
  0x91   : > { %v506_v43 = vor.u32 %v505_v35, %v5343_v27  ;;  %v493_v45 = vrot.slane %v5363_v38, 1  ;;  %v498_v46 = vrot.slane %v5366_v39, 1  ;;  %v786_v47 = vrot.slane %v5363_v38, 2  ;;  %p4951_p10 = scmp.ne.s32.totalorder %s6875_s29, %s4950_s26 }
  0x92   : > { %648 = vrot.lane.b32.xlu1 %v487_v41, %s5033_s23  ;;  %v790_v48 = vrot.slane %v788_v40, 1  ;;  %v791_v50 = vrot.slane %v5366_v39, 2  ;;  %v767_v51 = vrot.slane %v5326_v19, 1  ;;  %v768_v52 = vrot.slane %v5329_v20, 2 }
  0x93   : > { %646 = vrot.lane.b32.xlu0 %v475_v42, %s5033_s23  ;;  %v511_v49 = vsel %vm451_vm1, %v506_v43, %v510_v37  ;;  %v494_v53 = vor.u32 %v493_v45, %v5359_v36  ;;  %v787_v54 = vor.u32 %v786_v47, %v785_v44  ;;  %v770_v55 = vshrl.u32 %v5296_v5, 16  ;;  %p4952_p3 = pnand %p4951_p10, %p5215_p5 }
  0x94   : > { %v773_v56 = vrot.slane %v5337_v24, 2  ;;  %v792_v57 = vor.u32 %v791_v50, %v790_v48  ;;  %v769_v58 = vor.u32 %v768_v52, %v767_v51  ;;  %v794_v59 = vrot.slane %v5343_v27, 1 }
  0x95   : > { %v795_v60 = vrot.slane %v5346_v28, 2  ;;  %v499_v61 = vsel %vm451_vm1, %v494_v53, %v498_v46  ;;  %v772_v62 = vrot.slane %v770_v55, 1  ;;  %v797_v63 = vshrl.u32 %v5308_v11, 16  ;;  %v4768_v53 = vld [vmem:[#allocation5 + $0x1c] sm:$0xff]   ;;  %p4953_p7 = pneg %p4952_p3 }
  0x96   : > { %652 = vrot.lane.b32.xlu1 %v511_v49, %s5033_s23  ;;  %v800_v3 = vrot.slane %v5352_v32, 2  ;;  %v793_v4 = vsel %vm757_vm2, %v787_v54, %v792_v57  ;;  %v776_v9 = vrot.slane %v5320_v17, 1  ;;  %v777_v10 = vrot.slane %v5323_v18, 2  ;;  %4166 = vmatprep.subr.bf16.mxu1 %v4768_v53 }
  0x97   : > { %650 = vrot.lane.b32.xlu0 %v499_v61, %s5033_s23  ;;  %v796_v7 = vor.u32 %v795_v60, %v794_v59  ;;  %v774_v12 = vor.u32 %v773_v56, %v772_v62  ;;  %v799_v13 = vrot.slane %v797_v63, 1  ;;  %v779_v14 = vshrl.u32 %v5316_v16, 16  ;;  %4167 = vmatpush3.bf16.msra.mxu1 %v4768_v53  ;;  %v4769_v59 = vld [vmem:[#allocation5 + $0x54] sm:$0xff]  }
  0x98   : > { %v782_v15 = vrot.slane %v5334_v23, 2  ;;  %v778_v21 = vor.u32 %v777_v10, %v776_v9  ;;  %vm934_vm3 = vcmask 1045504   ;;  %v944_v29 = vrot.slane %v5285_v0, 2  ;;  %4286 = vmatprep.subr.bf16.mxu0 %v4769_v59 }
  0x99   : > { %v775_v22 = vsel %vm757_vm2, %v769_v58, %v774_v12  ;;  %v801_v25 = vor.u32 %v800_v3, %v799_v13  ;;  %v781_v26 = vrot.slane %v779_v14, 1  ;;  %v945_v30 = vrot.slane %v5288_v1, 2  ;;  %4287 = vmatpush3.bf16.msra.mxu0 %v4769_v59  ;;  %v5434_v3 = vld [vmem:[%s5270_s7 + $0x48] sm:$0xff]  }
  0x9a   : > { %908 = vrot.lane.b32.xlu1 %v793_v4, %s5034_s14  ;;  %v938_v31 = vrot.slane %v5291_v2, 2  ;;  %v939_v33 = vrot.slane %v5296_v5, 2  ;;  %v947_v34 = vrot.slane %v5299_v6, 2  ;;  %v948_v41 = vrot.slane %v5308_v11, 2 }
  0x9b   : > { %904 = vrot.lane.b32.xlu0 %v775_v22, %s5034_s14  ;;  %v802_v35 = vsel %vm757_vm2, %v796_v7, %v801_v25  ;;  %v783_v37 = vor.u32 %v782_v15, %v781_v26  ;;  %v941_v42 = vrot.slane %v5303_v8, 2  ;;  %v942_v43 = vrot.slane %v5316_v16, 2  ;;  %v5438_v7 = vld [vmem:[%s5270_s7 + $0x3c] sm:$0xff]  }
  0x9c   : > { %v1037_v44 = vrot.slane %v5359_v36, 2  ;;  %v1038_v45 = vrot.slane %v5363_v38, 3  ;;  %v1040_v46 = vrot.slane %v788_v40, 2  ;;  %v1041_v48 = vrot.slane %v5366_v39, 3 }
  0x9d   : > { %v784_v47 = vsel %vm757_vm2, %v778_v21, %v783_v37  ;;  %v1023_v49 = vrot.slane %v5326_v19, 2  ;;  %v946_v50 = vsel %vm934_vm3, %v944_v29, %v945_v30  ;;  %v1024_v51 = vrot.slane %v5329_v20, 3  ;;  %v5454_v21 = vld [vmem:[%s5270_s7 + $0x44] ss:$0 sps:$4 sm:$0x77]   ;;  %v4776_v30 = vld [vmem:[#allocation5 + $0x2c] sm:$0xff]  }
  0x9e   : > { %910 = vrot.lane.b32.xlu1 %v802_v35, %s5034_s14  ;;  %v1026_v52 = vrot.slane %v770_v55, 2  ;;  %v1027_v36 = vrot.slane %v5337_v24, 3  ;;  %v940_v38 = vsel %vm934_vm3, %v938_v31, %v939_v33  ;;  %v949_v40 = vsel %vm934_vm3, %v947_v34, %v948_v41  ;;  %v4775_v29 = vld [vmem:[#allocation5 + $0x5c] sm:$0xff]   ;;  %v4777_v35 = vld [vmem:[#allocation5 + $0x64] sm:$0xff]  }
  0x9f   : > { %906 = vrot.lane.b32.xlu0 %v784_v47, %s5034_s14  ;;  %v943_v54 = vsel %vm934_vm3, %v941_v42, %v942_v43  ;;  %vm1015_vm4 = vsmask.f32 5376  ;;  %v1039_v19 = vor.u32 %v1038_v45, %v1037_v44  ;;  %v1042_v39 = vor.u32 %v1041_v48, %v1040_v46  ;;  %4288 = vmatprep.subr.bf16.mxu0 %v4775_v29 }
  0xa0   : > { %v1044_v56 = vrot.slane %v5343_v27, 2  ;;  %v1045_v20 = vrot.slane %v5346_v28, 3  ;;  %v1025_v24 = vor.u32 %v1024_v51, %v1023_v49  ;;  %v1028_v55 = vor.u32 %v1027_v36, %v1026_v52  ;;  %4289 = vmatpush3.bf16.msra.mxu0 %v4775_v29 }
  0xa1   : > { %v1047_v57 = vrot.slane %v797_v63, 2  ;;  %v1048_v58 = vrot.slane %v5352_v32, 3  ;;  %v1030_v60 = vrot.slane %v5320_v17, 2  ;;  %v1031_v61 = vrot.slane %v5323_v18, 3  ;;  %4290 = vmatprep.subr.bf16.mxu0 %v4777_v35 }
  0xa2   : > { %989 = vrot.lane.b32.xlu1 %v946_v50, %s5035_s20  ;;  %v1033_v62 = vrot.slane %v779_v14, 2  ;;  %v1034_v27 = vrot.slane %v5334_v23, 3  ;;  %v1043_v28 = vsel %vm1015_vm4, %v1039_v19, %v1042_v39  ;;  %v1046_v63 = vor.u32 %v1045_v20, %v1044_v56  ;;  %v5441_v23 = vld [vmem:[%s5270_s7 + $0x50] ss:$0 sps:$4 sm:$0x77]  }
  0xa3   : > { %985 = vrot.lane.b32.xlu0 %v940_v38, %s5035_s20  ;;  %v1049_v32 = vor.u32 %v1048_v58, %v1047_v57  ;;  %v1029_v17 = vsel %vm1015_vm4, %v1025_v24, %v1028_v55  ;;  %v1032_v4 = vor.u32 %v1031_v61, %v1030_v60  ;;  %vm1160_vm5 = vcmask 1044480  }
  0xa4   : > { %v1035_v18 = vor.u32 %v1034_v27, %v1033_v62  ;;  %v1170_v9 = vrot.slane %v5285_v0, 3  ;;  %v1171_v10 = vrot.slane %v5288_v1, 3  ;;  %v1164_v13 = vrot.slane %v5291_v2, 3  ;;  %v4774_v1 = vld [vmem:[#allocation5 + $0x24] sm:$0xff]   ;;  %4291 = vmatpush3.bf16.msra.mxu0 %v4777_v35 }
  0xa5   : > { %v1050_v12 = vsel %vm1015_vm4, %v1046_v63, %v1049_v32  ;;  %v1165_v14 = vrot.slane %v5296_v5, 3  ;;  %v5451_v15 = vshll.u32 %v5434_v3, 16  ;;  %v5458_v25 = vshll.u32 %v5438_v7, 16  ;;  %4168 = vmatprep.subr.bf16.mxu1 %v4774_v1  ;;  %v5514_v63 = vld [vmem:[%s5270_s7 + $0x60] sm:$0xff]  }
  0xa6   : > { %991 = vrot.lane.b32.xlu1 %v949_v40, %s5035_s20  ;;  %v1036_v22 = vsel %vm1015_vm4, %v1032_v4, %v1035_v18  ;;  %v1173_v0 = vrot.slane %v5299_v6, 3  ;;  %v1172_v26 = vsel %vm1160_vm5, %v1170_v9, %v1171_v10  ;;  %v1174_v2 = vrot.slane %v5308_v11, 3  ;;  %4169 = vmatpush3.bf16.msra.mxu1 %v4774_v1  ;;  %v5528_v1 = vld [vmem:[%s5270_s7 + $0x54] sm:$0xff]  }
  0xa7   : > { %987 = vrot.lane.b32.xlu0 %v943_v54, %s5035_s20  ;;  %v1167_v5 = vrot.slane %v5303_v8, 3  ;;  %v1166_v31 = vsel %vm1160_vm5, %v1164_v13, %v1165_v14  ;;  %v5468_v33 = vshrl.u32 %v5434_v3, 16  ;;  %v529_v6 = vrot.slane %v5451_v15, 1  ;;  %4170 = vmatprep.subr.bf16.mxu1 %v4776_v30 }
  0xa8   : > { %v5472_v34 = vshll.u32 %v5441_v23, 16  ;;  %v1168_v11 = vrot.slane %v5316_v16, 3  ;;  %v5476_v8 = vshrl.u32 %v5438_v7, 16  ;;  %v517_v37 = vrot.slane %v5458_v25, 1 }
  0xa9   : > { %v5480_v41 = vshll.u32 %v5454_v21, 16  ;;  %v1175_v16 = vsel %vm1160_vm5, %v1173_v0, %v1174_v2  ;;  %v530_v42 = vor.u32 %v529_v6, %v5468_v33  ;;  %v815_v44 = vshrl.u32 %v5441_v23, 16 }
  0xaa   : > { %1134 = vrot.lane.b32.xlu1 %v1043_v28, %s5036_s6  ;;  %v534_v43 = vrot.slane %v5472_v34, 1  ;;  %v1169_v45 = vsel %vm1160_vm5, %v1167_v5, %v1168_v11  ;;  %v518_v46 = vor.u32 %v517_v37, %v5476_v8  ;;  %v806_v48 = vshrl.u32 %v5454_v21, 16  ;;  %4171 = vmatpush3.bf16.msra.mxu1 %v4776_v30  ;;  %v5534_v5 = vld [vmem:[%s5270_s7 + $0x68] ss:$0 sps:$4 sm:$0x77]  }
  0xab   : > { %1130 = vrot.lane.b32.xlu0 %v1029_v17, %s5036_s6  ;;  %v522_v47 = vrot.slane %v5480_v41, 1  ;;  %v695_v49 = vrot.slane %v5434_v3, 1  ;;  %v696_v50 = vrot.slane %v5441_v23, 1  ;;  %v692_v51 = vrot.slane %v5438_v7, 1 }
  0xac   : > { %v693_v52 = vrot.slane %v5454_v21, 1  ;;  %v812_v36 = vrot.slane %v5468_v33, 1  ;;  %v813_v53 = vrot.slane %v5451_v15, 2  ;;  %v535_v38 = vsel %vm451_vm1, %v530_v42, %v534_v43 }
  0xad   : > { %v817_v40 = vrot.slane %v815_v44, 1  ;;  %v818_v54 = vrot.slane %v5472_v34, 2  ;;  %v803_v19 = vrot.slane %v5476_v8, 1  ;;  %v523_v39 = vsel %vm451_vm1, %v518_v46, %v522_v47 }
  0xae   : > { %1136 = vrot.lane.b32.xlu1 %v1050_v12, %s5036_s6  ;;  %v804_v56 = vrot.slane %v5458_v25, 2  ;;  %v808_v20 = vrot.slane %v806_v48, 1  ;;  %v809_v24 = vrot.slane %v5480_v41, 2  ;;  %v697_v55 = vsel %vm676_vm0, %v695_v49, %v696_v50 }
  0xaf   : > { %1132 = vrot.lane.b32.xlu0 %v1036_v22, %s5036_s6  ;;  %v814_v57 = vor.u32 %v813_v53, %v812_v36  ;;  %v819_v58 = vor.u32 %v818_v54, %v817_v40  ;;  %v694_v59 = vsel %vm676_vm0, %v692_v51, %v693_v52  ;;  %v953_v62 = vrot.slane %v5434_v3, 2 }
  0xb0   : > { %v805_v60 = vor.u32 %v804_v56, %v803_v19  ;;  %v810_v61 = vor.u32 %v809_v24, %v808_v20  ;;  %v954_v27 = vrot.slane %v5441_v23, 2  ;;  %v950_v28 = vrot.slane %v5438_v7, 2 }
  0xb1   : > { %v951_v32 = vrot.slane %v5454_v21, 2  ;;  %v1058_v17 = vrot.slane %v5468_v33, 2  ;;  %v1059_v4 = vrot.slane %v5451_v15, 3  ;;  %v1061_v18 = vrot.slane %v815_v44, 2 }
  0xb2   : > { %1215 = vrot.lane.b32.xlu1 %v1172_v26, %s5037_s9  ;;  %v820_v9 = vsel %vm757_vm2, %v814_v57, %v819_v58  ;;  %v1062_v10 = vrot.slane %v5472_v34, 3  ;;  %v1051_v12 = vrot.slane %v5476_v8, 2  ;;  %v811_v13 = vsel %vm757_vm2, %v805_v60, %v810_v61  ;;  %v5541_v33 = vld [vmem:[%s5270_s7 + $0x5c] ss:$0 sps:$4 sm:$0x77]  }
  0xb3   : > { %1211 = vrot.lane.b32.xlu0 %v1166_v31, %s5037_s9  ;;  %v1052_v14 = vrot.slane %v5458_v25, 3  ;;  %v1054_v22 = vrot.slane %v806_v48, 2  ;;  %v1055_v0 = vrot.slane %v5480_v41, 3  ;;  %v955_v15 = vsel %vm934_vm3, %v953_v62, %v954_v27 }
  0xb4   : > { %v1060_v26 = vor.u32 %v1059_v4, %v1058_v17  ;;  %v1063_v2 = vor.u32 %v1062_v10, %v1061_v18  ;;  %v5537_v29 = vshll.u32 %v5514_v63, 16  ;;  %v952_v25 = vsel %vm934_vm3, %v950_v28, %v951_v32 }
  0xb5   : > { %v1053_v30 = vor.u32 %v1052_v14, %v1051_v12  ;;  %v1056_v31 = vor.u32 %v1055_v0, %v1054_v22  ;;  %v5544_v6 = vshll.u32 %v5528_v1, 16  ;;  %v1179_v34 = vrot.slane %v5434_v3, 3  ;;  %v5603_v22 = vld [vmem:[%s5270_s7 + $0x78] sm:$0xff]  }
  0xb6   : > { %1217 = vrot.lane.b32.xlu1 %v1175_v16, %s5037_s9  ;;  %v1180_v35 = vrot.slane %v5441_v23, 3  ;;  %v1176_v11 = vrot.slane %v5438_v7, 3  ;;  %v1177_v8 = vrot.slane %v5454_v21, 3  ;;  %v5552_v37 = vshrl.u32 %v5514_v63, 16 }
  0xb7   : > { %1213 = vrot.lane.b32.xlu0 %v1169_v45, %s5037_s9  ;;  %v1064_v41 = vsel %vm1015_vm4, %v1060_v26, %v1063_v2  ;;  %v553_v16 = vrot.slane %v5537_v29, 1  ;;  %v556_v42 = vshll.u32 %v5534_v5, 16  ;;  %v1057_v3 = vsel %vm1015_vm4, %v1053_v30, %v1056_v31  ;;  %v5613_v31 = vld [vmem:[%s5270_s7 + $0x80] ss:$0 sps:$4 sm:$0x77]  }
  0xb8   : > { %v5560_v43 = vshrl.u32 %v5528_v1, 16  ;;  %v541_v7 = vrot.slane %v5544_v6, 1  ;;  %v5564_v23 = vshll.u32 %v5541_v33, 16  ;;  %v1181_v21 = vsel %vm1160_vm5, %v1179_v34, %v1180_v35 }
  0xb9   : > { %v554_v44 = vor.u32 %v553_v16, %v5552_v37  ;;  %v558_v45 = vrot.slane %v556_v42, 1  ;;  %v833_v46 = vshrl.u32 %v5534_v5, 16  ;;  %v1178_v47 = vsel %vm1160_vm5, %v1176_v11, %v1177_v8 }
  0xba   : > { %656 = vrot.lane.b32.xlu1 %v535_v38, %s5033_s23  ;;  %v542_v48 = vor.u32 %v541_v7, %v5560_v43  ;;  %v546_v49 = vrot.slane %v5564_v23, 1  ;;  %v824_v50 = vshrl.u32 %v5541_v33, 16  ;;  %v701_v51 = vrot.slane %v5514_v63, 1 }
  0xbb   : > { %654 = vrot.lane.b32.xlu0 %v523_v39, %s5033_s23  ;;  %v702_v52 = vrot.slane %v5534_v5, 1  ;;  %v698_v36 = vrot.slane %v5528_v1, 1  ;;  %v699_v53 = vrot.slane %v5541_v33, 1  ;;  %v830_v38 = vrot.slane %v5552_v37, 1 }
  0xbc   : > { %v831_v40 = vrot.slane %v5537_v29, 2  ;;  %v559_v54 = vsel %vm451_vm1, %v554_v44, %v558_v45  ;;  %v835_v19 = vrot.slane %v833_v46, 1  ;;  %v836_v39 = vrot.slane %v556_v42, 2 }
  0xbd   : > { %v821_v56 = vrot.slane %v5560_v43, 1  ;;  %v547_v20 = vsel %vm451_vm1, %v542_v48, %v546_v49  ;;  %v822_v24 = vrot.slane %v5544_v6, 2  ;;  %v827_v57 = vrot.slane %v5564_v23, 2 }
  0xbe   : > { %737 = vrot.lane.b32.xlu1 %v697_v55, %s5032_s21  ;;  %v826_v55 = vrot.slane %v824_v50, 1  ;;  %v703_v58 = vsel %vm676_vm0, %v701_v51, %v702_v52  ;;  %v832_v60 = vor.u32 %v831_v40, %v830_v38  ;;  %v837_v61 = vor.u32 %v836_v39, %v835_v19 }
  0xbf   : > { %735 = vrot.lane.b32.xlu0 %v694_v59, %s5032_s21  ;;  %v700_v59 = vsel %vm676_vm0, %v698_v36, %v699_v53  ;;  %v823_v62 = vor.u32 %v822_v24, %v821_v56  ;;  %v959_v28 = vrot.slane %v5514_v63, 2  ;;  %v960_v32 = vrot.slane %v5534_v5, 2 }
  0xc0   : > { %v828_v27 = vor.u32 %v827_v57, %v826_v55  ;;  %v1072_v17 = vrot.slane %v5552_v37, 2  ;;  %v1073_v4 = vrot.slane %v5537_v29, 3  ;;  %v1075_v18 = vrot.slane %v833_v46, 2  ;;  %v5609_v29 = vld [vmem:[%s5270_s7 + $0x6c] sm:$0xff]  }
  0xc1   : > { %v838_v10 = vsel %vm757_vm2, %v832_v60, %v837_v61  ;;  %v956_v12 = vrot.slane %v5528_v1, 2  ;;  %v1065_v14 = vrot.slane %v5560_v43, 2  ;;  %v1068_v26 = vrot.slane %v824_v50, 2  ;;  %v5622_v37 = vld [vmem:[%s5270_s7 + $0x74] ss:$0 sps:$4 sm:$0x77]  }
  0xc2   : > { %914 = vrot.lane.b32.xlu1 %v820_v9, %s5034_s14  ;;  %v1076_v9 = vrot.slane %v556_v42, 3  ;;  %v829_v0 = vsel %vm757_vm2, %v823_v62, %v828_v27  ;;  %v1069_v2 = vrot.slane %v5564_v23, 3  ;;  %v961_v34 = vsel %vm934_vm3, %v959_v28, %v960_v32  ;;  %v4778_v27 = vld [vmem:[#allocation5 + $0x34] ss:$0 sps:$4 sm:$0xff]  }
  0xc3   : > { %912 = vrot.lane.b32.xlu0 %v811_v13, %s5034_s14  ;;  %v957_v13 = vrot.slane %v5541_v33, 2  ;;  %v5618_v35 = vshll.u32 %v5603_v22, 16  ;;  %v1185_v16 = vrot.slane %v5514_v63, 3  ;;  %v1182_v43 = vrot.slane %v5528_v1, 3 }
  0xc4   : > { %v1077_v30 = vor.u32 %v1076_v9, %v1075_v18  ;;  %v1070_v8 = vor.u32 %v1069_v2, %v1068_v26  ;;  %v1183_v7 = vrot.slane %v5541_v33, 3  ;;  %v5635_v23 = vshrl.u32 %v5603_v22, 16 }
  0xc5   : > { %v5639_v44 = vshll.u32 %v5613_v31, 16  ;;  %v5643_v45 = vshrl.u32 %v5609_v29, 16  ;;  %v5647_v1 = vshll.u32 %v5622_v37, 16  ;;  %v851_v48 = vshrl.u32 %v5613_v31, 16 }
  0xc6   : > { %995 = vrot.lane.b32.xlu1 %v955_v15, %s5035_s20  ;;  %v1066_v15 = vrot.slane %v5544_v6, 3  ;;  %v958_v6 = vsel %vm934_vm3, %v956_v12, %v957_v13  ;;  %v1184_v49 = vsel %vm1160_vm5, %v1182_v43, %v1183_v7  ;;  %v842_v52 = vshrl.u32 %v5622_v37, 16  ;;  %v5710_v7 = vld [vmem:[%s5270_s7 + $0x98] ss:$0 sps:$4 sm:$0x77]  }
  0xc7   : > { %993 = vrot.lane.b32.xlu0 %v952_v25, %s5035_s20  ;;  %v1074_v25 = vor.u32 %v1073_v4, %v1072_v17  ;;  %v570_v51 = vrot.slane %v5647_v1, 1  ;;  %v707_v36 = vrot.slane %v5603_v22, 1  ;;  %v708_v53 = vrot.slane %v5613_v31, 1  ;;  %v4779_v4 = vld [vmem:[#allocation5 + $0x6c] ss:$0 sps:$4 sm:$0xff]  }
  0xc8   : > { %v1067_v11 = vor.u32 %v1066_v15, %v1065_v14  ;;  %v704_v38 = vrot.slane %v5609_v29, 1  ;;  %v705_v40 = vrot.slane %v5622_v37, 1  ;;  %v849_v19 = vrot.slane %v5618_v35, 2 }
  0xc9   : > { %v1078_v42 = vsel %vm1015_vm4, %v1074_v25, %v1077_v30  ;;  %v853_v56 = vrot.slane %v851_v48, 1  ;;  %v839_v24 = vrot.slane %v5643_v45, 1  ;;  %v709_v60 = vsel %vm676_vm0, %v707_v36, %v708_v53  ;;  %v5690_v30 = vld [vmem:[%s5270_s7 + $0x90] sm:$0xff]  }
  0xca   : > { %1140 = vrot.lane.b32.xlu1 %v1064_v41, %s5036_s6  ;;  %v5625_v41 = vshll.u32 %v5609_v29, 16  ;;  %v1071_v63 = vsel %vm1015_vm4, %v1067_v11, %v1070_v8  ;;  %v706_v28 = vsel %vm676_vm0, %v704_v38, %v705_v40  ;;  %v965_v18 = vrot.slane %v5603_v22, 2  ;;  %v5698_v8 = vld [vmem:[%s5270_s7 + $0x84] sm:$0xff]  }
  0xcb   : > { %1138 = vrot.lane.b32.xlu0 %v1057_v3, %s5036_s6  ;;  %v1186_v3 = vrot.slane %v5534_v5, 3  ;;  %v966_v9 = vrot.slane %v5613_v31, 2  ;;  %v963_v12 = vrot.slane %v5622_v37, 2  ;;  %v1086_v13 = vrot.slane %v5635_v23, 2 }
  0xcc   : > { %v565_v5 = vrot.slane %v5625_v41, 1  ;;  %v840_v57 = vrot.slane %v5625_v41, 2  ;;  %v1087_v14 = vrot.slane %v5618_v35, 3  ;;  %vm1576_vm6 = vcmask 1043456  }
  0xcd   : > { %v1187_v33 = vsel %vm1160_vm5, %v1185_v16, %v1186_v3  ;;  %v1090_v26 = vrot.slane %v5639_v44, 3  ;;  %v1079_v2 = vrot.slane %v5643_v45, 2  ;;  %v1080_v25 = vrot.slane %v5625_v41, 3  ;;  %4646 = vmatprep.subr.msk.bf16.mxu1 %vm1576_vm6, %v4778_v27  ;;  %4649 = vmatprep.subr.msk.bf16.mxu0 %vm1576_vm6, %v4779_v4 }
  0xce   : > { %1221 = vrot.lane.b32.xlu1 %v1181_v21, %s5037_s9  ;;  %v577_v21 = vrot.slane %v5618_v35, 1  ;;  %v566_v50 = vor.u32 %v565_v5, %v5643_v45  ;;  %v841_v32 = vor.u32 %v840_v57, %v839_v24  ;;  %v1083_v11 = vrot.slane %v5647_v1, 3  ;;  %v5718_v45 = vld [vmem:[%s5270_s7 + $0x8c] ss:$0 sps:$4 sm:$0x77]  }
  0xcf   : > { %1219 = vrot.lane.b32.xlu0 %v1178_v47, %s5037_s9  ;;  %v582_v47 = vrot.slane %v5639_v44, 1  ;;  %v1578_v16 = vsel %vm1576_vm6, %v4778_v27, 0  ;;  %v5703_v41 = vsel %vm1576_vm6, %v4779_v4, 0  ;;  %v1088_v3 = vor.u32 %v1087_v14, %v1086_v13 }
  0xd0   : > { %v578_v46 = vor.u32 %v577_v21, %v5635_v23  ;;  %v571_v55 = vsel %vm451_vm1, %v566_v50, %v570_v51  ;;  %4173 = vmatpush3.bf16.msra.mxu1 %v1578_v16  ;;  %4293 = vmatpush3.bf16.msra.mxu0 %v5703_v41  ;;  %v5721_v5 = vshll.u32 %v5698_v8, 16  ;;  %v5735_v51 = vshll.u32 %v5710_v7, 16 }
  0xd1   : > { %v869_v40 = vshrl.u32 %v5710_v7, 16  ;;  %v713_v24 = vrot.slane %v5690_v30, 1  ;;  %v710_v57 = vrot.slane %v5698_v8, 1  ;;  %vm1241_vm7 = vcmask 64512  }
  0xd2   : > { %660 = vrot.lane.b32.xlu1 %v559_v54, %s5033_s23  ;;  %v848_v54 = vrot.slane %v5635_v23, 1  ;;  %v583_v39 = vsel %vm451_vm1, %v578_v46, %v582_v47  ;;  %v5713_v23 = vshll.u32 %v5690_v30, 16  ;;  %v1188_v46 = vrot.slane %v5609_v29, 3 }
  0xd3   : > { %658 = vrot.lane.b32.xlu0 %v547_v20, %s5033_s23  ;;  %v854_v20 = vrot.slane %v5639_v44, 2  ;;  %v1081_v44 = vor.u32 %v1080_v25, %v1079_v2  ;;  %v1189_v47 = vrot.slane %v5622_v37, 3  ;;  %v5743_v37 = vshll.u32 %v5718_v45, 16 }
  0xd4   : > { %v850_v61 = vor.u32 %v849_v19, %v848_v54  ;;  %v601_v50 = vrot.slane %v5713_v23, 1  ;;  %v606_v38 = vrot.slane %v5735_v51, 1  ;;  %v871_v27 = vrot.slane %v869_v40, 1 }
  0xd5   : > { %v855_v62 = vor.u32 %v854_v20, %v853_v56  ;;  %v1190_v54 = vsel %vm1160_vm5, %v1188_v46, %v1189_v47  ;;  %v860_v56 = vshrl.u32 %v5718_v45, 16  ;;  %v858_v4 = vrot.slane %v5721_v5, 2 }
  0xd6   : > { %741 = vrot.lane.b32.xlu1 %v703_v58, %s5032_s21  ;;  %v844_v58 = vrot.slane %v842_v52, 1  ;;  %v1101_v16 = vrot.slane %v5713_v23, 3  ;;  %v1094_v46 = vrot.slane %v5721_v5, 3  ;;  %vm1274_vm8 = vcmask 130048  }
  0xd7   : > { %739 = vrot.lane.b32.xlu0 %v700_v59, %s5032_s21  ;;  %v845_v59 = vrot.slane %v5647_v1, 2  ;;  %v856_v15 = vsel %vm757_vm2, %v850_v61, %v855_v62  ;;  %v1191_v1 = vrot.slane %v5603_v22, 3  ;;  %v1096_v47 = vrot.slane %v860_v56, 2 }
  0xd8   : > { %vm1307_vm9 = vcmask 195584   ;;  %vm1340_vm10 = vcmask 261120   ;;  %vm1373_vm11 = vcmask 326656   ;;  %vm1406_vm12 = vcmask 392192  }
  0xd9   : > { %v846_v17 = vor.u32 %v845_v59, %v844_v58  ;;  %v711_v58 = vrot.slane %v5718_v45, 1  ;;  %vm1543_vm13 = vcmask 457728   ;;  %vm3609_vm14 = vcmask 519168  }
  0xda   : > { %918 = vrot.lane.b32.xlu1 %v838_v10, %s5034_s14  ;;  %v962_v10 = vrot.slane %v5609_v29, 2  ;;  %v589_v29 = vrot.slane %v5721_v5, 1 }
  0xdb   : > { %916 = vrot.lane.b32.xlu0 %v829_v0, %s5034_s14  ;;  %v1089_v0 = vrot.slane %v851_v48, 2  ;;  %v847_v35 = vsel %vm757_vm2, %v841_v32, %v846_v17 }
  0xdc   : > { %v964_v21 = vsel %vm934_vm3, %v962_v10, %v963_v12 }
  0xdd   : > { %v1091_v43 = vor.u32 %v1090_v26, %v1089_v0 }
  0xde   : > { %999 = vrot.lane.b32.xlu1 %v961_v34, %s5035_s20  ;;  %v5693_v34 = vld [vmem:[#allocation5 + $0x70] sm:$0xff]  }
  0xdf   : > { %997 = vrot.lane.b32.xlu0 %v958_v6, %s5035_s20  ;;  %v1082_v6 = vrot.slane %v842_v52, 2  ;;  %4326 = vmatprep.subr.bf16.mxu0 %v5693_v34  ;;  %v1092_v48 = vsel %vm1015_vm4, %v1088_v3, %v1091_v43  ;;  %v1104_v3 = vrot.slane %v5735_v51, 3 }
  0xe2   : > { %1144 = vrot.lane.b32.xlu1 %v1078_v42, %s5036_s6  ;;  %v967_v42 = vsel %vm934_vm3, %v965_v18, %v966_v9  ;;  %v862_v18 = vrot.slane %v860_v56, 1  ;;  %v863_v9 = vrot.slane %v5743_v37, 2  ;;  %v1197_v56 = vrot.slane %v5690_v30, 3 }
  0xe3   : > { %1142 = vrot.lane.b32.xlu0 %v1071_v63, %s5036_s6  ;;  %v1084_v63 = vor.u32 %v1083_v11, %v1082_v6  ;;  %v972_v6 = vrot.slane %v5710_v7, 2 }
  0xe4   : > { %v864_v2 = vor.u32 %v863_v9, %v862_v18 }
  0xe5   : > { %v1085_v22 = vsel %vm1015_vm4, %v1081_v44, %v1084_v63  ;;  %v969_v44 = vrot.slane %v5718_v45, 2 }
  0xe6   : > { %1225 = vrot.lane.b32.xlu1 %v1187_v33, %s5037_s9  ;;  %v1192_v33 = vrot.slane %v5613_v31, 3  ;;  %v5739_v31 = vshrl.u32 %v5698_v8, 16 }
  0xe7   : > { %1223 = vrot.lane.b32.xlu0 %v1184_v49, %s5037_s9  ;;  %v5731_v49 = vshrl.u32 %v5690_v30, 16 }
  0xe8   : > { %v1193_v36 = vsel %vm1160_vm5, %v1191_v1, %v1192_v33  ;;  %v590_v19 = vor.u32 %v589_v29, %v5739_v31  ;;  %v857_v32 = vrot.slane %v5739_v31, 1  ;;  %v1093_v63 = vrot.slane %v5739_v31, 2  ;;  %v5797_v1 = vld [vmem:[%s5270_s7 + $0xa8] sm:$0xff]   ;;  %v5813_v29 = vld [vmem:[%s5270_s7 + $0xb0] ss:$0 sps:$4 sm:$0x77]  }
  0xe9   : > { %v602_v53 = vor.u32 %v601_v50, %v5731_v49  ;;  %v866_v59 = vrot.slane %v5731_v49, 1  ;;  %v1100_v11 = vrot.slane %v5731_v49, 2  ;;  %v5805_v49 = vld [vmem:[%s5270_s7 + $0x9c] sm:$0xff]   ;;  %v5816_v5 = vshll.u32 %v5797_v1, 16 }
  0xea   : > { %664 = vrot.lane.b32.xlu1 %v583_v39, %s5033_s23  ;;  %v594_v39 = vrot.slane %v5743_v37, 1  ;;  %v859_v26 = vor.u32 %v858_v4, %v857_v32  ;;  %v887_v32 = vshrl.u32 %v5813_v29, 16 }
  0xeb   : > { %662 = vrot.lane.b32.xlu0 %v571_v55, %s5033_s23  ;;  %v714_v55 = vrot.slane %v5710_v7, 1  ;;  %v607_v62 = vsel %vm451_vm1, %v602_v53, %v606_v38  ;;  %v1095_v53 = vor.u32 %v1094_v46, %v1093_v63 }
  0xec   : > { %v595_v17 = vsel %vm451_vm1, %v590_v19, %v594_v39 }
  0xed   : > { %v715_v12 = vsel %vm676_vm0, %v713_v24, %v714_v55  ;;  %v1198_v24 = vrot.slane %v5710_v7, 3  ;;  %v1194_v55 = vrot.slane %v5698_v8, 3  ;;  %v5847_v7 = vshrl.u32 %v5805_v49, 16 }
  0xee   : > { %745 = vrot.lane.b32.xlu1 %v709_v60, %s5032_s21  ;;  %v867_v60 = vrot.slane %v5713_v23, 2  ;;  %v865_v23 = vsel %vm757_vm2, %v859_v26, %v864_v2  ;;  %v719_v26 = vrot.slane %v5797_v1, 1  ;;  %v720_v2 = vrot.slane %v5813_v29, 1 }
  0xef   : > { %743 = vrot.lane.b32.xlu0 %v706_v28, %s5032_s21  ;;  %v872_v28 = vrot.slane %v5735_v51, 2  ;;  %v1102_v51 = vor.u32 %v1101_v16, %v1100_v11 }
  0xf0   : > { %v868_v13 = vor.u32 %v867_v60, %v866_v59  ;;  %v625_v59 = vrot.slane %v5816_v5, 1  ;;  %v5841_v60 = vshll.u32 %v5813_v29, 16 }
  0xf1   : > { %v873_v14 = vor.u32 %v872_v28, %v871_v27  ;;  %v1199_v28 = vsel %vm1160_vm5, %v1197_v56, %v1198_v24  ;;  %v978_v56 = vrot.slane %v5813_v29, 2  ;;  %v974_v24 = vrot.slane %v5805_v49, 2 }
  0xf2   : > { %922 = vrot.lane.b32.xlu1 %v856_v15, %s5034_s14  ;;  %v712_v15 = vsel %vm676_vm0, %v710_v57, %v711_v58  ;;  %v1195_v57 = vrot.slane %v5718_v45, 3  ;;  %v5837_v58 = vshrl.u32 %v5797_v1, 16  ;;  %v630_v9 = vrot.slane %v5841_v60, 1 }
  0xf3   : > { %920 = vrot.lane.b32.xlu0 %v847_v35, %s5034_s14  ;;  %v971_v35 = vrot.slane %v5690_v30, 2  ;;  %v874_v43 = vsel %vm757_vm2, %v868_v13, %v873_v14 }
  0xf4   : > { %v1196_v4 = vsel %vm1160_vm5, %v1194_v55, %v1195_v57  ;;  %v626_v18 = vor.u32 %v625_v59, %v5837_v58  ;;  %v884_v16 = vrot.slane %v5837_v58, 1  ;;  %v1114_v59 = vrot.slane %v5837_v58, 2 }
  0xf5   : > { %v973_v31 = vsel %vm934_vm3, %v971_v35, %v972_v6  ;;  %v716_v6 = vrot.slane %v5805_v49, 1 }
  0xf6   : > { %1003 = vrot.lane.b32.xlu1 %v967_v42, %s5035_s20  ;;  %v1103_v42 = vrot.slane %v869_v40, 2  ;;  %v5822_v40 = vld [vmem:[%s5270_s7 + $0xa4] ss:$0 sps:$4 sm:$0x77]   ;;  %v631_v63 = vsel %vm451_vm1, %v626_v18, %v630_v9  ;;  %v1107_v18 = vrot.slane %v5847_v7, 2 }
  0xf7   : > { %1001 = vrot.lane.b32.xlu0 %v964_v21, %s5035_s20  ;;  %v968_v21 = vrot.slane %v5698_v8, 2  ;;  %v5851_v27 = vshll.u32 %v5822_v40, 16  ;;  %v717_v11 = vrot.slane %v5822_v40, 1  ;;  %v975_v57 = vrot.slane %v5822_v40, 2 }
  0xf9   : > { %v881_v46 = vrot.slane %v5851_v27, 2 }
  0xfa   : > { %1148 = vrot.lane.b32.xlu1 %v1092_v48, %s5036_s6  ;;  %v1097_v48 = vrot.slane %v5743_v37, 3  ;;  %v970_v37 = vsel %vm934_vm3, %v968_v21, %v969_v44  ;;  %v875_v21 = vrot.slane %v5847_v7, 1 }
  0xfb   : > { %1146 = vrot.lane.b32.xlu0 %v1085_v22, %s5036_s6  ;;  %v1105_v22 = vor.u32 %v1104_v3, %v1103_v42  ;;  %v885_v42 = vrot.slane %v5816_v5, 2  ;;  %v889_v3 = vrot.slane %v887_v32, 1 }
  0xfc   : > { %v5747_v52 = vpop.permute.xlu1 %731  ;;  %v1098_v38 = vor.u32 %v1097_v48, %v1096_v47 }
  0xfd   : > { %v5757_v20 = vpop.permute.xlu0 %727  ;;  %v1106_v39 = vsel %vm1015_vm4, %v1102_v51, %v1105_v22  ;;  %v721_v22 = vsel %vm676_vm0, %v719_v26, %v720_v2  ;;  %v1111_v26 = vrot.slane %v5851_v27, 3  ;;  %v4816_v2 = vld [vmem:[%s5270_s7 + $0x24] sm:$0xff]  }
  0xfe   : > { %1229 = vrot.lane.b32.xlu1 %v1193_v36, %s5037_s9  ;;  %v1099_v30 = vsel %vm1015_vm4, %v1095_v53, %v1098_v38  ;;  %v977_v53 = vrot.slane %v5797_v1, 2 }
  0xff   : > { %1227 = vrot.lane.b32.xlu0 %v1190_v54, %s5037_s9  ;;  %v5825_v54 = vshll.u32 %v5805_v49, 16 }
 0x100   : > { %v5767_v61 = vpop.permute.xlu1 %733 }
 0x101   : > { %v5775_v10 = vpop.permute.xlu0 %729  ;;  %v613_v8 = vrot.slane %v5825_v54, 1  ;;  %v876_v44 = vrot.slane %v5825_v54, 2  ;;  %v1108_v9 = vrot.slane %v5825_v54, 3 }
 0x102   : > { %668 = vrot.lane.b32.xlu1 %v607_v62, %s5033_s23 }
 0x103   : > { %666 = vrot.lane.b32.xlu0 %v595_v17, %s5033_s23  ;;  %v5858_v17 = vld [vmem:[#allocation5] sm:$0xff]   ;;  %v614_v14 = vor.u32 %v613_v8, %v5847_v7 }
 0x104   : > { %v5780_v0 = vpop.permute.xlu1 %648  ;;  %4206 = vmatprep.subr.bf16.mxu1 %v5858_v17 }
 0x105   : > { %v5783_v25 = vpop.permute.xlu0 %646 }
 0x106   : > { %749 = vrot.lane.b32.xlu1 %v715_v12, %s5032_s21  ;;  %v878_v12 = vshrl.u32 %v5822_v40, 16 }
 0x107   : > { %747 = vrot.lane.b32.xlu0 %v712_v15, %s5032_s21  ;;  %v618_v15 = vrot.slane %v5851_v27, 1  ;;  %v979_v27 = vsel %vm934_vm3, %v977_v53, %v978_v56  ;;  %v5950_v53 = vld [vmem:[%s5270_s7 + $0xbc] ss:$0 sps:$4 sm:$0x77]  }
 0x108   : > { %v5799_v33 = vpop.permute.xlu1 %652 }
 0x109   : > { %v5807_v50 = vpop.permute.xlu0 %650  ;;  %v619_v48 = vsel %vm451_vm1, %v614_v14, %v618_v15  ;;  %v1110_v15 = vrot.slane %v878_v12, 2 }
 0x10a   : > { %926 = vrot.lane.b32.xlu1 %v874_v43, %s5034_s14  ;;  %v890_v43 = vrot.slane %v5841_v60, 2  ;;  %v1249_v58 = vsel %vm1241_vm7, %v4816_v2, %v5807_v50  ;;  %v976_v50 = vsel %vm934_vm3, %v974_v24, %v975_v57  ;;  %v723_v2 = vrot.slane %v5950_v53, 1 }
 0x10b   : > { %924 = vrot.lane.b32.xlu0 %v865_v23, %s5034_s14  ;;  %v880_v23 = vrot.slane %v878_v12, 1 }
 0x10c   : > { %v5818_v36 = vpop.permute.xlu1 %908  ;;  %v891_v38 = vor.u32 %v890_v43, %v889_v3  ;;  %v1112_v43 = vor.u32 %v1111_v26, %v1110_v15 }
 0x10d   : > { %v5827_v19 = vpop.permute.xlu0 %904  ;;  %v882_v55 = vor.u32 %v881_v46, %v880_v23 }
 0x10e   : > { %1007 = vrot.lane.b32.xlu1 %v973_v31, %s5035_s20  ;;  %v718_v31 = vsel %vm676_vm0, %v716_v6, %v717_v11  ;;  %v1109_v11 = vor.u32 %v1108_v9, %v1107_v18  ;;  %v5994_v18 = vshll.u32 %v5950_v53, 16 }
 0x10f   : > { %1005 = vrot.lane.b32.xlu0 %v970_v37, %s5035_s20  ;;  %v886_v37 = vor.u32 %v885_v42, %v884_v16  ;;  %v1203_v16 = vrot.slane %v5797_v1, 3  ;;  %v5918_v42 = vld [vmem:[%s5270_s7 + $0xb4] sm:$0xff]  }
 0x110   : > { %v5843_v62 = vpop.permute.xlu1 %910  ;;  %v1113_v56 = vsel %vm1015_vm4, %v1109_v11, %v1112_v43  ;;  %v4794_v43 = vld [vmem:[#allocation5 + $0x80] sm:$0xff]  }
 0x111   : > { %v5853_v45 = vpop.permute.xlu0 %906 }
 0x112   : > { %1152 = vrot.lane.b32.xlu1 %v1106_v39, %s5036_s6  ;;  %v877_v39 = vor.u32 %v876_v44, %v875_v21  ;;  %v1204_v21 = vrot.slane %v5813_v29, 3  ;;  %v1200_v44 = vrot.slane %v5805_v49, 3 }
 0x113   : > { %1150 = vrot.lane.b32.xlu0 %v1099_v30, %s5036_s6  ;;  %v1115_v30 = vrot.slane %v5816_v5, 3  ;;  %v892_v5 = vsel %vm757_vm2, %v886_v37, %v891_v38 }
 0x114   : > { %v5865_v13 = vpop.permute.xlu1 %989  ;;  %v883_v7 = vsel %vm757_vm2, %v877_v39, %v882_v55  ;;  %v1205_v26 = vsel %vm1160_vm5, %v1203_v16, %v1204_v21 }
 0x115   : > { %v5872_v35 = vpop.permute.xlu0 %985  ;;  %v1116_v12 = vor.u32 %v1115_v30, %v1114_v59  ;;  %v5984_v30 = vld [vmem:[%s5270_s7 + $0xc8] ss:$0 sps:$4 sm:$0x77]  }
 0x116   : > { %1233 = vrot.lane.b32.xlu1 %v1199_v28, %s5037_s9  ;;  %v1117_v28 = vrot.slane %v887_v32, 2 }
 0x117   : > { %1231 = vrot.lane.b32.xlu0 %v1196_v4, %s5037_s9  ;;  %v1118_v4 = vrot.slane %v5841_v60, 3  ;;  %v4817_v60 = vld [vmem:[%s5270_s7 + $0xc] sm:$0xff]  }
 0x118   : > { %v5885_v47 = vpop.permute.xlu1 %991  ;;  %v1245_v54 = vsel %vm1241_vm7, %v4817_v60, %v5783_v25  ;;  %v1282_v25 = vsel %vm1274_vm8, %v1249_v58, %v5747_v52  ;;  %v1201_v52 = vrot.slane %v5822_v40, 3  ;;  %v4793_v58 = vld [vmem:[#allocation5 + $0x78] sm:$0xff]  }
 0x119   : > { %v5888_v51 = vpop.permute.xlu0 %987  ;;  %v1119_v6 = vor.u32 %v1118_v4, %v1117_v28  ;;  %v1315_v1 = vsel %vm1307_vm9, %v1282_v25, %v5818_v36  ;;  %v1278_v46 = vsel %vm1274_vm8, %v1245_v54, %v5757_v20  ;;  %v722_v36 = vrot.slane %v5918_v42, 1 }
 0x11a   : > { %672 = vrot.lane.b32.xlu1 %v631_v63, %s5033_s23  ;;  %v4818_v63 = vld [vmem:[%s5270_s7 + $0x30] sm:$0xff]   ;;  %v899_v54 = vrot.slane %v5994_v18, 2  ;;  %v1202_v11 = vsel %vm1160_vm5, %v1200_v44, %v1201_v52  ;;  %v642_v25 = vrot.slane %v5994_v18, 1  ;;  %v980_v52 = vrot.slane %v5918_v42, 2 }
 0x11b   : > { %670 = vrot.lane.b32.xlu0 %v619_v48, %s5033_s23  ;;  %v1251_v23 = vsel %vm1241_vm7, %v4818_v63, %v5799_v33  ;;  %v4819_v48 = vld [vmem:[%s5270_s7 + $0x18] sm:$0xff]   ;;  %v1348_v33 = vsel %vm1340_vm10, %v1315_v1, %v5865_v13  ;;  %v724_v21 = vsel %vm676_vm0, %v722_v36, %v723_v2  ;;  %v1206_v2 = vrot.slane %v5918_v42, 3 }
 0x11c   : > { %v1135_v8 = vpop.permute.xlu1 %1134  ;;  %v1247_v29 = vsel %vm1241_vm7, %v4819_v48, %v5780_v0  ;;  %v1120_v0 = vsel %vm1015_vm4, %v1116_v12, %v1119_v6  ;;  %v1284_v13 = vsel %vm1274_vm8, %v1251_v23, %v5767_v61  ;;  %v5973_v61 = vshrl.u32 %v5918_v42, 16 }
 0x11d   : > { %v1131_v14 = vpop.permute.xlu0 %1130  ;;  %v1381_v40 = vsel %vm1373_vm11, %v1348_v33, %v1135_v8  ;;  %v1317_v24 = vsel %vm1307_vm9, %v1284_v13, %v5843_v62  ;;  %v1280_v55 = vsel %vm1274_vm8, %v1247_v29, %v5775_v10  ;;  %v896_v10 = vshrl.u32 %v5950_v53, 16  ;;  %v4795_v29 = vld [vmem:[#allocation5 + $0x88] ss:$0 sps:$4 sm:$0xff]  }
 0x11e   : > { %753 = vrot.lane.b32.xlu1 %v721_v22, %s5032_s21  ;;  %v1311_v22 = vsel %vm1307_vm9, %v1278_v46, %v5827_v19  ;;  %v5953_v19 = vshll.u32 %v5918_v42, 16  ;;  %v1313_v59 = vsel %vm1307_vm9, %v1280_v55, %v5853_v45  ;;  %v1350_v62 = vsel %vm1340_vm10, %v1317_v24, %v5885_v47 }
 0x11f   : > { %751 = vrot.lane.b32.xlu0 %v718_v31, %s5032_s21  ;;  %v5943_v31 = vld [vmem:[%s5270_s7 + $0xc0] sm:$0xff]   ;;  %v1344_v20 = vsel %vm1340_vm10, %v1311_v22, %v5872_v35  ;;  %v1346_v28 = vsel %vm1340_vm10, %v1313_v59, %v5888_v51  ;;  %v6021_v12 = vshll.u32 %v5984_v30, 16  ;;  %v1476_v46 = vshrl.u32 %v5984_v30, 16 }
 0x120   : > { %v1137_v32 = vpop.permute.xlu1 %1136  ;;  %v1377_v38 = vsel %vm1373_vm11, %v1344_v20, %v1131_v14  ;;  %v5987_v8 = vshll.u32 %v5943_v31, 16  ;;  %v637_v47 = vrot.slane %v5953_v19, 1  ;;  %v894_v60 = vrot.slane %v5953_v19, 2 }
 0x121   : > { %v1133_v3 = vpop.permute.xlu0 %1132  ;;  %v1383_v45 = vsel %vm1373_vm11, %v1350_v62, %v1137_v32  ;;  %v1464_v23 = vrot.slane %v6021_v12, 1  ;;  %v981_v48 = vrot.slane %v5950_v53, 2  ;;  %v1468_v22 = vrot.slane %v5943_v31, 1  ;;  %v6069_v62 = vld [vmem:[#allocation5 + $0x8c] sm:$0xff]  }
 0x122   : > { %930 = vrot.lane.b32.xlu1 %v892_v5, %s5034_s14  ;;  %v1379_v9 = vsel %vm1373_vm11, %v1346_v28, %v1133_v3  ;;  %v893_v5 = vrot.slane %v5973_v61, 1  ;;  %v1459_v32 = vrot.slane %v5987_v8, 1  ;;  %v638_v16 = vor.u32 %v637_v47, %v5973_v61 }
 0x123   : > { %928 = vrot.lane.b32.xlu0 %v883_v7, %s5034_s14  ;;  %v4797_v7 = vld [vmem:[#allocation5 + $0x8] sm:$0xff]   ;;  %v1469_v33 = vrot.slane %v5984_v30, 1  ;;  %v1121_v36 = vrot.slane %v5973_v61, 2  ;;  %v1122_v20 = vrot.slane %v5953_v19, 3  ;;  %v1124_v13 = vrot.slane %v896_v10, 2 }
 0x124   : > { %v1216_v37 = vpop.permute.xlu1 %1215  ;;  %v895_v49 = vor.u32 %v894_v60, %v893_v5  ;;  %v643_v1 = vsel %vm451_vm1, %v638_v16, %v642_v25  ;;  %v1474_v19 = vrot.slane %v5987_v8, 2  ;;  %v1478_v24 = vrot.slane %v1476_v46, 1  ;;  %v4820_v16 = vld [vmem:[%s5270_s7 + $0x48] sm:$0xff]  }
 0x125   : > { %v5959_v39 = vsel %vm1406_vm12, %v1381_v40, %v1216_v37  ;;  %v1212_v35 = vpop.permute.xlu0 %1211  ;;  %v4800_v40 = vld [vmem:[#allocation5 + $0x10] sm:$0xff]   ;;  %v1479_v55 = vrot.slane %v6021_v12, 2  ;;  %v2618_v59 = vsel %vm1576_vm6, %v4795_v29, 0  ;;  %v1123_v28 = vor.u32 %v1122_v20, %v1121_v36 }
 0x126   : > { %1011 = vrot.lane.b32.xlu1 %v979_v27, %s5035_s20  ;;  %v5968_v57 = vsel %vm1406_vm12, %v1377_v38, %v1212_v35  ;;  %4294 = vmatprep.mubr.msk.bf16.mxu0 %vm1543_vm13, %v5959_v39  ;;  %v898_v27 = vrot.slane %v896_v10, 1  ;;  %v1125_v38 = vrot.slane %v5994_v18, 3  ;;  %v982_v10 = vsel %vm934_vm3, %v980_v52, %v981_v48 }
 0x127   : > { %1009 = vrot.lane.b32.xlu0 %v976_v50, %s5035_s20  ;;  %4174 = vmatprep.mubr.msk.bf16.mxu1 %vm1543_vm13, %v5968_v57  ;;  %v6017_v50 = vshrl.u32 %v5943_v31, 16  ;;  %v1470_v18 = vsel %vm676_vm0, %v1468_v22, %v1469_v33  ;;  %v1484_v5 = vrot.slane %v5943_v31, 2  ;;  %v1485_v60 = vrot.slane %v5984_v30, 2 }
 0x128   : > { %v1218_v4 = vpop.permute.xlu1 %1217  ;;  %v900_v44 = vor.u32 %v899_v54, %v898_v27  ;;  %v1498_v42 = vrot.slane %v5943_v31, 3  ;;  %v4821_v31 = vld [vmem:[%s5270_s7 + $0x3c] sm:$0xff]  }
 0x129   : > { %v5998_v14 = vsel %vm1406_vm12, %v1383_v45, %v1218_v4  ;;  %v1214_v15 = vpop.permute.xlu0 %1213  ;;  %v1460_v63 = vor.u32 %v1459_v32, %v6017_v50  ;;  %v1126_v45 = vor.u32 %v1125_v38, %v1124_v13  ;;  %v6075_v4 = vld [vmem:[%s5270_s7] sm:$0xff]   ;;  %v1489_v54 = vrot.slane %v6017_v50, 2  ;;  %v6091_v32 = vld [vmem:[%s5270_s7 + $0x8] ss:$0 sps:$4 sm:$0x77]  }
 0x12a   : > { %v6003_v51 = vsel %vm1406_vm12, %v1379_v9, %v1214_v15  ;;  %1156 = vrot.lane.b32.xlu1 %v1120_v0, %s5036_s6  ;;  %4295 = vmatmul.mubr.msk.bf16.vlgmr.msra.gmra.mrb[0].mxu0 %vm1543_vm13, %v5998_v14  ;;  %v901_v37 = vsel %vm757_vm2, %v895_v49, %v900_v44  ;;  %v1480_v15 = vor.u32 %v1479_v55, %v1478_v24  ;;  %v460_v48 = vshll.u32 %v6091_v32, 16 }
 0x12b   : > { %1154 = vrot.lane.b32.xlu0 %v1113_v56, %s5036_s6  ;;  %4175 = vmatmul.mubr.msk.bf16.vlgmr.msra.gmra.mrb[0].mxu1 %vm1543_vm13, %v6003_v51  ;;  %v1465_v0 = vsel %vm451_vm1, %v1460_v63, %v1464_v23  ;;  %v1473_v56 = vrot.slane %v6017_v50, 1  ;;  %v1127_v27 = vsel %vm1015_vm4, %v1123_v28, %v1126_v45  ;;  %v761_v36 = vshrl.u32 %v6091_v32, 16 }
 0x12c   : > { %4178 = vmatprep.mubr.msk.bf16.mxu1 %vm1543_vm13, %v5959_v39  ;;  %v6025_v6 = vpop.permute.xlu1 %656  ;;  %4327 = vmatpush3.bf16.msra.mxu0 %v5693_v34  ;;  %v677_v38 = vrot.slane %v6075_v4, 1  ;;  %v462_v24 = vrot.slane %v460_v48, 1  ;;  %v764_v45 = vrot.slane %v460_v48, 2 }
 0x12d   : > { %v6033_v3 = vpop.permute.xlu0 %654  ;;  %4328 = vmatprep.subr.bf16.mxu0 %v4793_v58  ;;  %4207 = vmatpush3.bf16.msra.mxu1 %v5858_v17  ;;  %v1475_v9 = vor.u32 %v1474_v19, %v1473_v56  ;;  %v1255_v25 = vsel %vm1241_vm7, %v4820_v16, %v6025_v6  ;;  %v1486_v6 = vsel %vm934_vm3, %v1484_v5, %v1485_v60  ;;  %v4802_v56 = vld [vmem:[#allocation5 + $0x18] ss:$0 sps:$4 sm:$0xff]   ;;  %v763_v28 = vrot.slane %v761_v36, 1  ;;  %v6162_v16 = vld [vmem:[%s5270_s7 + $0xd4] ss:$0 sps:$4 sm:$0x77]  }
 0x12e   : > { %1237 = vrot.lane.b32.xlu1 %v1205_v26, %s5037_s9  ;;  %4208 = vmatprep.subr.bf16.mxu1 %v4797_v7  ;;  %v1253_v49 = vsel %vm1241_vm7, %v4821_v31, %v6033_v3 }
 0x12f   : > { %1235 = vrot.lane.b32.xlu0 %v1202_v11, %s5037_s9  ;;  %v6094_v11 = vshll.u32 %v6075_v4, 16 }
 0x130   : > { %v6041_v34 = vpop.permute.xlu1 %737  ;;  %4329 = vmatpush3.bf16.msra.mxu0 %v4793_v58  ;;  %v1207_v58 = vrot.slane %v5950_v53, 3  ;;  %v1499_v53 = vrot.slane %v5984_v30, 3 }
 0x131   : > { %v6045_v17 = vpop.permute.xlu0 %735  ;;  %4330 = vmatprep.subr.bf16.mxu0 %v4794_v43  ;;  %4209 = vmatpush3.bf16.msra.mxu1 %v4797_v7  ;;  %v1490_v7 = vrot.slane %v5987_v8, 3  ;;  %v1481_v8 = vsel %vm757_vm2, %v1475_v9, %v1480_v15  ;;  %v1288_v44 = vsel %vm1274_vm8, %v1255_v25, %v6041_v34  ;;  %v457_v34 = vrot.slane %v6094_v11, 1 }
 0x132   : > { %755 = vrot.lane.b32.xlu1 %v724_v21, %s5032_s21  ;;  %4210 = vmatprep.subr.bf16.mxu1 %v4800_v40  ;;  %v1493_v21 = vrot.slane %v6021_v12, 3  ;;  %v1208_v23 = vsel %vm1160_vm5, %v1206_v2, %v1207_v58  ;;  %v1500_v13 = vsel %vm1160_vm5, %v1498_v42, %v1499_v53  ;;  %v936_v2 = vrot.slane %v6091_v32, 2 }
 0x133   : > { %674 = vrot.lane.b32.xlu0 %v643_v1, %s5033_s23  ;;  %4179 = vmatmul.mubr.msk.bf16.gmra.mrb[4].mxu1 %vm1543_vm13, %v5998_v14  ;;  %v1286_v1 = vsel %vm1274_vm8, %v1253_v49, %v6045_v17  ;;  %v1491_v12 = vor.u32 %v1490_v7, %v1489_v54  ;;  %v1017_v54 = vrot.slane %v6094_v11, 3  ;;  %v1019_v42 = vrot.slane %v761_v36, 2 }
 0x134   : > { %v915_v35 = vpop.permute.xlu1 %914  ;;  %4331 = vmatpush3.bf16.msra.mxu0 %v4794_v43  ;;  %v1492_v43 = vrot.slane %v1476_v46, 2  ;;  %v453_v46 = vshrl.u32 %v6075_v4, 16  ;;  %v1020_v53 = vrot.slane %v460_v48, 3  ;;  %v1951_v48 = vrot.slane %v6162_v16, 1 }
 0x135   : > { %v913_v61 = vpop.permute.xlu0 %912  ;;  %4651 = vmatprep.subr.msk.bf16.mxu0 %vm1576_vm6, %v4795_v29  ;;  %4211 = vmatpush3.bf16.msra.mxu1 %v4800_v40  ;;  %v1321_v30 = vsel %vm1307_vm9, %v1288_v44, %v915_v35  ;;  %v678_v35 = vrot.slane %v6091_v32, 1 }
 0x136   : > { %932 = vrot.lane.b32.xlu1 %v901_v37, %s5034_s14  ;;  %v1319_v3 = vsel %vm1307_vm9, %v1286_v1, %v913_v61  ;;  %v1494_v33 = vor.u32 %v1493_v21, %v1492_v43  ;;  %v458_v19 = vor.u32 %v457_v34, %v453_v46  ;;  %v758_v55 = vrot.slane %v453_v46, 1  ;;  %4647 = vmatprep.subr.msk.bf16.mxu1 %vm1576_vm6, %v4802_v56 }
 0x137   : > { %1466 = vrot.lane.b32.xlu0 %v1465_v0, %s5033_s23  ;;  %v759_v61 = vrot.slane %v6094_v11, 2  ;;  %v679_v15 = vsel %vm676_vm0, %v677_v38, %v678_v35  ;;  %v1016_v60 = vrot.slane %v453_v46, 2  ;;  %v1162_v43 = vrot.slane %v6091_v32, 3  ;;  %v6183_v35 = vld [vmem:[%s5270_s7 + $0xd8] sm:$0xff]  }
 0x138   : > { %v996_v47 = vpop.permute.xlu1 %995  ;;  %4333 = vmatpush3.bf16.msra.mxu0 %v2618_v59  ;;  %v463_v58 = vsel %vm451_vm1, %v458_v19, %v462_v24  ;;  %v1958_v21 = vshrl.u32 %v6162_v16, 16  ;;  %v1944_v1 = vshll.u32 %v6162_v16, 16 }
 0x139   : > { %v994_v26 = vpop.permute.xlu0 %993  ;;  %4366 = vmatprep.subr.bf16.mxu0 %v6069_v62  ;;  %v1354_v52 = vsel %vm1340_vm10, %v1321_v30, %v996_v47  ;;  %v6146_v47 = vld [vmem:[%s5270_s7 + $0xcc] sm:$0xff]   ;;  %v760_v5 = vor.u32 %v759_v61, %v758_v55  ;;  %v1018_v31 = vor.u32 %v1017_v54, %v1016_v60  ;;  %v4823_v54 = vld [vmem:[%s5270_s7 + $0x54] sm:$0xff]  }
 0x13a   : > { %1013 = vrot.lane.b32.xlu1 %v982_v10, %s5035_s20  ;;  %v1352_v29 = vsel %vm1340_vm10, %v1319_v3, %v994_v26  ;;  %v1495_v10 = vsel %vm1015_vm4, %v1491_v12, %v1494_v33  ;;  %v935_v26 = vrot.slane %v6075_v4, 2  ;;  %v1939_v25 = vshll.u32 %v6146_v47, 16  ;;  %v6201_v60 = vld [vmem:[#allocation5 + $0x38] sm:$0xff]  }
 0x13b   : > { %1471 = vrot.lane.b32.xlu0 %v1470_v18, %s5032_s21  ;;  %v1765_v18 = vsel %vm1576_vm6, %v4802_v56, 0  ;;  %v1937_v49 = vshrl.u32 %v6146_v47, 16  ;;  %v1960_v3 = vrot.slane %v1958_v21, 1  ;;  %v1950_v34 = vrot.slane %v6146_v47, 1 }
 0x13c   : > { %v1141_v50 = vpop.permute.xlu1 %1140  ;;  %4213 = vmatpush3.bf16.msra.mxu1 %v1765_v18  ;;  %v937_v11 = vsel %vm934_vm3, %v935_v26, %v936_v2  ;;  %v1956_v46 = vrot.slane %v1939_v25, 2  ;;  %v1972_v38 = vrot.slane %v1939_v25, 3  ;;  %v1974_v61 = vrot.slane %v1958_v21, 2 }
 0x13d   : > { %v1139_v63 = vpop.permute.xlu0 %1138  ;;  %v1387_v17 = vsel %vm1373_vm11, %v1354_v52, %v1141_v50  ;;  %v1955_v12 = vrot.slane %v1937_v49, 1  ;;  %v1961_v52 = vrot.slane %v1944_v1, 2  ;;  %v1952_v24 = vsel %vm676_vm0, %v1950_v34, %v1951_v48  ;;  %4246 = vmatprep.subr.bf16.mxu1 %v6201_v60 }
 0x13e   : > { %1158 = vrot.lane.b32.xlu1 %v1127_v27, %s5036_s6  ;;  %v1385_v20 = vsel %vm1373_vm11, %v1352_v29, %v1139_v63  ;;  %v765_v27 = vor.u32 %v764_v45, %v763_v28  ;;  %v1966_v29 = vrot.slane %v6146_v47, 2  ;;  %v6190_v28 = vld [vmem:[%s5270_s7 + $0xe0] ss:$0 sps:$4 sm:$0x77]   ;;  %v1980_v2 = vrot.slane %v6146_v47, 3 }
 0x13f   : > { %1482 = vrot.lane.b32.xlu0 %v1481_v8, %s5034_s14  ;;  %v1161_v8 = vrot.slane %v6075_v4, 3  ;;  %v1957_v56 = vor.u32 %v1956_v46, %v1955_v12  ;;  %v1962_v19 = vor.u32 %v1961_v52, %v1960_v3  ;;  %v4822_v45 = vld [vmem:[%s5270_s7 + $0x60] sm:$0xff]   ;;  %v2253_v21 = vshrl.u32 %v6190_v28, 16 }
 0x140   : > { %v1222_v22 = vpop.permute.xlu1 %1221  ;;  %v766_v63 = vsel %vm757_vm2, %v760_v5, %v765_v27  ;;  %v6199_v5 = vld [vmem:[%s5270_s7 + $0xe4] sm:$0xff]  }
 0x141   : > { %v6125_v40 = vsel %vm1406_vm12, %v1387_v17, %v1222_v22  ;;  %v1220_v37 = vpop.permute.xlu0 %1219  ;;  %v1163_v32 = vsel %vm1160_vm5, %v1161_v8, %v1162_v43  ;;  %v1967_v17 = vrot.slane %v6162_v16, 2  ;;  %v1963_v43 = vsel %vm757_vm2, %v1957_v56, %v1962_v19 }
 0x142   : > { %v6128_v0 = vsel %vm1406_vm12, %v1385_v20, %v1220_v37  ;;  %1239 = vrot.lane.b32.xlu1 %v1208_v23, %s5037_s9  ;;  %v1021_v23 = vor.u32 %v1020_v53, %v1019_v42  ;;  %v1946_v20 = vrot.slane %v1944_v1, 1  ;;  %v2255_v34 = vrot.slane %v2253_v21, 1 }
 0x143   : > { %1487 = vrot.lane.b32.xlu0 %v1486_v6, %s5035_s20  ;;  %4182 = vmatprep.mubr.msk.bf16.mxu1 %vm1543_vm13, %v6128_v0  ;;  %v1941_v6 = vrot.slane %v1939_v25, 1  ;;  %v1968_v55 = vsel %vm934_vm3, %v1966_v29, %v1967_v17  ;;  %v2245_v17 = vrot.slane %v6183_v35, 1 }
 0x144   : > { %4298 = vmatprep.mubr.msk.bf16.mxu0 %vm1543_vm13, %v6128_v0  ;;  %4183 = vmatmul.mubr.msk.bf16.gmra.mrb[8].mxu1 %vm1543_vm13, %v6125_v40  ;;  %v6142_v59 = vpop.permute.xlu1 %660  ;;  %v1022_v33 = vsel %vm1015_vm4, %v1018_v31, %v1021_v23  ;;  %v6220_v31 = vshrl.u32 %v6183_v35, 16  ;;  %v6226_v23 = vld [vmem:[%s5270_s7 + $0xec] ss:$0 sps:$4 sm:$0x77]  }
 0x145   : > { %4299 = vmatmul.mubr.msk.bf16.gmra.mrb[4].mxu0 %vm1543_vm13, %v6125_v40  ;;  %v6151_v9 = vpop.permute.xlu0 %658  ;;  %v1942_v36 = vor.u32 %v1941_v6, %v1937_v49  ;;  %v1259_v18 = vsel %vm1241_vm7, %v4822_v45, %v6142_v59  ;;  %v6208_v59 = vshll.u32 %v6183_v35, 16  ;;  %v6229_v6 = vshll.u32 %v6199_v5, 16 }
 0x146   : > { %1501 = vrot.lane.b32.xlu1 %v1500_v13, %s5037_s9  ;;  %v1971_v13 = vrot.slane %v1937_v49, 2  ;;  %v1257_v27 = vsel %vm1241_vm7, %v4823_v54, %v6151_v9  ;;  %v2250_v46 = vrot.slane %v6220_v31, 1  ;;  %v2261_v54 = vrot.slane %v6183_v35, 2 }
 0x147   : > { %1496 = vrot.lane.b32.xlu0 %v1495_v10, %s5036_s6  ;;  %v1975_v10 = vrot.slane %v1944_v1, 3  ;;  %v1947_v26 = vsel %vm451_vm1, %v1942_v36, %v1946_v20  ;;  %v2236_v12 = vrot.slane %v6208_v59, 1  ;;  %v2251_v52 = vrot.slane %v6208_v59, 2 }
 0x148   : > { %v742_v7 = vpop.permute.xlu1 %741  ;;  %v1973_v25 = vor.u32 %v1972_v38, %v1971_v13  ;;  %v6253_v36 = vshrl.u32 %v6199_v5, 16  ;;  %v2531_v20 = vrot.slane %v6229_v6, 1 }
 0x149   : > { %v740_v50 = vpop.permute.xlu0 %739  ;;  %v1292_v42 = vsel %vm1274_vm8, %v1259_v18, %v742_v7  ;;  %v2237_v56 = vor.u32 %v2236_v12, %v6220_v31  ;;  %v2276_v12 = vrot.slane %v6190_v28, 3 }
 0x14a   : > { %725 = vrot.lane.b32.xlu1 %v679_v15, %s5032_s21  ;;  %v1290_v8 = vsel %vm1274_vm8, %v1257_v27, %v740_v50  ;;  %v2532_v45 = vor.u32 %v2531_v20, %v6253_v36  ;;  %v2262_v27 = vrot.slane %v6190_v28, 2  ;;  %v2561_v20 = vrot.slane %v6253_v36, 2 }
 0x14b   : > { %644 = vrot.lane.b32.xlu0 %v463_v58, %s5033_s23  ;;  %v1981_v58 = vrot.slane %v6162_v16, 3 }
 0x14c   : > { %v919_v44 = vpop.permute.xlu1 %918 }
 0x14d   : > { %v917_v30 = vpop.permute.xlu0 %916  ;;  %v1325_v16 = vsel %vm1307_vm9, %v1292_v42, %v919_v44  ;;  %v1982_v29 = vsel %vm1160_vm5, %v1980_v2, %v1981_v58  ;;  %v2548_v2 = vshrl.u32 %v6226_v23, 16  ;;  %v2266_v42 = vrot.slane %v6220_v31, 2 }
 0x14e   : > { %983 = vrot.lane.b32.xlu1 %v937_v11, %s5035_s20  ;;  %v1323_v9 = vsel %vm1307_vm9, %v1290_v8, %v917_v30  ;;  %v1976_v11 = vor.u32 %v1975_v10, %v1974_v61 }
 0x14f   : > { %902 = vrot.lane.b32.xlu0 %v766_v63, %s5034_s14  ;;  %v2239_v63 = vshll.u32 %v6190_v28, 16 }
 0x150   : > { %v1000_v22 = vpop.permute.xlu1 %999  ;;  %v1977_v38 = vsel %vm1015_vm4, %v1973_v25, %v1976_v11  ;;  %v2269_v25 = vrot.slane %v2253_v21, 2  ;;  %v2263_v21 = vsel %vm934_vm3, %v2261_v54, %v2262_v27 }
 0x151   : > { %v998_v37 = vpop.permute.xlu0 %997  ;;  %v1358_v7 = vsel %vm1340_vm10, %v1325_v16, %v1000_v22  ;;  %v2256_v48 = vrot.slane %v2239_v63, 2  ;;  %v2246_v22 = vrot.slane %v6190_v28, 1  ;;  %v2241_v19 = vrot.slane %v2239_v63, 1 }
 0x152   : > { %1209 = vrot.lane.b32.xlu1 %v1163_v32, %s5037_s9  ;;  %v1356_v50 = vsel %vm1340_vm10, %v1323_v9, %v998_v37  ;;  %v6257_v37 = vshll.u32 %v6226_v23, 16  ;;  %v2270_v8 = vrot.slane %v2239_v63, 3  ;;  %v2540_v9 = vrot.slane %v6199_v5, 1 }
 0x153   : > { %1128 = vrot.lane.b32.xlu0 %v1022_v33, %s5036_s6  ;;  %v2247_v61 = vsel %vm676_vm0, %v2245_v17, %v2246_v22  ;;  %v6294_v22 = vld [vmem:[%s5270_s7 + $0xf0] sm:$0xff]  }
 0x154   : > { %v1145_v15 = vpop.permute.xlu1 %1144  ;;  %v2536_v18 = vrot.slane %v6257_v37, 1  ;;  %v2271_v63 = vor.u32 %v2270_v8, %v2269_v25  ;;  %v2571_v8 = vrot.slane %v6226_v23, 3 }
 0x155   : > { %v1143_v53 = vpop.permute.xlu0 %1142  ;;  %v1391_v49 = vsel %vm1373_vm11, %v1358_v7, %v1145_v15  ;;  %v2541_v7 = vrot.slane %v6226_v23, 1 }
 0x156   : > { %1953 = vrot.lane.b32.xlu1 %v1952_v24, %s5032_s21  ;;  %v1389_v1 = vsel %vm1373_vm11, %v1356_v50, %v1143_v53  ;;  %v2252_v24 = vor.u32 %v2251_v52, %v2250_v46  ;;  %v2267_v53 = vrot.slane %v6208_v59, 3  ;;  %v2545_v50 = vrot.slane %v6253_v36, 1  ;;  %v4825_v36 = vld [vmem:[%s5270_s7 + $0x6c] sm:$0xff]  }
 0x157   : > { %1948 = vrot.lane.b32.xlu0 %v1947_v26, %s5033_s23  ;;  %v2242_v26 = vsel %vm451_vm1, %v2237_v56, %v2241_v19  ;;  %v2551_v59 = vrot.slane %v6257_v37, 2  ;;  %v2556_v46 = vrot.slane %v6199_v5, 2  ;;  %v2557_v52 = vrot.slane %v6226_v23, 2 }
 0x158   : > { %v1226_v44 = vpop.permute.xlu1 %1225  ;;  %v2268_v31 = vor.u32 %v2267_v53, %v2266_v42  ;;  %v2564_v56 = vrot.slane %v2548_v2, 2  ;;  %v2565_v19 = vrot.slane %v6257_v37, 3  ;;  %v2570_v53 = vrot.slane %v6199_v5, 3 }
 0x159   : > { %v6233_v30 = vsel %vm1406_vm12, %v1391_v49, %v1226_v44  ;;  %v1224_v32 = vpop.permute.xlu0 %1223  ;;  %v2546_v49 = vrot.slane %v6229_v6, 2  ;;  %v2550_v44 = vrot.slane %v2548_v2, 1 }
 0x15a   : > { %v6238_v3 = vsel %vm1406_vm12, %v1389_v1, %v1224_v32  ;;  %1969 = vrot.lane.b32.xlu1 %v1968_v55, %s5035_s20  ;;  %v2257_v55 = vor.u32 %v2256_v48, %v2255_v34  ;;  %v2275_v32 = vrot.slane %v6183_v35, 3  ;;  %v2542_v48 = vsel %vm676_vm0, %v2540_v9, %v2541_v7 }
 0x15b   : > { %4186 = vmatprep.mubr.msk.bf16.mxu1 %vm1543_vm13, %v6238_v3  ;;  %4302 = vmatprep.mubr.msk.bf16.mxu0 %vm1543_vm13, %v6238_v3  ;;  %v2552_v17 = vor.u32 %v2551_v59, %v2550_v44  ;;  %v2272_v28 = vsel %vm1015_vm4, %v2268_v31, %v2271_v63  ;;  %v2572_v31 = vsel %vm1160_vm5, %v2570_v53, %v2571_v8  ;;  %v2835_v63 = vrot.slane %v6294_v22, 1 }
 0x15c   : > { %1964 = vrot.lane.b32.xlu0 %v1963_v43, %s5034_s14  ;;  %4187 = vmatmul.mubr.msk.bf16.gmra.mrb[12].mxu1 %vm1543_vm13, %v6233_v30  ;;  %v665_v33 = vpop.permute.xlu1 %664  ;;  %v2258_v58 = vsel %vm757_vm2, %v2252_v24, %v2257_v55  ;;  %v2537_v43 = vsel %vm451_vm1, %v2532_v45, %v2536_v18  ;;  %v4824_v24 = vld [vmem:[%s5270_s7 + $0x78] sm:$0xff]   ;;  %v2277_v45 = vsel %vm1160_vm5, %v2275_v32, %v2276_v12 }
 0x15d   : > { %4303 = vmatmul.mubr.msk.bf16.gmra.mrb[8].mxu0 %vm1543_vm13, %v6233_v30  ;;  %v6261_v13 = vpop.permute.xlu0 %662  ;;  %v1263_v55 = vsel %vm1241_vm7, %v4824_v24, %v665_v33  ;;  %v2558_v18 = vsel %vm934_vm3, %v2556_v46, %v2557_v52  ;;  %v6315_v33 = vshll.u32 %v6294_v22, 16 }
 0x15e   : > { %1983 = vrot.lane.b32.xlu1 %v1982_v29, %s5037_s9  ;;  %v2547_v29 = vor.u32 %v2546_v49, %v2545_v50 }
 0x15f   : > { %v2826_v44 = vrot.slane %v6315_v33, 1  ;;  %v2841_v52 = vrot.slane %v6315_v33, 2 }
 0x160   : > { %1978 = vrot.lane.b32.xlu0 %v1977_v38, %s5036_s6  ;;  %v746_v10 = vpop.permute.xlu1 %745  ;;  %v2562_v38 = vrot.slane %v6229_v6, 3  ;;  %v1261_v6 = vsel %vm1241_vm7, %v4825_v36, %v6261_v13  ;;  %v2553_v37 = vsel %vm757_vm2, %v2547_v29, %v2552_v17 }
 0x161   : > { %v744_v15 = vpop.permute.xlu0 %743  ;;  %v1296_v2 = vsel %vm1274_vm8, %v1263_v55, %v746_v10  ;;  %v2566_v10 = vor.u32 %v2565_v19, %v2564_v56  ;;  %v2851_v19 = vrot.slane %v6294_v22, 2 }
 0x162   : > { %2248 = vrot.lane.b32.xlu1 %v2247_v61, %s5032_s21  ;;  %v1294_v54 = vsel %vm1274_vm8, %v1261_v6, %v744_v15  ;;  %v2563_v42 = vor.u32 %v2562_v38, %v2561_v20  ;;  %v6364_v38 = vld [vmem:[%s5270_s7 + $0x104] ss:$0 sps:$4 sm:$0x77]  }
 0x163   : > { %v3138_v8 = vshrl.u32 %v6364_v38, 16 }
 0x164   : > { %2243 = vrot.lane.b32.xlu0 %v2242_v26, %s5033_s23  ;;  %v923_v16 = vpop.permute.xlu1 %922  ;;  %v6307_v26 = vld [vmem:[%s5270_s7 + $0xf8] ss:$0 sps:$4 sm:$0x77]   ;;  %v2567_v12 = vsel %vm1015_vm4, %v2563_v42, %v2566_v10  ;;  %v4803_v10 = vld [vmem:[#allocation5 + $0x94] sm:$0xff]  }
 0x165   : > { %v921_v11 = vpop.permute.xlu0 %920  ;;  %v1329_v27 = vsel %vm1307_vm9, %v1296_v2, %v923_v16  ;;  %v2822_v16 = vshrl.u32 %v6294_v22, 16  ;;  %v2829_v7 = vshll.u32 %v6307_v26, 16  ;;  %v2843_v23 = vshrl.u32 %v6307_v26, 16 }
 0x166   : > { %2259 = vrot.lane.b32.xlu1 %v2258_v58, %s5034_s14  ;;  %v1327_v25 = vsel %vm1307_vm9, %v1294_v54, %v921_v11  ;;  %v2852_v24 = vrot.slane %v6307_v26, 2  ;;  %v2865_v54 = vrot.slane %v6294_v22, 3 }
 0x167   : > { %v2840_v46 = vrot.slane %v2822_v16, 1  ;;  %v2831_v29 = vrot.slane %v2829_v7, 1  ;;  %v2845_v17 = vrot.slane %v2843_v23, 1  ;;  %v2846_v20 = vrot.slane %v2829_v7, 2 }
 0x168   : > { %2538 = vrot.lane.b32.xlu0 %v2537_v43, %s5033_s23  ;;  %v1004_v1 = vpop.permute.xlu1 %1003  ;;  %v2859_v36 = vrot.slane %v2843_v23, 2 }
 0x169   : > { %v1002_v34 = vpop.permute.xlu0 %1001  ;;  %v1362_v13 = vsel %vm1340_vm10, %v1329_v27, %v1004_v1  ;;  %v2836_v1 = vrot.slane %v6307_v26, 1  ;;  %v2866_v27 = vrot.slane %v6307_v26, 3 }
 0x16a   : > { %2264 = vrot.lane.b32.xlu1 %v2263_v21, %s5035_s20  ;;  %v1360_v43 = vsel %vm1340_vm10, %v1327_v25, %v1002_v34  ;;  %v6340_v21 = vld [vmem:[%s5270_s7 + $0xfc] sm:$0xff]   ;;  %v6383_v25 = vshll.u32 %v6364_v38, 16 }
 0x16b   : > { %v2837_v56 = vsel %vm676_vm0, %v2835_v63, %v2836_v1  ;;  %v6379_v42 = vshrl.u32 %v6340_v21, 16  ;;  %v4805_v1 = vld [vmem:[#allocation5 + $0x9c] sm:$0xff]  }
 0x16c   : > { %2543 = vrot.lane.b32.xlu0 %v2542_v48, %s5032_s21  ;;  %v1149_v61 = vpop.permute.xlu1 %1148  ;;  %v2827_v48 = vor.u32 %v2826_v44, %v2822_v16  ;;  %v3131_v44 = vrot.slane %v6364_v38, 1 }
 0x16d   : > { %v1147_v58 = vpop.permute.xlu0 %1146  ;;  %v1395_v9 = vsel %vm1373_vm11, %v1362_v13, %v1149_v61  ;;  %v2842_v61 = vor.u32 %v2841_v52, %v2840_v46  ;;  %v3135_v23 = vrot.slane %v6379_v42, 1  ;;  %v3141_v46 = vrot.slane %v6383_v25, 2 }
 0x16e   : > { %2273 = vrot.lane.b32.xlu1 %v2272_v28, %s5036_s6  ;;  %v1393_v50 = vsel %vm1373_vm11, %v1360_v43, %v1147_v58  ;;  %v6367_v28 = vshll.u32 %v6340_v21, 16  ;;  %v2832_v2 = vsel %vm451_vm1, %v2827_v48, %v2831_v29  ;;  %v2847_v58 = vor.u32 %v2846_v20, %v2845_v17 }
 0x16f   : > { %v3146_v48 = vrot.slane %v6340_v21, 2  ;;  %v3147_v29 = vrot.slane %v6364_v38, 2 }
 0x170   : > { %2554 = vrot.lane.b32.xlu0 %v2553_v37, %s5034_s14  ;;  %v1230_v15 = vpop.permute.xlu1 %1229  ;;  %v2860_v37 = vrot.slane %v2829_v7, 3  ;;  %v3121_v53 = vrot.slane %v6367_v28, 1  ;;  %v2848_v43 = vsel %vm757_vm2, %v2842_v61, %v2847_v58  ;;  %v4827_v58 = vld [vmem:[%s5270_s7 + $0x84] sm:$0xff]  }
 0x171   : > { %v6331_v11 = vsel %vm1406_vm12, %v1395_v9, %v1230_v15  ;;  %v1228_v49 = vpop.permute.xlu0 %1227 }
 0x172   : > { %v6336_v59 = vsel %vm1406_vm12, %v1393_v50, %v1228_v49  ;;  %2278 = vrot.lane.b32.xlu1 %v2277_v45, %s5037_s9  ;;  %v2856_v45 = vrot.slane %v2822_v16, 2  ;;  %v2861_v15 = vor.u32 %v2860_v37, %v2859_v36  ;;  %v2867_v16 = vsel %vm1160_vm5, %v2865_v54, %v2866_v27 }
 0x173   : > { %4190 = vmatprep.mubr.msk.bf16.mxu1 %vm1543_vm13, %v6336_v59  ;;  %4306 = vmatprep.mubr.msk.bf16.mxu0 %vm1543_vm13, %v6336_v59  ;;  %v3122_v7 = vor.u32 %v3121_v53, %v6379_v42  ;;  %v3126_v50 = vrot.slane %v6383_v25, 1  ;;  %v3130_v49 = vrot.slane %v6340_v21, 1  ;;  %v3151_v36 = vrot.slane %v6379_v42, 2 }
 0x174   : > { %2559 = vrot.lane.b32.xlu0 %v2558_v18, %s5035_s20  ;;  %4191 = vmatmul.mubr.msk.bf16.gmra.mrb[16].mxu1 %vm1543_vm13, %v6331_v11  ;;  %v6352_v32 = vpop.permute.xlu1 %668  ;;  %v2857_v18 = vrot.slane %v6315_v33, 3  ;;  %v2853_v33 = vsel %vm934_vm3, %v2851_v19, %v2852_v24  ;;  %v4826_v19 = vld [vmem:[%s5270_s7 + $0x90] sm:$0xff]   ;;  %v3154_v27 = vrot.slane %v3138_v8, 2  ;;  %v3155_v53 = vrot.slane %v6383_v25, 3 }
 0x175   : > { %4307 = vmatmul.mubr.msk.bf16.gmra.mrb[12].mxu0 %vm1543_vm13, %v6331_v11  ;;  %v6358_v34 = vpop.permute.xlu0 %666  ;;  %v3127_v17 = vsel %vm451_vm1, %v3122_v7, %v3126_v50  ;;  %v3132_v20 = vsel %vm676_vm0, %v3130_v49, %v3131_v44  ;;  %v1267_v24 = vsel %vm1241_vm7, %v4826_v19, %v6352_v32  ;;  %v3160_v42 = vrot.slane %v6340_v21, 3 }
 0x176   : > { %4334 = vmatprep.mubr.msk.bf16.mxu0 %vm1543_vm13, %v5998_v14  ;;  %2573 = vrot.lane.b32.xlu1 %v2572_v31, %s5037_s9  ;;  %v2858_v9 = vor.u32 %v2857_v18, %v2856_v45  ;;  %v3136_v31 = vrot.slane %v6367_v28, 2  ;;  %v4807_v45 = vld [vmem:[#allocation5 + $0xa4] ss:$0 sps:$4 sm:$0xff]   ;;  %v1265_v37 = vsel %vm1241_vm7, %v4827_v58, %v6358_v34  ;;  %v3148_v34 = vsel %vm934_vm3, %v3146_v48, %v3147_v29 }
 0x177   : > { %v3161_v25 = vrot.slane %v6364_v38, 3  ;;  %v6443_v38 = vld [vmem:[#allocation5 + $0xa8] sm:$0xff]   ;;  %v3156_v50 = vor.u32 %v3155_v53, %v3154_v27  ;;  %v4828_v29 = vld [vmem:[%s5270_s7 + $0xa8] sm:$0xff]  }
 0x178   : > { %2568 = vrot.lane.b32.xlu0 %v2567_v12, %s5036_s6  ;;  %v750_v55 = vpop.permute.xlu1 %749  ;;  %v3140_v12 = vrot.slane %v3138_v8, 1 }
 0x179   : > { %v748_v6 = vpop.permute.xlu0 %747  ;;  %v1300_v54 = vsel %vm1274_vm8, %v1267_v24, %v750_v55  ;;  %v3162_v44 = vsel %vm1160_vm5, %v3160_v42, %v3161_v25 }
 0x17a   : > { %2838 = vrot.lane.b32.xlu1 %v2837_v56, %s5032_s21  ;;  %v3137_v56 = vor.u32 %v3136_v31, %v3135_v23  ;;  %v3142_v18 = vor.u32 %v3141_v46, %v3140_v12 }
 0x17c   : > { %v927_v13 = vpop.permute.xlu1 %926  ;;  %2833 = vrot.lane.b32.xlu0 %v2832_v2, %s5033_s23  ;;  %v3152_v2 = vrot.slane %v6367_v28, 3 }
 0x17d   : > { %4335 = vmatmul.mubr.msk.bf16.vlgmr.msra.gmra.mrb[0].mxu0 %vm1543_vm13, %v6128_v0  ;;  %v925_v26 = vpop.permute.xlu0 %924 }
 0x17e   : > { %4338 = vmatprep.mubr.msk.bf16.mxu0 %vm1543_vm13, %v6125_v40  ;;  %2854 = vrot.lane.b32.xlu1 %v2853_v33, %s5035_s20  ;;  %v1298_v33 = vsel %vm1274_vm8, %v1265_v37, %v748_v6  ;;  %v3153_v7 = vor.u32 %v3152_v2, %v3151_v36 }
 0x17f   : > { %4367 = vmatpush3.bf16.msra.mxu0 %v6069_v62  ;;  %v2862_v62 = vsel %vm1015_vm4, %v2858_v9, %v2861_v15  ;;  %v1331_v28 = vsel %vm1307_vm9, %v1298_v33, %v925_v26  ;;  %v3143_v26 = vsel %vm757_vm2, %v3137_v56, %v3142_v18  ;;  %v4829_v56 = vld [vmem:[%s5270_s7 + $0x9c] sm:$0xff]  }
 0x180   : > { %v1008_v63 = vpop.permute.xlu1 %1007  ;;  %2849 = vrot.lane.b32.xlu0 %v2848_v43, %s5034_s14  ;;  %4368 = vmatprep.subr.bf16.mxu0 %v4803_v10  ;;  %v2913_v43 = vsel %vm1576_vm6, %v4807_v45, 0 }
 0x181   : > { %v1006_v52 = vpop.permute.xlu0 %1005 }
 0x182   : > { %2868 = vrot.lane.b32.xlu1 %v2867_v16, %s5037_s9  ;;  %v1364_v6 = vsel %vm1340_vm10, %v1331_v28, %v1006_v52 }
 0x183   : > { %4369 = vmatpush3.bf16.msra.mxu0 %v4803_v10  ;;  %v1333_v10 = vsel %vm1307_vm9, %v1300_v54, %v927_v13 }
 0x184   : > { %v1153_v61 = vpop.permute.xlu1 %1152  ;;  %2863 = vrot.lane.b32.xlu0 %v2862_v62, %s5036_s6  ;;  %4370 = vmatprep.subr.bf16.mxu0 %v4805_v1  ;;  %v1366_v55 = vsel %vm1340_vm10, %v1333_v10, %v1008_v63  ;;  %v3157_v63 = vsel %vm1015_vm4, %v3153_v7, %v3156_v50 }
 0x185   : > { %4339 = vmatmul.mubr.msk.bf16.gmra.mrb[4].mxu0 %vm1543_vm13, %v6238_v3  ;;  %v1151_v32 = vpop.permute.xlu0 %1150  ;;  %v1399_v13 = vsel %vm1373_vm11, %v1366_v55, %v1153_v61 }
 0x186   : > { %4342 = vmatprep.mubr.msk.bf16.mxu0 %vm1543_vm13, %v6233_v30  ;;  %3133 = vrot.lane.b32.xlu1 %v3132_v20, %s5032_s21  ;;  %v1397_v9 = vsel %vm1373_vm11, %v1364_v6, %v1151_v32  ;;  %v4830_v6 = vld [vmem:[%s5270_s7 + $0xb4] sm:$0xff]  }
 0x187   : > { %4371 = vmatpush3.bf16.msra.mxu0 %v4805_v1 }
 0x188   : > { %v1234_v8 = vpop.permute.xlu1 %1233  ;;  %4652 = vmatprep.subr.msk.bf16.mxu0 %vm1576_vm6, %v4807_v45  ;;  %3128 = vrot.lane.b32.xlu0 %v3127_v17, %s5033_s23 }
 0x189   : > { %v6441_v15 = vsel %vm1406_vm12, %v1399_v13, %v1234_v8  ;;  %v1232_v16 = vpop.permute.xlu0 %1231 }
 0x18a   : > { %v6446_v49 = vsel %vm1406_vm12, %v1397_v9, %v1232_v16  ;;  %3149 = vrot.lane.b32.xlu1 %v3148_v34, %s5035_s20 }
 0x18b   : > { %4194 = vmatprep.mubr.msk.bf16.mxu1 %vm1543_vm13, %v6446_v49  ;;  %4373 = vmatpush3.bf16.msra.mxu0 %v2913_v43 }
 0x18c   : > { %4195 = vmatmul.mubr.msk.bf16.gmra.mrb[20].mxu1 %vm1543_vm13, %v6441_v15  ;;  %v673_v23 = vpop.permute.xlu1 %672  ;;  %3144 = vrot.lane.b32.xlu0 %v3143_v26, %s5034_s14 }
 0x18d   : > { %4343 = vmatmul.mubr.msk.bf16.gmra.mrb[8].mxu0 %vm1543_vm13, %v6336_v59  ;;  %v671_v31 = vpop.permute.xlu0 %670  ;;  %4406 = vmatprep.subr.bf16.mxu0 %v6443_v38  ;;  %v1271_v17 = vsel %vm1241_vm7, %v4828_v29, %v673_v23 }
 0x18e   : > { %4346 = vmatprep.mubr.msk.bf16.mxu0 %vm1543_vm13, %v6331_v11  ;;  %3163 = vrot.lane.b32.xlu1 %v3162_v44, %s5037_s9  ;;  %v1269_v19 = vsel %vm1241_vm7, %v4829_v56, %v671_v31  ;;  %v4831_v31 = vld [vmem:[%s5270_s7 + $0xc0] sm:$0xff]   ;;  %s4954_s7 = sshll.u32 %s5038_s5, 4  ;;  %s4955_s7 = int_to_ptr.vmem [resolvable:$false] %s4954_s7 }
 0x18f   : > { %s4956_s21 = scalar_lea.vmem %s4955_s7, 4096  ;;  %p4957_p12 = scmp.lt.s32.totalorder %s6875_s29, %s4955_s7 }
 0x190   : > { %v754_v1 = vpop.permute.xlu1 %753  ;;  %3158 = vrot.lane.b32.xlu0 %v3157_v63, %s5036_s6  ;;  %p4958_p1 = scmp.lt.s32.totalorder %s4956_s21, %s4950_s26 }
 0x191   : > { %v752_v12 = vpop.permute.xlu0 %751  ;;  %v1304_v24 = vsel %vm1274_vm8, %v1271_v17, %v754_v1 }
 0x192   : > { %v1302_v45 = vsel %vm1274_vm8, %v1269_v19, %v752_v12  ;;  %p4959_p2 = por %p4958_p1, %p4957_p12 }
 0x194   : > { %v931_v46 = vpop.permute.xlu1 %930  ;;  %p4960_p4 = pnand %p4959_p2, %p4953_p7 }
 0x195   : > { %4347 = vmatmul.mubr.msk.bf16.gmra.mrb[12].mxu0 %vm1543_vm13, %v6446_v49  ;;  %v929_v52 = vpop.permute.xlu0 %928  ;;  %v1337_v18 = vsel %vm1307_vm9, %v1304_v24, %v931_v46 }
 0x196   : > { %4350 = vmatprep.mubr.msk.bf16.mxu0 %vm1543_vm13, %v6441_v15  ;;  %v1335_v36 = vsel %vm1307_vm9, %v1302_v45, %v929_v52 }
 0x198   : > { %v1012_v62 = vpop.permute.xlu1 %1011 }
 0x199   : > { %v1010_v48 = vpop.permute.xlu0 %1009  ;;  %v1370_v2 = vsel %vm1340_vm10, %v1337_v18, %v1012_v62 }
 0x19a   : > { %v1368_v58 = vsel %vm1340_vm10, %v1335_v36, %v1010_v48 }
 0x19c   : > { %v1157_v20 = vpop.permute.xlu1 %1156 }
 0x19d   : > { %v1155_v61 = vpop.permute.xlu0 %1154  ;;  %v1403_v37 = vsel %vm1373_vm11, %v1370_v2, %v1157_v20 }
 0x19e   : > { %v1401_v32 = vsel %vm1373_vm11, %v1368_v58, %v1155_v61 }
 0x1a0   : > { %v1238_v54 = vpop.permute.xlu1 %1237 }
 0x1a1   : > { %v6480_v27 = vsel %vm1406_vm12, %v1403_v37, %v1238_v54  ;;  %v1236_v53 = vpop.permute.xlu0 %1235  ;;  %v4806_v54 = vld [vmem:[#allocation5 + $0x40] sm:$0xff]  }
 0x1a2   : > { %v6483_v33 = vsel %vm1406_vm12, %v1401_v32, %v1236_v53 }
 0x1a3   : > { %4198 = vmatprep.mubr.msk.bf16.mxu1 %vm1543_vm13, %v6483_v33  ;;  %4351 = vmatmul.mubr.msk.bf16.gmra.mrb[16].mxu0 %vm1543_vm13, %v6483_v33 }
 0x1a4   : > { %4199 = vmatmul.mubr.msk.bf16.gmra.mrb[24].mxu1 %vm1543_vm13, %v6480_v27  ;;  %4354 = vmatprep.mubr.msk.bf16.mxu0 %vm1543_vm13, %v6480_v27  ;;  %v756_v10 = vpop.permute.xlu1 %755 }
 0x1a5   : > { %v675_v34 = vpop.permute.xlu0 %674 }
 0x1a6   : > { %v1273_v13 = vsel %vm1241_vm7, %v4830_v6, %v675_v34 }
 0x1a7   : > { %v1306_v43 = vsel %vm1274_vm8, %v1273_v13, %v756_v10  ;;  %v4811_v10 = vld [vmem:[#allocation5 + $0x48] sm:$0xff]  }
 0x1a8   : > { %v933_v28 = vpop.permute.xlu1 %932 }
 0x1a9   : > { %v1467_v55 = vpop.permute.xlu0 %1466  ;;  %v1339_v9 = vsel %vm1307_vm9, %v1306_v43, %v933_v28 }
 0x1aa   : > { %v1504_v63 = vsel %vm1241_vm7, %v4831_v31, %v1467_v55 }
 0x1ac   : > { %v1014_v42 = vpop.permute.xlu1 %1013 }
 0x1ad   : > { %v1472_v25 = vpop.permute.xlu0 %1471  ;;  %v1372_v16 = vsel %vm1340_vm10, %v1339_v9, %v1014_v42  ;;  %v4832_v9 = vld [vmem:[#allocation5 + $0x54] sm:$0xff]  }
 0x1ae   : > { %v1506_v1 = vsel %vm1274_vm8, %v1504_v63, %v1472_v25 }
 0x1b0   : > { %v1159_v8 = vpop.permute.xlu1 %1158 }
 0x1b1   : > { %v1483_v26 = vpop.permute.xlu0 %1482  ;;  %v1405_v7 = vsel %vm1373_vm11, %v1372_v16, %v1159_v8 }
 0x1b2   : > { %v1508_v12 = vsel %vm1307_vm9, %v1506_v1, %v1483_v26 }
 0x1b4   : > { %v1240_v50 = vpop.permute.xlu1 %1239 }
 0x1b5   : > { %v6500_v44 = vsel %vm1406_vm12, %v1405_v7, %v1240_v50  ;;  %v1488_v23 = vpop.permute.xlu0 %1487 }
 0x1b6   : > { %4202 = vmatprep.mubr.msk.bf16.mxu1 %vm1543_vm13, %v6500_v44  ;;  %4355 = vmatmul.mubr.msk.bf16.gmra.mrb[20].mxu0 %vm1543_vm13, %v6500_v44  ;;  %v1510_v52 = vsel %vm1340_vm10, %v1508_v12, %v1488_v23 }
 0x1b8   : > { %v1502_v46 = vpop.permute.xlu1 %1501 }
 0x1b9   : > { %v1497_v62 = vpop.permute.xlu0 %1496 }
 0x1ba   : > { %v1512_v48 = vsel %vm1373_vm11, %v1510_v52, %v1497_v62 }
 0x1bb   : > { %v6513_v29 = vsel %vm1406_vm12, %v1512_v48, %v1502_v46 }
 0x1bc   : > { %4203 = vmatmul.mubr.msk.bf16.gmra.mrb[28].mxu1 %vm1543_vm13, %v6513_v29  ;;  %4358 = vmatprep.mubr.msk.bf16.mxu0 %vm1543_vm13, %v6513_v29  ;;  %v726_v17 = vpop.permute.xlu1 %725 }
 0x1bd   : > { %v645_v20 = vpop.permute.xlu0 %644 }
 0x1be   : > { %v1243_v56 = vsel %vm1241_vm7, %v6075_v4, %v645_v20 }
 0x1bf   : > { %v1276_v24 = vsel %vm1274_vm8, %v1243_v56, %v726_v17 }
 0x1c0   : > { %v984_v19 = vpop.permute.xlu1 %983 }
 0x1c1   : > { %v903_v61 = vpop.permute.xlu0 %902 }
 0x1c2   : > { %v1309_v45 = vsel %vm1307_vm9, %v1276_v24, %v903_v61 }
 0x1c3   : > { %v1342_v36 = vsel %vm1340_vm10, %v1309_v45, %v984_v19 }
 0x1c4   : > { %v1210_v18 = vpop.permute.xlu1 %1209 }
 0x1c5   : > { %v1129_v2 = vpop.permute.xlu0 %1128 }
 0x1c6   : > { %v1375_v58 = vsel %vm1373_vm11, %v1342_v36, %v1129_v2  ;;  %v4814_v2 = vld [vmem:[#allocation5 + $0xb8] sm:$0xff]  }
 0x1c7   : > { %v1408_v37 = vsel %vm1406_vm12, %v1375_v58, %v1210_v18  ;;  %v4815_v58 = vld [vmem:[#allocation5 + $0xc0] ss:$0 sps:$4 sm:$0xff]  }
 0x1c8   : > { %4214 = vmatprep.mubr.msk.bf16.mxu1 %vm1543_vm13, %v1408_v37  ;;  %v1954_v32 = vpop.permute.xlu1 %1953  ;;  %v4833_v37 = vld [vmem:[#allocation5 + $0x5c] sm:$0xff]  }
 0x1c9   : > { %4215 = vmatmul.mubr.msk.bf16.vlgmr.msra.gmra.mrb[0].mxu1 %vm1543_vm13, %v5968_v57  ;;  %v1949_v4 = vpop.permute.xlu0 %1948  ;;  %v4812_v57 = vld [vmem:[#allocation5 + $0x50] ss:$0 sps:$4 sm:$0xff]  }
 0x1ca   : > { %4218 = vmatprep.mubr.msk.bf16.mxu1 %vm1543_vm13, %v6003_v51  ;;  %4247 = vmatpush3.bf16.msra.mxu1 %v6201_v60  ;;  %v1986_v53 = vsel %vm1241_vm7, %v6146_v47, %v1949_v4  ;;  %v2028_v13 = vsel %vm1576_vm6, %v4812_v57, 0 }
 0x1cb   : > { %4248 = vmatprep.subr.bf16.mxu1 %v4806_v54  ;;  %v1988_v28 = vsel %vm1274_vm8, %v1986_v53, %v1954_v32 }
 0x1cc   : > { %v1970_v34 = vpop.permute.xlu1 %1969 }
 0x1ce   : > { %v1965_v55 = vpop.permute.xlu0 %1964  ;;  %4249 = vmatpush3.bf16.msra.mxu1 %v4806_v54 }
 0x1cf   : > { %v1990_v42 = vsel %vm1307_vm9, %v1988_v28, %v1965_v55  ;;  %4250 = vmatprep.subr.bf16.mxu1 %v4811_v10 }
 0x1d0   : > { %v1984_v25 = vpop.permute.xlu1 %1983  ;;  %v1992_v60 = vsel %vm1340_vm10, %v1990_v42, %v1970_v34 }
 0x1d1   : > { %4219 = vmatmul.mubr.msk.bf16.gmra.mrb[4].mxu1 %vm1543_vm13, %v5959_v39 }
 0x1d2   : > { %v1979_v6 = vpop.permute.xlu0 %1978  ;;  %4222 = vmatprep.mubr.msk.bf16.mxu1 %vm1543_vm13, %v5998_v14  ;;  %4251 = vmatpush3.bf16.msra.mxu1 %v4811_v10 }
 0x1d3   : > { %v1994_v47 = vsel %vm1373_vm11, %v1992_v60, %v1979_v6  ;;  %4648 = vmatprep.subr.msk.bf16.mxu1 %vm1576_vm6, %v4812_v57 }
 0x1d4   : > { %v6545_v8 = vsel %vm1406_vm12, %v1994_v47, %v1984_v25  ;;  %v2249_v43 = vpop.permute.xlu1 %2248 }
 0x1d5   : > { %4359 = vmatmul.mubr.msk.bf16.gmra.mrb[24].mxu0 %vm1543_vm13, %v6545_v8 }
 0x1d6   : > { %v2244_v26 = vpop.permute.xlu0 %2243  ;;  %4253 = vmatpush3.bf16.msra.mxu1 %v2028_v13 }
 0x1d7   : > { %4446 = vmatprep.subr.bf16.mxu1 %v4832_v9  ;;  %v2281_v23 = vsel %vm1241_vm7, %v6183_v35, %v2244_v26 }
 0x1d8   : > { %v2260_v16 = vpop.permute.xlu1 %2259  ;;  %v2283_v1 = vsel %vm1274_vm8, %v2281_v23, %v2249_v43 }
 0x1d9   : > { %4223 = vmatmul.mubr.msk.bf16.gmra.mrb[8].mxu1 %vm1543_vm13, %v6128_v0  ;;  %v2285_v12 = vsel %vm1307_vm9, %v2283_v1, %v2260_v16  ;;  %v6733_v1 = vld [vmem:[#allocation7] ss:$0 sm:$0xff] }
 0x1da   : > { %v2539_v7 = vpop.permute.xlu0 %2538  ;;  %4226 = vmatprep.mubr.msk.bf16.mxu1 %vm1543_vm13, %v6125_v40 }
 0x1db   : > { %v2576_v20 = vsel %vm1241_vm7, %v6199_v5, %v2539_v7  ;;  %v4813_v5 = vld [vmem:[#allocation5 + $0xb0] sm:$0xff]  }
 0x1dc   : > { %v2265_v50 = vpop.permute.xlu1 %2264 }
 0x1dd   : > { %v2287_v52 = vsel %vm1340_vm10, %v2285_v12, %v2265_v50 }
 0x1de   : > { %v2544_v31 = vpop.permute.xlu0 %2543 }
 0x1df   : > { %v2578_v56 = vsel %vm1274_vm8, %v2576_v20, %v2544_v31 }
 0x1e0   : > { %v2274_v63 = vpop.permute.xlu1 %2273 }
 0x1e1   : > { %4227 = vmatmul.mubr.msk.bf16.gmra.mrb[12].mxu1 %vm1543_vm13, %v6238_v3  ;;  %v2289_v62 = vsel %vm1373_vm11, %v2287_v52, %v2274_v63  ;;  %v6735_v52 = vld [vmem:[#allocation8] ss:$0 sm:$0xff] }
 0x1e2   : > { %v2555_v46 = vpop.permute.xlu0 %2554  ;;  %4230 = vmatprep.mubr.msk.bf16.mxu1 %vm1543_vm13, %v6233_v30 }
 0x1e3   : > { %v2580_v19 = vsel %vm1307_vm9, %v2578_v56, %v2555_v46 }
 0x1e4   : > { %v2279_v48 = vpop.permute.xlu1 %2278 }
 0x1e5   : > { %v6564_v35 = vsel %vm1406_vm12, %v2289_v62, %v2279_v48 }
 0x1e6   : > { %v2560_v17 = vpop.permute.xlu0 %2559  ;;  %4362 = vmatprep.mubr.msk.bf16.mxu0 %vm1543_vm13, %v6564_v35 }
 0x1e7   : > { %v2582_v61 = vsel %vm1340_vm10, %v2580_v19, %v2560_v17 }
 0x1e8   : > { %v2574_v24 = vpop.permute.xlu1 %2573 }
 0x1e9   : > { %4231 = vmatmul.mubr.msk.bf16.gmra.mrb[16].mxu1 %vm1543_vm13, %v6336_v59 }
 0x1ea   : > { %v2569_v45 = vpop.permute.xlu0 %2568  ;;  %4234 = vmatprep.mubr.msk.bf16.mxu1 %vm1543_vm13, %v6331_v11 }
 0x1eb   : > { %v2584_v18 = vsel %vm1373_vm11, %v2582_v61, %v2569_v45 }
 0x1ec   : > { %v6579_v36 = vsel %vm1406_vm12, %v2584_v18, %v2574_v24  ;;  %v2839_v54 = vpop.permute.xlu1 %2838 }
 0x1ed   : > { %4363 = vmatmul.mubr.msk.bf16.gmra.mrb[28].mxu0 %vm1543_vm13, %v6579_v36 }
 0x1ee   : > { %4374 = vmatprep.mubr.msk.bf16.mxu0 %vm1543_vm13, %v6128_v0 }
 0x1f0   : > { %v2855_v53 = vpop.permute.xlu1 %2854 }
 0x1f1   : > { %4235 = vmatmul.mubr.msk.bf16.gmra.mrb[20].mxu1 %vm1543_vm13, %v6446_v49 }
 0x1f2   : > { %4238 = vmatprep.mubr.msk.bf16.mxu1 %vm1543_vm13, %v6441_v15 }
 0x1f4   : > { %v2869_v28 = vpop.permute.xlu1 %2868 }
 0x1f5   : > { %4375 = vmatmul.mubr.msk.bf16.vlgmr.msra.gmra.mrb[0].mxu0 %vm1543_vm13, %v6125_v40 }
 0x1f6   : > { %4407 = vmatpush3.bf16.msra.mxu0 %v6443_v38  ;;  %4378 = vmatprep.mubr.msk.bf16.mxu0 %vm1543_vm13, %v6238_v3  ;;  %v3208_v38 = vsel %vm1576_vm6, %v4815_v58, 0 }
 0x1f7   : > { %4408 = vmatprep.subr.bf16.mxu0 %v4813_v5 }
 0x1f9   : > { %4239 = vmatmul.mubr.msk.bf16.gmra.mrb[24].mxu1 %vm1543_vm13, %v6483_v33 }
 0x1fa   : > { %4242 = vmatprep.mubr.msk.bf16.mxu1 %vm1543_vm13, %v6480_v27  ;;  %4409 = vmatpush3.bf16.msra.mxu0 %v4813_v5 }
 0x1fb   : > { %4410 = vmatprep.subr.bf16.mxu0 %v4814_v2 }
 0x1fd   : > { %4379 = vmatmul.mubr.msk.bf16.gmra.mrb[4].mxu0 %vm1543_vm13, %v6233_v30 }
 0x1fe   : > { %4382 = vmatprep.mubr.msk.bf16.mxu0 %vm1543_vm13, %v6336_v59  ;;  %4411 = vmatpush3.bf16.msra.mxu0 %v4814_v2 }
 0x1ff   : > { %4653 = vmatprep.subr.msk.bf16.mxu0 %vm1576_vm6, %v4815_v58 }
 0x201   : > { %4243 = vmatmul.mubr.msk.bf16.gmra.mrb[28].mxu1 %vm1543_vm13, %v6500_v44 }
 0x202   : > { %4254 = vmatprep.mubr.msk.bf16.mxu1 %vm1543_vm13, %v6003_v51  ;;  %4413 = vmatpush3.bf16.msra.mxu0 %v3208_v38  ;;  %v4834_v51 = vld [vmem:[#allocation5 + $0x64] sm:$0xff]  }
 0x205   : > { %4383 = vmatmul.mubr.msk.bf16.gmra.mrb[8].mxu0 %vm1543_vm13, %v6331_v11 }
 0x206   : > { %4386 = vmatprep.mubr.msk.bf16.mxu0 %vm1543_vm13, %v6446_v49 }
 0x209   : > { %4255 = vmatmul.mubr.msk.bf16.vlgmr.msra.gmra.mrb[0].mxu1 %vm1543_vm13, %v5959_v39  ;;  %v4835_v39 = vld [vmem:[#allocation5 + $0x6c] ss:$0 sps:$4 sm:$0xff]  }
 0x20a   : > { %4258 = vmatprep.mubr.msk.bf16.mxu1 %vm1543_vm13, %v5998_v14  ;;  %4450 = vmatpush3.bf16.msra.mxu1 %v4832_v9  ;;  %v2834_v14 = vpop.permute.xlu0 %2833 }
 0x20b   : > { %4447 = vmatprep.subr.bf16.mxu1 %v4833_v37 }
 0x20d   : > { %4387 = vmatmul.mubr.msk.bf16.gmra.mrb[12].mxu0 %vm1543_vm13, %v6441_v15 }
 0x20e   : > { %4390 = vmatprep.mubr.msk.bf16.mxu0 %vm1543_vm13, %v6483_v33  ;;  %4451 = vmatpush3.bf16.msra.mxu1 %v4833_v37 }
 0x20f   : > { %4448 = vmatprep.subr.bf16.mxu1 %v4834_v51 }
 0x211   : > { %4259 = vmatmul.mubr.msk.bf16.gmra.mrb[4].mxu1 %vm1543_vm13, %v6128_v0  ;;  %v2871_v0 = vsel %vm1241_vm7, %v6294_v22, %v2834_v14 }
 0x212   : > { %4262 = vmatprep.mubr.msk.bf16.mxu1 %vm1543_vm13, %v6125_v40  ;;  %4452 = vmatpush3.bf16.msra.mxu1 %v4834_v51  ;;  %v2873_v32 = vsel %vm1274_vm8, %v2871_v0, %v2839_v54 }
 0x213   : > { %4650 = vmatprep.subr.msk.bf16.mxu1 %vm1576_vm6, %v4835_v39 }
 0x215   : > { %4391 = vmatmul.mubr.msk.bf16.gmra.mrb[16].mxu0 %vm1543_vm13, %v6480_v27 }
 0x216   : > { %4394 = vmatprep.mubr.msk.bf16.mxu0 %vm1543_vm13, %v6500_v44  ;;  %4453 = vmatpush3.bf16.msra.mxu1 %v5703_v41  ;;  %v2850_v41 = vpop.permute.xlu0 %2849 }
 0x217   : > { %v2875_v4 = vsel %vm1307_vm9, %v2873_v32, %v2850_v41 }
 0x218   : > { %v2877_v22 = vsel %vm1340_vm10, %v2875_v4, %v2855_v53 }
 0x219   : > { %4263 = vmatmul.mubr.msk.bf16.gmra.mrb[8].mxu1 %vm1543_vm13, %v6238_v3 }
 0x21a   : > { %4266 = vmatprep.mubr.msk.bf16.mxu1 %vm1543_vm13, %v6233_v30  ;;  %v2864_v10 = vpop.permute.xlu0 %2863 }
 0x21b   : > { %v2879_v34 = vsel %vm1373_vm11, %v2877_v22, %v2864_v10 }
 0x21c   : > { %v2881_v55 = vsel %vm1406_vm12, %v2879_v34, %v2869_v28 }
 0x21d   : > { %4395 = vmatmul.mubr.msk.bf16.gmra.mrb[20].mxu0 %vm1543_vm13, %v6513_v29 }
 0x21e   : > { %4398 = vmatprep.mubr.msk.bf16.mxu0 %vm1543_vm13, %v6545_v8 }
 0x221   : > { %4267 = vmatmul.mubr.msk.bf16.gmra.mrb[12].mxu1 %vm1543_vm13, %v6336_v59 }
 0x222   : > { %4270 = vmatprep.mubr.msk.bf16.mxu1 %vm1543_vm13, %v6331_v11 }
 0x225   : > { %4399 = vmatmul.mubr.msk.bf16.gmra.mrb[24].mxu0 %vm1543_vm13, %v6564_v35 }
 0x226   : > { %4402 = vmatprep.mubr.msk.bf16.mxu0 %vm1543_vm13, %v6579_v36 }
 0x229   : > { %4271 = vmatmul.mubr.msk.bf16.gmra.mrb[16].mxu1 %vm1543_vm13, %v6446_v49 }
 0x22a   : > { %4274 = vmatprep.mubr.msk.bf16.mxu1 %vm1543_vm13, %v6441_v15 }
 0x22d   : > { %4403 = vmatmul.mubr.msk.bf16.gmra.mrb[28].mxu0 %vm1543_vm13, %v2881_v55 }
 0x22e   : > { %4414 = vmatprep.mubr.msk.bf16.mxu0 %vm1543_vm13, %v6125_v40  ;;  %v3129_v40 = vpop.permute.xlu0 %3128 }
 0x231   : > { %4275 = vmatmul.mubr.msk.bf16.gmra.mrb[20].mxu1 %vm1543_vm13, %v6483_v33 }
 0x232   : > { %4278 = vmatprep.mubr.msk.bf16.mxu1 %vm1543_vm13, %v6480_v27 }
 0x235   : > { %4415 = vmatmul.mubr.msk.bf16.vlgmr.msra.gmra.mrb[0].mxu0 %vm1543_vm13, %v6238_v3  ;;  %v3134_v3 = vpop.permute.xlu1 %3133 }
 0x236   : > { %4418 = vmatprep.mubr.msk.bf16.mxu0 %vm1543_vm13, %v6233_v30  ;;  %v3166_v30 = vsel %vm1241_vm7, %v6340_v21, %v3129_v40 }
 0x239   : > { %4279 = vmatmul.mubr.msk.bf16.gmra.mrb[24].mxu1 %vm1543_vm13, %v6500_v44 }
 0x23a   : > { %4282 = vmatprep.mubr.msk.bf16.mxu1 %vm1543_vm13, %v6513_v29 }
 0x23d   : > { %4419 = vmatmul.mubr.msk.bf16.gmra.mrb[4].mxu0 %vm1543_vm13, %v6336_v59  ;;  %v3145_v59 = vpop.permute.xlu0 %3144 }
 0x23e   : > { %4422 = vmatprep.mubr.msk.bf16.mxu0 %vm1543_vm13, %v6331_v11  ;;  %v3168_v11 = vsel %vm1274_vm8, %v3166_v30, %v3134_v3 }
 0x241   : > { %4283 = vmatmul.mubr.msk.bf16.gmra.mrb[28].mxu1 %vm1543_vm13, %v6545_v8  ;;  %v3159_v21 = vpop.permute.xlu0 %3158 }
 0x242   : > { %4310 = vmatprep.mubr.msk.bf16.mxu1 %vm1543_vm13, %v6446_v49 }
 0x245   : > { %4423 = vmatmul.mubr.msk.bf16.gmra.mrb[8].mxu0 %vm1543_vm13, %v6446_v49  ;;  %v3150_v49 = vpop.permute.xlu1 %3149 }
 0x246   : > { %4426 = vmatprep.mubr.msk.bf16.mxu0 %vm1543_vm13, %v6441_v15 }
 0x249   : > { %4311 = vmatmul.mubr.msk.bf16.vlgmr.msra.gmra.mrb[16].mxu1 %vm1543_vm13, %v6441_v15  ;;  %v3170_v15 = vsel %vm1307_vm9, %v3168_v11, %v3145_v59 }
 0x24a   : > { %4314 = vmatprep.mubr.msk.bf16.mxu1 %vm1543_vm13, %v6483_v33 }
 0x24d   : > { %4427 = vmatmul.mubr.msk.bf16.gmra.mrb[12].mxu0 %vm1543_vm13, %v6483_v33 }
 0x24e   : > { %4430 = vmatprep.mubr.msk.bf16.mxu0 %vm1543_vm13, %v6480_v27 }
 0x251   : > { %4315 = vmatmul.mubr.msk.bf16.gmra.mrb[20].mxu1 %vm1543_vm13, %v6480_v27  ;;  %v3172_v27 = vsel %vm1340_vm10, %v3170_v15, %v3150_v49 }
 0x252   : > { %4318 = vmatprep.mubr.msk.bf16.mxu1 %vm1543_vm13, %v6500_v44  ;;  %v3174_v33 = vsel %vm1373_vm11, %v3172_v27, %v3159_v21 }
 0x255   : > { %4431 = vmatmul.mubr.msk.bf16.gmra.mrb[16].mxu0 %vm1543_vm13, %v6500_v44  ;;  %v3164_v44 = vpop.permute.xlu1 %3163 }
 0x256   : > { %4434 = vmatprep.mubr.msk.bf16.mxu0 %vm1543_vm13, %v6513_v29 }
 0x259   : > { %4319 = vmatmul.mubr.msk.bf16.gmra.mrb[24].mxu1 %vm1543_vm13, %v6513_v29  ;;  %v3176_v29 = vsel %vm1406_vm12, %v3174_v33, %v3164_v44 }
 0x25a   : > { %4322 = vmatprep.mubr.msk.bf16.mxu1 %vm1543_vm13, %v6545_v8 }
 0x25d   : > { %4435 = vmatmul.mubr.msk.bf16.gmra.mrb[20].mxu0 %vm1543_vm13, %v6545_v8 }
 0x25e   : > { %4438 = vmatprep.mubr.msk.bf16.mxu0 %vm1543_vm13, %v6564_v35 }
 0x261   : > { %4323 = vmatmul.mubr.msk.bf16.gmra.mrb[28].mxu1 %vm1543_vm13, %v6564_v35 }
 0x265   : > { %4439 = vmatmul.mubr.msk.bf16.gmra.mrb[24].mxu0 %vm1543_vm13, %v6579_v36 }
 0x266   : > { %4442 = vmatprep.mubr.msk.bf16.mxu0 %vm1543_vm13, %v2881_v55 }
 0x26d   : > { %4443 = vmatmul.mubr.msk.bf16.gmra.mrb[28].mxu0 %vm1543_vm13, %v3176_v29 }
 0x2dc   : > { %v4256_v42 = vpop.f32.mrb[0].mxu1 }
 0x2dd   : > { %v2064_v57 = vpop.f32.mrb[1].mxu1 }
 0x2de   : > { %v4257_v25 = vpop.f32.mrb[2].mxu1 }
 0x2df   : > { %v2067_v60 = vpop.f32.mrb[3].mxu1 }
 0x2e4   : > { %v4260_v6 = vpop.f32.mrb[4].mxu1 }
 0x2e5   : > { %v2080_v47 = vpop.f32.mrb[5].mxu1 }
 0x2e6   : > { %v4261_v13 = vpop.f32.mrb[6].mxu1 }
 0x2e7   : > { %v2083_v8 = vpop.f32.mrb[7].mxu1 }
 0x2ec   : > { %v4264_v43 = vpop.f32.mrb[8].mxu1 }
 0x2ed   : > { %v2096_v26 = vpop.f32.mrb[9].mxu1 }
 0x2ee   : > { %v6721_v9 = vpop.f32.mrb[10].mxu1 }
 0x2ef   : > { %v6723_v16 = vpop.f32.mrb[11].mxu1 }
 0x2f4   : > { %v6725_v7 = vpop.f32.mrb[12].mxu1 }
 0x2f5   : > { %v6727_v50 = vpop.f32.mrb[13].mxu1 }
 0x2f6   : > { %v6729_v23 = vpop.f32.mrb[14].mxu1 }
 0x2f7   : > { %v6731_v31 = vpop.f32.mrb[15].mxu1 }
 0x308   : > { %v4416_v63 = vpop.f32.mrb[0].mxu0 }
 0x309   : > { %v4454_v12 = vadd.f32 %v4416_v63, %v4256_v42  ;;  %v3244_v46 = vpop.f32.mrb[1].mxu0 }
 0x30a   : > { %v4455_v62 = vadd.f32 %v3244_v46, %v2064_v57  ;;  %v4417_v48 = vpop.f32.mrb[2].mxu0 }
 0x30b   : > { %v3412_v35 = vmul.f32 %v4454_v12, %v6733_v1  ;;  %v4456_v17 = vadd.f32 %v4417_v48, %v4257_v25  ;;  %v3247_v20 = vpop.f32.mrb[3].mxu0 }
 0x30c   : > { %v3410_v56 = vmul.f32 %v4455_v62, %v6733_v1  ;;  %v4457_v19 = vadd.f32 %v3247_v20, %v2067_v60 }
 0x30d   : > { %v3451_v24 = vadd.f32 %v6735_v52, %v3412_v35  ;;  %v3413_v61 = vmul.f32 %v4456_v17, %v6733_v1 }
 0x30e   : > { %v3449_v45 = vadd.f32 %v6735_v52, %v3410_v56  ;;  %v3411_v18 = vmul.f32 %v4457_v19, %v6733_v1 }
 0x30f   : > { %v3995_v36 = vpack.c.bf16 %v3451_v24, %v3451_v24  ;;  %v3452_v5 = vadd.f32 %v6735_v52, %v3413_v61 }
 0x310   : > { %v3993_v2 = vpack.c.bf16 %v3449_v45, %v3449_v45  ;;  %v3450_v58 = vadd.f32 %v6735_v52, %v3411_v18  ;;  %v4420_v38 = vpop.f32.mrb[4].mxu0 }
 0x311   : > { %3612 = vst.msk [vmem:[%s6746_s25 + $0x8] sm:$0xf] %vm3609_vm14, %v3995_v36  ;;  %v3996_v37 = vpack.c.bf16 %v3452_v5, %v3452_v5  ;;  %v4458_v51 = vadd.f32 %v4420_v38, %v4260_v6  ;;  %v3260_v39 = vpop.f32.mrb[5].mxu0 }
 0x312   : > { %3610 = vst.msk [vmem:[%s6746_s25] sm:$0xf] %vm3609_vm14, %v3993_v2  ;;  %v3994_v14 = vpack.c.bf16 %v3450_v58, %v3450_v58  ;;  %v4459_v0 = vadd.f32 %v3260_v39, %v2080_v47  ;;  %v4421_v54 = vpop.f32.mrb[6].mxu0 }
 0x313   : > { %3613 = vst.msk [vmem:[%s6746_s25 + $0xc] sm:$0xf] %vm3609_vm14, %v3996_v37  ;;  %v3416_v32 = vmul.f32 %v4458_v51, %v6733_v1  ;;  %v4460_v41 = vadd.f32 %v4421_v54, %v4261_v13  ;;  %v3263_v4 = vpop.f32.mrb[7].mxu0 }
 0x314   : > { %3611 = vst.msk [vmem:[%s6746_s25 + $0x4] sm:$0xf] %vm3609_vm14, %v3994_v14  ;;  %v3414_v53 = vmul.f32 %v4459_v0, %v6733_v1  ;;  %v4461_v22 = vadd.f32 %v3263_v4, %v2083_v8 }
 0x315   : > { %v3455_v10 = vadd.f32 %v6735_v52, %v3416_v32  ;;  %v3417_v34 = vmul.f32 %v4460_v41, %v6733_v1 }
 0x316   : > { %v3453_v28 = vadd.f32 %v6735_v52, %v3414_v53  ;;  %v3415_v55 = vmul.f32 %v4461_v22, %v6733_v1 }
 0x317   : > { %v3999_v40 = vpack.c.bf16 %v3455_v10, %v3455_v10  ;;  %v3456_v30 = vadd.f32 %v6735_v52, %v3417_v34 }
 0x318   : > { %v3997_v3 = vpack.c.bf16 %v3453_v28, %v3453_v28  ;;  %v3454_v11 = vadd.f32 %v6735_v52, %v3415_v55  ;;  %v4424_v59 = vpop.f32.mrb[8].mxu0 }
 0x319   : > { %3616 = vst.msk [vmem:[%s6746_s25 + $0x18] sm:$0xf] %vm3609_vm14, %v3999_v40  ;;  %v4000_v15 = vpack.c.bf16 %v3456_v30, %v3456_v30  ;;  %v4462_v49 = vadd.f32 %v4424_v59, %v4264_v43  ;;  %v3276_v27 = vpop.f32.mrb[9].mxu0 }
 0x31a   : > { %3614 = vst.msk [vmem:[%s6746_s25 + $0x10] sm:$0xf] %vm3609_vm14, %v3997_v3  ;;  %v3998_v21 = vpack.c.bf16 %v3454_v11, %v3454_v11  ;;  %v4463_v33 = vadd.f32 %v3276_v27, %v2096_v26  ;;  %v4425_v44 = vpop.f32.mrb[10].mxu0 }
 0x31b   : > { %3617 = vst.msk [vmem:[%s6746_s25 + $0x1c] sm:$0xf] %vm3609_vm14, %v4000_v15  ;;  %v3420_v29 = vmul.f32 %v4462_v49, %v6733_v1  ;;  %v4464_v42 = vadd.f32 %v4425_v44, %v6721_v9  ;;  %v3279_v57 = vpop.f32.mrb[11].mxu0 }
 0x31c   : > { %3615 = vst.msk [vmem:[%s6746_s25 + $0x14] sm:$0xf] %vm3609_vm14, %v3998_v21  ;;  %v3418_v25 = vmul.f32 %v4463_v33, %v6733_v1  ;;  %v4465_v60 = vadd.f32 %v3279_v57, %v6723_v16  ;;  %v4312_v6 = vpop.f32.mrb[16].mxu1 }
 0x31d   : > { %v3459_v47 = vadd.f32 %v6735_v52, %v3420_v29  ;;  %v3421_v13 = vmul.f32 %v4464_v42, %v6733_v1  ;;  %v2423_v8 = vpop.f32.mrb[17].mxu1 }
 0x31e   : > { %v3457_v43 = vadd.f32 %v6735_v52, %v3418_v25  ;;  %v3419_v26 = vmul.f32 %v4465_v60, %v6733_v1  ;;  %v4313_v9 = vpop.f32.mrb[18].mxu1 }
 0x31f   : > { %v4003_v63 = vpack.c.bf16 %v3459_v47, %v3459_v47  ;;  %v3460_v12 = vadd.f32 %v6735_v52, %v3421_v13  ;;  %v2426_v46 = vpop.f32.mrb[19].mxu1 }
 0x320   : > { %v4001_v62 = vpack.c.bf16 %v3457_v43, %v3457_v43  ;;  %v3458_v16 = vadd.f32 %v6735_v52, %v3419_v26  ;;  %v4428_v48 = vpop.f32.mrb[12].mxu0 }
 0x321   : > { %3620 = vst.msk [vmem:[%s6746_s25 + $0x28] sm:$0xf] %vm3609_vm14, %v4003_v63  ;;  %v4004_v35 = vpack.c.bf16 %v3460_v12, %v3460_v12  ;;  %v4466_v17 = vadd.f32 %v4428_v48, %v6725_v7  ;;  %v3292_v20 = vpop.f32.mrb[13].mxu0 }
 0x322   : > { %3618 = vst.msk [vmem:[%s6746_s25 + $0x20] sm:$0xf] %vm3609_vm14, %v4001_v62  ;;  %v4002_v56 = vpack.c.bf16 %v3458_v16, %v3458_v16  ;;  %v4467_v19 = vadd.f32 %v3292_v20, %v6727_v50  ;;  %v4429_v24 = vpop.f32.mrb[14].mxu0 }
 0x323   : > { %3621 = vst.msk [vmem:[%s6746_s25 + $0x2c] sm:$0xf] %vm3609_vm14, %v4004_v35  ;;  %v3424_v61 = vmul.f32 %v4466_v17, %v6733_v1  ;;  %v4468_v45 = vadd.f32 %v4429_v24, %v6729_v23  ;;  %v3295_v18 = vpop.f32.mrb[15].mxu0 }
 0x324   : > { %3619 = vst.msk [vmem:[%s6746_s25 + $0x24] sm:$0xf] %vm3609_vm14, %v4002_v56  ;;  %v3422_v36 = vmul.f32 %v4467_v19, %v6733_v1  ;;  %v4469_v7 = vadd.f32 %v3295_v18, %v6731_v31  ;;  %v4316_v5 = vpop.f32.mrb[20].mxu1 }
 0x325   : > { %v3463_v2 = vadd.f32 %v6735_v52, %v3424_v61  ;;  %v3425_v50 = vmul.f32 %v4468_v45, %v6733_v1  ;;  %v2439_v58 = vpop.f32.mrb[21].mxu1 }
 0x326   : > { %v3461_v38 = vadd.f32 %v6735_v52, %v3422_v36  ;;  %v3423_v37 = vmul.f32 %v4469_v7, %v6733_v1  ;;  %v4317_v23 = vpop.f32.mrb[22].mxu1 }
 0x327   : > { %v4007_v51 = vpack.c.bf16 %v3463_v2, %v3463_v2  ;;  %v3464_v39 = vadd.f32 %v6735_v52, %v3425_v50  ;;  %v2442_v14 = vpop.f32.mrb[23].mxu1 }
 0x328   : > { %v4005_v0 = vpack.c.bf16 %v3461_v38, %v3461_v38  ;;  %v3462_v31 = vadd.f32 %v6735_v52, %v3423_v37  ;;  %v4432_v54 = vpop.f32.mrb[16].mxu0 }
 0x329   : > { %3624 = vst.msk [vmem:[%s6746_s25 + $0x38] sm:$0xf] %vm3609_vm14, %v4007_v51  ;;  %v4008_v32 = vpack.c.bf16 %v3464_v39, %v3464_v39  ;;  %v4470_v41 = vadd.f32 %v4432_v54, %v4312_v6  ;;  %v3308_v4 = vpop.f32.mrb[17].mxu0 }
 0x32a   : > { %3622 = vst.msk [vmem:[%s6746_s25 + $0x30] sm:$0xf] %vm3609_vm14, %v4005_v0  ;;  %v4006_v53 = vpack.c.bf16 %v3462_v31, %v3462_v31  ;;  %v4471_v22 = vadd.f32 %v3308_v4, %v2423_v8  ;;  %v4433_v10 = vpop.f32.mrb[18].mxu0 }
 0x32b   : > { %3625 = vst.msk [vmem:[%s6746_s25 + $0x3c] sm:$0xf] %vm3609_vm14, %v4008_v32  ;;  %v3428_v34 = vmul.f32 %v4470_v41, %v6733_v1  ;;  %v4472_v28 = vadd.f32 %v4433_v10, %v4313_v9  ;;  %v3311_v55 = vpop.f32.mrb[19].mxu0 }
 0x32c   : > { %3623 = vst.msk [vmem:[%s6746_s25 + $0x34] sm:$0xf] %vm3609_vm14, %v4006_v53  ;;  %v3426_v40 = vmul.f32 %v4471_v22, %v6733_v1  ;;  %v4473_v30 = vadd.f32 %v3311_v55, %v2426_v46  ;;  %v4320_v3 = vpop.f32.mrb[24].mxu1 }
 0x32d   : > { %v3467_v11 = vadd.f32 %v6735_v52, %v3428_v34  ;;  %v3429_v59 = vmul.f32 %v4472_v28, %v6733_v1  ;;  %v2455_v15 = vpop.f32.mrb[25].mxu1 }
 0x32e   : > { %v3465_v49 = vadd.f32 %v6735_v52, %v3426_v40  ;;  %v3427_v27 = vmul.f32 %v4473_v30, %v6733_v1  ;;  %v4321_v21 = vpop.f32.mrb[26].mxu1 }
 0x32f   : > { %v4011_v33 = vpack.c.bf16 %v3467_v11, %v3467_v11  ;;  %v3468_v44 = vadd.f32 %v6735_v52, %v3429_v59  ;;  %v2458_v29 = vpop.f32.mrb[27].mxu1 }
 0x330   : > { %v4009_v42 = vpack.c.bf16 %v3465_v49, %v3465_v49  ;;  %v3466_v57 = vadd.f32 %v6735_v52, %v3427_v27  ;;  %v4436_v25 = vpop.f32.mrb[20].mxu0 }
 0x331   : > { %3628 = vst.msk [vmem:[%s6746_s25 + $0x48] sm:$0xf] %vm3609_vm14, %v4011_v33  ;;  %v4012_v60 = vpack.c.bf16 %v3468_v44, %v3468_v44  ;;  %v4474_v6 = vadd.f32 %v4436_v25, %v4316_v5  ;;  %v3324_v47 = vpop.f32.mrb[21].mxu0 }
 0x332   : > { %3626 = vst.msk [vmem:[%s6746_s25 + $0x40] sm:$0xf] %vm3609_vm14, %v4009_v42  ;;  %v4010_v13 = vpack.c.bf16 %v3466_v57, %v3466_v57  ;;  %v4475_v8 = vadd.f32 %v3324_v47, %v2439_v58  ;;  %v4437_v43 = vpop.f32.mrb[22].mxu0 }
 0x333   : > { %3629 = vst.msk [vmem:[%s6746_s25 + $0x4c] sm:$0xf] %vm3609_vm14, %v4012_v60  ;;  %v3432_v26 = vmul.f32 %v4474_v6, %v6733_v1  ;;  %v4476_v9 = vadd.f32 %v4437_v43, %v4317_v23  ;;  %v3327_v63 = vpop.f32.mrb[23].mxu0 }
 0x334   : > { %3627 = vst.msk [vmem:[%s6746_s25 + $0x44] sm:$0xf] %vm3609_vm14, %v4010_v13  ;;  %v3430_v12 = vmul.f32 %v4475_v8, %v6733_v1  ;;  %v4477_v46 = vadd.f32 %v3327_v63, %v2442_v14  ;;  %v4324_v62 = vpop.f32.mrb[28].mxu1 }
 0x335   : > { %v3471_v16 = vadd.f32 %v6735_v52, %v3432_v26  ;;  %v3433_v48 = vmul.f32 %v4476_v9, %v6733_v1  ;;  %v2471_v35 = vpop.f32.mrb[29].mxu1 }
 0x336   : > { %v3469_v17 = vadd.f32 %v6735_v52, %v3430_v12  ;;  %v3431_v20 = vmul.f32 %v4477_v46, %v6733_v1  ;;  %v4325_v56 = vpop.f32.mrb[30].mxu1 }
 0x337   : > { %v4015_v19 = vpack.c.bf16 %v3471_v16, %v3471_v16  ;;  %v3472_v24 = vadd.f32 %v6735_v52, %v3433_v48  ;;  %v2474_v61 = vpop.f32.mrb[31].mxu1 }
 0x338   : > { %v4013_v45 = vpack.c.bf16 %v3469_v17, %v3469_v17  ;;  %v3470_v18 = vadd.f32 %v6735_v52, %v3431_v20  ;;  %v4440_v36 = vpop.f32.mrb[24].mxu0 }
 0x339   : > { %3632 = vst.msk [vmem:[%s6746_s25 + $0x58] sm:$0xf] %vm3609_vm14, %v4015_v19  ;;  %v4016_v7 = vpack.c.bf16 %v3472_v24, %v3472_v24  ;;  %v4478_v5 = vadd.f32 %v4440_v36, %v4320_v3  ;;  %v3340_v2 = vpop.f32.mrb[25].mxu0 }
 0x33a   : > { %3630 = vst.msk [vmem:[%s6746_s25 + $0x50] sm:$0xf] %vm3609_vm14, %v4013_v45  ;;  %v4014_v50 = vpack.c.bf16 %v3470_v18, %v3470_v18  ;;  %v4479_v58 = vadd.f32 %v3340_v2, %v2455_v15  ;;  %v4441_v38 = vpop.f32.mrb[26].mxu0 }
 0x33b   : > { %3633 = vst.msk [vmem:[%s6746_s25 + $0x5c] sm:$0xf] %vm3609_vm14, %v4016_v7  ;;  %v3436_v37 = vmul.f32 %v4478_v5, %v6733_v1  ;;  %v4480_v23 = vadd.f32 %v4441_v38, %v4321_v21  ;;  %v3343_v51 = vpop.f32.mrb[27].mxu0 }
 0x33c   : > { %3631 = vst.msk [vmem:[%s6746_s25 + $0x54] sm:$0xf] %vm3609_vm14, %v4014_v50  ;;  %v3434_v39 = vmul.f32 %v4479_v58, %v6733_v1  ;;  %v4481_v14 = vadd.f32 %v3343_v51, %v2458_v29 }
 0x33d   : > { %v3475_v0 = vadd.f32 %v6735_v52, %v3436_v37  ;;  %v3437_v31 = vmul.f32 %v4480_v23, %v6733_v1 }
 0x33e   : > { %v3473_v54 = vadd.f32 %v6735_v52, %v3434_v39  ;;  %v3435_v32 = vmul.f32 %v4481_v14, %v6733_v1 }
 0x33f   : > { %v4019_v41 = vpack.c.bf16 %v3475_v0, %v3475_v0  ;;  %v3476_v4 = vadd.f32 %v6735_v52, %v3437_v31 }
 0x340   : > { %v4017_v53 = vpack.c.bf16 %v3473_v54, %v3473_v54  ;;  %v3474_v22 = vadd.f32 %v6735_v52, %v3435_v32  ;;  %v4444_v10 = vpop.f32.mrb[28].mxu0 }
 0x341   : > { %3636 = vst.msk [vmem:[%s6746_s25 + $0x68] sm:$0xf] %vm3609_vm14, %v4019_v41  ;;  %v4020_v34 = vpack.c.bf16 %v3476_v4, %v3476_v4  ;;  %v4482_v28 = vadd.f32 %v4444_v10, %v4324_v62  ;;  %v3356_v55 = vpop.f32.mrb[29].mxu0 }
 0x342   : > { %3634 = vst.msk [vmem:[%s6746_s25 + $0x60] sm:$0xf] %vm3609_vm14, %v4017_v53  ;;  %v4018_v40 = vpack.c.bf16 %v3474_v22, %v3474_v22  ;;  %v4483_v30 = vadd.f32 %v3356_v55, %v2471_v35  ;;  %v4445_v3 = vpop.f32.mrb[30].mxu0 }
 0x343   : > { %3637 = vst.msk [vmem:[%s6746_s25 + $0x6c] sm:$0xf] %vm3609_vm14, %v4020_v34  ;;  %v3440_v11 = vmul.f32 %v4482_v28, %v6733_v1  ;;  %v4484_v59 = vadd.f32 %v4445_v3, %v4325_v56  ;;  %v3359_v15 = vpop.f32.mrb[31].mxu0 }
 0x344   : > { %3635 = vst.msk [vmem:[%s6746_s25 + $0x64] sm:$0xf] %vm3609_vm14, %v4018_v40  ;;  %v3438_v49 = vmul.f32 %v4483_v30, %v6733_v1  ;;  %v4485_v27 = vadd.f32 %v3359_v15, %v2474_v61 }
 0x345   : > { %v3479_v21 = vadd.f32 %v6735_v52, %v3440_v11  ;;  %v3441_v33 = vmul.f32 %v4484_v59, %v6733_v1 }
 0x346   : > { %v3477_v44 = vadd.f32 %v6735_v52, %v3438_v49  ;;  %v3439_v29 = vmul.f32 %v4485_v27, %v6733_v1 }
 0x347   : > { %v4023_v42 = vpack.c.bf16 %v3479_v21, %v3479_v21  ;;  %v3480_v57 = vadd.f32 %v6735_v52, %v3441_v33 }
 0x348   : > { %v4021_v25 = vpack.c.bf16 %v3477_v44, %v3477_v44  ;;  %v3478_v60 = vadd.f32 %v6735_v52, %v3439_v29 }
 0x349   : > { %3640 = vst.msk [vmem:[%s6746_s25 + $0x78] sm:$0xf] %vm3609_vm14, %v4023_v42  ;;  %v4024_v6 = vpack.c.bf16 %v3480_v57, %v3480_v57 }
 0x34a   : > { %3638 = vst.msk [vmem:[%s6746_s25 + $0x70] sm:$0xf] %vm3609_vm14, %v4021_v25  ;;  %v4022_v1 = vpack.c.bf16 %v3478_v60, %v3478_v60 }
 0x34b   : > { %3641 = vst.msk [vmem:[%s6746_s25 + $0x7c] sm:$0xf] %vm3609_vm14, %v4024_v6 }
 0x34c   : > { %3639 = vst.msk [vmem:[%s6746_s25 + $0x74] sm:$0xf] %vm3609_vm14, %v4022_v1 }
 0x34d   : > { %4963 = shalt.err (!%p4960_p4)
}
 0x34e   : > { %s4964_s23 = scalar_lea.hbm %s6873_s13, 2048  ;;  %s4968_s6 = scalar_lea.hbm %s6929_s4, 4096 }
 0x34f   : > { %p4965_p9 = scmp.ne.s32.totalorder %s6873_s13, %s4964_s23  ;;  %p4969_p8 = scmp.lt.u32.totalorder %s6873_s13, %s6929_s4 }
 0x350   : > { %p4970_p13 = scmp.lt.u32.totalorder %s4968_s6, %s4964_s23  ;;  %p4972_p10 = scmp.lt.u32.totalorder %s4964_s23, %s6873_s13 }
 0x351   : > { %p4966_p0 = pnand %p4965_p9, %p5215_p5 }
 0x352   : > { %p4971_p6 = por %p4970_p13, %p4969_p8 }
 0x353   : > { %p4967_p11 = pneg %p4966_p0 }
 0x354   : > { %p4973_p3 = por %p4972_p10, %p4971_p6 }
 0x356   : > { %p4974_p7 = pnand %p4973_p3, %p4967_p11 }
 0x358   : > { %4977 = shalt.err (!%p4974_p7)
}
 0x359   : > { %s5039_s25 = smov 64   ;;  %s5040_s8 = smov 4  }
 0x35a   : > { %4671 = dma.vmem_to_hbm [thread:$0]  (%p5215_p5), %s6875_s29, 2048, %s6873_s13, %s3643_s19, %s5039_s25, %s5039_s25, %s5040_s8  }
 0x35b PF: > { %s3671_s30 = sand.u32 1, %s5012_s15   ;;  %p6947_p12 = scmp.ne.s32.totalorder %s6934_s22, 0 }
 0x35c   : > { %p6948_p1 = scmp.ge.s32.totalorder %s5024_s18, 2  ;;  %s3672_s11 = scalar_lea.sflag [#allocation4], %s3671_s30 }
 0x35e   : > { %p4688_p2 = pnand %p6948_p1, %p6947_p12 }
 0x360   : > { %5007 = dma.done.wait (!%p4688_p2), %s3672_s11, 2048  }
 0x361   : > { %5009 = vsyncadd (!%p4688_p2), %s3672_s11, 4294965248  ;;  %p19_p4 = scmp.ge.s32.totalorder %s5201_s10, 4   ;;  %s6949_s15 = smov %s5016_s16 }
 0x362   : > { %s6950_s16 = smov %s5020_s17  ;;  %s6951_s17 = smov %s5211_s24 }
 0x363   : > { %s6952_s18 = smov %s5201_s10  ;;  %21 = sbr.rel (!%p19_p4) target bundleno = 7 (0x7), region = 93 }
 0x36a   :  { %3677 = vsyncpa [#allocation3], 1 }
 0x36b   :  { %3679 = vsyncpa [#allocation3 + $0x1], 1 }
 0x36c   :  { %3680 = vsyncpa [#allocation6], 1 }
 0x36d   :  { %3681 = vsyncpa [#allocation9], 1 }
 0x36e   :  { %3682 = vsyncpa [#allocation4], 1 }
 0x36f   :  { %3684 = vsyncpa [#allocation4 + $0x1], 1 }

</bundles_post_ra>
